<compile_context>
chip_gen: v7x
topology: tpu7x:2x2x1
jax: 0.10.0
libtpu: 0.0.40
codegen_flags: <defaults>
</compile_context>

<pallas_src>
import jax
import jax.numpy as jnp
import numpy as np
from jax.experimental import pallas as pl
from jax.experimental.pallas import tpu as pltpu


def ilm_kernel(x_ref, wih_ref, whh_ref, b_ref, wdec_ref, bdec_ref,
               abias_ref, penalty_ref,
               logits_ref, raw_ref, fh_ref):
    """One batch-group of the forward pass.

    x_ref      : (BB, T, I)    batch-first input slice for this batch group
    wih_ref    : (I, 4H)       LSTM input weights, pre-transposed (i,f,g,o)
    whh_ref    : (H, 4H)       LSTM recurrent weights, pre-transposed
    b_ref      : (1, 4H)       b_ih + b_hh
    wdec_ref   : (H, Opad)     decoder weights, pre-transposed, lane-padded
    bdec_ref   : (1, Opad)
    abias_ref  : (1, H)        anchor_bias
    penalty_ref: (1, Opad)     precomputed (1 - mask) * (-1e9), 0 in pad lanes
    logits_ref : (BB, Opad)    gated logits (lane-padded)
    raw_ref    : (BB, Opad)    raw logits (lane-padded)
    fh_ref     : (BB, Hpad)    final_hidden, zero-padded to 128 lanes
    """
    BB, T, I = x_ref.shape
    H = whh_ref.shape[0]
    H_pad = fh_ref.shape[1]

    # --- Fused input projection (single MXU push, register-resident) --------
    # x (BB,T,I) -> (BB*T, I): T == 8 sublanes, so this collapse is
    # layout-preserving. One matmul replaces T tiny pushes + a VMEM scratch.
    x2d = x_ref[...].reshape(BB * T, I)
    gx2d = (jnp.dot(x2d, wih_ref[...], preferred_element_type=jnp.float32)
            + b_ref[...])                              # (BB*T, 4H)
    gx = gx2d.reshape(BB, T, 4 * H)                    # (BB, T, 4H), free split

    whh = whh_ref[...]

    # --- LSTM recurrence: fully unrolled static loop (T small & static) -----
    # The gx[:, t, :] sublane extractions do not depend on h, so the scheduler
    # hoists them off the serial h @ W_hh dependency chain. Gate elementwise
    # math stays f32; nonlinearities are taken over the full (BB,4H) tile
    # (EUP slot is otherwise idle) and then statically lane-sliced.
    h = jnp.zeros((BB, H), jnp.float32)
    c = jnp.zeros((BB, H), jnp.float32)
    for t in range(T):
        gates = gx[:, t, :] + jnp.dot(h, whh, preferred_element_type=jnp.float32)
        sg = jax.nn.sigmoid(gates)                     # full-tile EUP
        tg = jnp.tanh(gates)                           # full-tile EUP
        i = sg[:, 0:H]
        f = sg[:, H:2 * H]
        g = tg[:, 2 * H:3 * H]
        o = sg[:, 3 * H:4 * H]
        c = f * c + i * g
        h = o * jnp.tanh(c)

    # --- anchor bias + decoder + ethical gate --------------------------------
    final_hidden = h + abias_ref[...]                                # (BB, H)
    raw = (jnp.dot(final_hidden, wdec_ref[...],
                   preferred_element_type=jnp.float32)
           + bdec_ref[...])                                          # (BB, Opad)

    raw_ref[...] = raw
    # EthicalGate.filter_logits: single add of the precomputed penalty.
    # TODO(synk): classifier-based gating (use_classifier=True) not implemented.
    logits_ref[...] = raw + penalty_ref[...]

    # Lane-dense final_hidden store: pad H -> Hpad (128) with zeros so the
    # store is a full-lane vst; wrapper slices back to H.
    if H_pad == H:
        fh_ref[...] = final_hidden
    else:
        fh_ref[...] = jnp.concatenate(
            [final_hidden, jnp.zeros((BB, H_pad - H), jnp.float32)], axis=1)


def integrated_learning_module_forward(x, params, *, batch_block=None,
                                        core_parallel=False):
    """x: (B, T, I) float32 (batch_first, like the PyTorch module).

    batch_block=None -> whole batch in one program (best on single-TC v5e/v6e).
    On v7x, pass batch_block=B//2 and core_parallel=True to pin the two batch
    groups onto the two TensorCores.
    """
    B, T, I = x.shape
    H = params["w_hh_t"].shape[0]
    O = params["output_size"]
    O_pad = params["w_dec_t_pad"].shape[1]
    H_pad = ((H + 127) // 128) * 128

    bb = B if batch_block is None else min(batch_block, B)
    assert B % bb == 0, "batch must be a multiple of the batch block"
    grid = (B // bb,)

    if grid[0] == 1:
        sem = ("arbitrary",)
    elif core_parallel:
        sem = (pltpu.CORE_PARALLEL,)   # v7x: split batch groups across TCs
    else:
        sem = ("parallel",)

    out_shapes = (
        jax.ShapeDtypeStruct((B, O_pad), jnp.float32),  # gated logits (padded)
        jax.ShapeDtypeStruct((B, O_pad), jnp.float32),  # raw logits (padded)
        jax.ShapeDtypeStruct((B, H_pad), jnp.float32),  # final_hidden (padded)
    )
    in_specs = [
        pl.BlockSpec((bb, T, I), lambda g: (g, 0, 0)),       # x batch-group slice
        pl.BlockSpec((I, 4 * H), lambda g: (0, 0)),          # w_ih_t (invariant)
        pl.BlockSpec((H, 4 * H), lambda g: (0, 0)),          # w_hh_t
        pl.BlockSpec((1, 4 * H), lambda g: (0, 0)),          # b_gates
        pl.BlockSpec((H, O_pad), lambda g: (0, 0)),          # w_dec_t (padded)
        pl.BlockSpec((1, O_pad), lambda g: (0, 0)),          # b_dec (padded)
        pl.BlockSpec((1, H), lambda g: (0, 0)),              # anchor_bias
        pl.BlockSpec((1, O_pad), lambda g: (0, 0)),          # ethical penalty
    ]
    out_specs = (
        pl.BlockSpec((bb, O_pad), lambda g: (g, 0)),
        pl.BlockSpec((bb, O_pad), lambda g: (g, 0)),
        pl.BlockSpec((bb, H_pad), lambda g: (g, 0)),
    )

    logits_pad, raw_pad, fh_pad = pl.pallas_call(
        ilm_kernel,
        out_shape=out_shapes,
        grid=grid,
        in_specs=in_specs,
        out_specs=out_specs,
        compiler_params=pltpu.CompilerParams(dimension_semantics=sem),
    )(x,
      params["w_ih_t"], params["w_hh_t"], params["b_gates"],
      params["w_dec_t_pad"], params["b_dec_pad"],
      params["anchor_bias"], params["penalty_pad"])

    # Slice padded lane axes back (wrapper-side, trivial).
    return logits_pad[:, :O], raw_pad[:, :O], fh_pad[:, :H]


def make_params(key, input_size, hidden_size, output_size, vocab_size,
                disallowed_tokens):
    """Deterministic synthetic init mirroring the PyTorch module's shapes."""
    ks = jax.random.split(key, 6)
    k_lstm = 1.0 / np.sqrt(hidden_size)
    k_dec = 1.0 / np.sqrt(hidden_size)

    # PyTorch LSTM weights: weight_ih (4H, I), weight_hh (4H, H), biases (4H,)
    w_ih = jax.random.uniform(ks[0], (4 * hidden_size, input_size),
                              jnp.float32, -k_lstm, k_lstm)
    w_hh = jax.random.uniform(ks[1], (4 * hidden_size, hidden_size),
                              jnp.float32, -k_lstm, k_lstm)
    b_ih = jax.random.uniform(ks[2], (4 * hidden_size,), jnp.float32,
                              -k_lstm, k_lstm)
    b_hh = jax.random.uniform(ks[3], (4 * hidden_size,), jnp.float32,
                              -k_lstm, k_lstm)
    # decoder: Linear(hidden_size, output_size)
    w_dec = jax.random.uniform(ks[4], (output_size, hidden_size), jnp.float32,
                               -k_dec, k_dec)
    b_dec = jax.random.uniform(ks[5], (output_size,), jnp.float32,
                               -k_dec, k_dec)

    # anchor_bias initialized to zeros in the module's __init__
    anchor_bias = jnp.zeros((hidden_size,), jnp.float32)

    # ethical mask: 1 everywhere, 0 at disallowed tokens
    mask = np.ones((vocab_size,), np.float32)
    for tok in disallowed_tokens:
        if 0 <= tok < vocab_size:
            mask[tok] = 0.0
    mask = jnp.asarray(mask)

    # Lane-dense padding of the output/vocab axis to a multiple of 128 so the
    # kernel's logits stores are unmasked full-lane vst's. Pad lanes carry
    # zero weights/bias and zero ethical penalty, and are sliced off outside.
    o_pad = ((output_size + 127) // 128) * 128
    pad = o_pad - output_size
    w_dec_t = jnp.transpose(w_dec)                              # (H, O)
    w_dec_t_pad = jnp.pad(w_dec_t, ((0, 0), (0, pad)))          # (H, Opad)
    b_dec_pad = jnp.pad(b_dec, (0, pad)).reshape(1, -1)         # (1, Opad)
    mask_pad = jnp.pad(mask, (0, pad),
                       constant_values=1.0).reshape(1, -1)      # (1, Opad)
    penalty_pad = (1.0 - mask_pad) * (-1e9)                     # (1, Opad)

    return {
        "output_size": output_size,
        "w_ih_t": jnp.transpose(w_ih),                  # (I, 4H)
        "w_hh_t": jnp.transpose(w_hh),                  # (H, 4H)
        "b_gates": (b_ih + b_hh).reshape(1, -1),        # (1, 4H)
        "anchor_bias": anchor_bias.reshape(1, -1),      # (1, H)
        # unpadded versions (used by the pure-JAX reference):
        "w_dec_t": w_dec_t,                             # (H, O)
        "b_dec": b_dec.reshape(1, -1),                  # (1, O)
        "ethical_mask": mask.reshape(1, -1),            # (1, O)
        # padded versions (fed to the kernel):
        "w_dec_t_pad": w_dec_t_pad,
        "b_dec_pad": b_dec_pad,
        "penalty_pad": penalty_pad,
    }


def reference_forward(x, params):
    """Pure-JAX reference implementing the same math (for verification)."""
    B, T, _ = x.shape
    H = params["w_hh_t"].shape[0]
    h = jnp.zeros((B, H), jnp.float32)
    c = jnp.zeros((B, H), jnp.float32)
    for t in range(T):
        gates = (x[:, t, :] @ params["w_ih_t"]
                 + h @ params["w_hh_t"] + params["b_gates"])
        i = jax.nn.sigmoid(gates[:, 0:H])
        f = jax.nn.sigmoid(gates[:, H:2 * H])
        g = jnp.tanh(gates[:, 2 * H:3 * H])
        o = jax.nn.sigmoid(gates[:, 3 * H:4 * H])
        c = f * c + i * g
        h = o * jnp.tanh(c)
    final_hidden = h + params["anchor_bias"]
    logits = final_hidden @ params["w_dec_t"] + params["b_dec"]
    gated = logits + (1.0 - params["ethical_mask"]) * (-1e9)
    return gated, logits, final_hidden


if __name__ == "__main__":
    # Small shapes consistent with the module; batch 16 fills the f32 sublanes
    # and is processed as a single program (grid=(1,)) per the perf review.
    B, T, I, H, O = 16, 8, 16, 32, 64
    disallowed = [0, 5, 63]

    key = jax.random.PRNGKey(0)
    kx, kp = jax.random.split(key)
    x = jax.random.normal(kx, (B, T, I), dtype=jnp.float32)
    params = make_params(kp, I, H, O, O, disallowed)

    logits, raw_logits, final_hidden = jax.block_until_ready(
        integrated_learning_module_forward(x, params))

    ref_logits, ref_raw, ref_fh = reference_forward(x, params)
    np.testing.assert_allclose(np.asarray(final_hidden), np.asarray(ref_fh),
                               rtol=1e-5, atol=1e-5)
    np.testing.assert_allclose(np.asarray(raw_logits), np.asarray(ref_raw),
                               rtol=1e-5, atol=1e-5)
    np.testing.assert_allclose(np.asarray(logits), np.asarray(ref_logits),
                               rtol=1e-5, atol=1e-4)

    print("KERNEL_OK")
</pallas_src>

<mosaic_0001>
module attributes {stable_mosaic.version = 11 : i64} {
  func.func @ilm_kernel(%arg0: i32, %arg1: memref<16x8x16xf32, #tpu.memory_space<vmem>>, %arg2: memref<16x128xf32, #tpu.memory_space<vmem>>, %arg3: memref<32x128xf32, #tpu.memory_space<vmem>>, %arg4: memref<1x128xf32, #tpu.memory_space<vmem>>, %arg5: memref<32x128xf32, #tpu.memory_space<vmem>>, %arg6: memref<1x128xf32, #tpu.memory_space<vmem>>, %arg7: memref<1x32xf32, #tpu.memory_space<vmem>>, %arg8: memref<1x128xf32, #tpu.memory_space<vmem>>, %arg9: memref<16x128xf32, #tpu.memory_space<vmem>>, %arg10: memref<16x128xf32, #tpu.memory_space<vmem>>, %arg11: memref<16x128xf32, #tpu.memory_space<vmem>>) attributes {dimension_semantics = [#tpu.dimension_semantics<arbitrary>], iteration_bounds = array<i64: 1>, scalar_prefetch = 0 : i64, scratch_operands = 0 : i64, tpu.core_type = #tpu.core_type<tc>, window_params = [{transform_indices = @transform_0, window_bounds = array<i64: 16, 8, 16>}, {pipeline_mode = #tpu.pipeline_mode<synchronous>, transform_indices = @transform_1, window_bounds = array<i64: 16, 128>}, {pipeline_mode = #tpu.pipeline_mode<synchronous>, transform_indices = @transform_2, window_bounds = array<i64: 32, 128>}, {pipeline_mode = #tpu.pipeline_mode<synchronous>, transform_indices = @transform_3, window_bounds = array<i64: 1, 128>}, {pipeline_mode = #tpu.pipeline_mode<synchronous>, transform_indices = @transform_4, window_bounds = array<i64: 32, 128>}, {pipeline_mode = #tpu.pipeline_mode<synchronous>, transform_indices = @transform_5, window_bounds = array<i64: 1, 128>}, {pipeline_mode = #tpu.pipeline_mode<synchronous>, transform_indices = @transform_6, window_bounds = array<i64: 1, 32>}, {pipeline_mode = #tpu.pipeline_mode<synchronous>, transform_indices = @transform_7, window_bounds = array<i64: 1, 128>}, {transform_indices = @transform_8, window_bounds = array<i64: 16, 128>}, {transform_indices = @transform_9, window_bounds = array<i64: 16, 128>}, {transform_indices = @transform_10, window_bounds = array<i64: 16, 128>}]} {
    %c0 = arith.constant 0 : index
    %c0_0 = arith.constant 0 : index
    %c0_1 = arith.constant 0 : index
    %0 = vector.load %arg1[%c0, %c0_0, %c0_1] : memref<16x8x16xf32, #tpu.memory_space<vmem>>, vector<16x8x16xf32>
    %1 = vector.shape_cast %0 : vector<16x8x16xf32> to vector<128x16xf32>
    %c0_2 = arith.constant 0 : index
    %c0_3 = arith.constant 0 : index
    %2 = vector.load %arg2[%c0_2, %c0_3] : memref<16x128xf32, #tpu.memory_space<vmem>>, vector<16x128xf32>
    %cst = arith.constant dense<0.000000e+00> : vector<128x128xf32>
    %3 = tpu.matmul %1, %2, %cst {dimension_numbers = #tpu.dot_dimension_numbers<[1], [0], [0], [1], [0, 0, 1, 1], [], []>} : vector<128x16xf32>, vector<16x128xf32>, vector<128x128xf32> -> vector<128x128xf32>
    %c0_4 = arith.constant 0 : index
    %c0_5 = arith.constant 0 : index
    %4 = vector.load %arg4[%c0_4, %c0_5] : memref<1x128xf32, #tpu.memory_space<vmem>>, vector<1x128xf32>
    %5 = vector.broadcast %4 : vector<1x128xf32> to vector<128x128xf32>
    %6 = arith.addf %3, %5 : vector<128x128xf32>
    %7 = vector.shape_cast %6 : vector<128x128xf32> to vector<16x8x128xf32>
    %c0_6 = arith.constant 0 : index
    %c0_7 = arith.constant 0 : index
    %8 = vector.load %arg3[%c0_6, %c0_7] : memref<32x128xf32, #tpu.memory_space<vmem>>, vector<32x128xf32>
    %cst_8 = arith.constant 0.000000e+00 : f32
    %9 = vector.broadcast %cst_8 : f32 to vector<16x32xf32>
    %cst_9 = arith.constant 0.000000e+00 : f32
    %10 = vector.broadcast %cst_9 : f32 to vector<16x32xf32>
    %11 = vector.extract_strided_slice %7 {offsets = [0, 0, 0], sizes = [16, 1, 128], strides = [1, 1, 1]} : vector<16x8x128xf32> to vector<16x1x128xf32>
    %12 = vector.shape_cast %11 : vector<16x1x128xf32> to vector<16x128xf32>
    %cst_10 = arith.constant dense<0.000000e+00> : vector<16x128xf32>
    %13 = tpu.matmul %9, %8, %cst_10 {dimension_numbers = #tpu.dot_dimension_numbers<[1], [0], [0], [1], [0, 0, 1, 1], [], []>} : vector<16x32xf32>, vector<32x128xf32>, vector<16x128xf32> -> vector<16x128xf32>
    %14 = arith.addf %12, %13 : vector<16x128xf32>
    %15 = arith.negf %14 : vector<16x128xf32>
    %16 = math.exp %15 : vector<16x128xf32>
    %cst_11 = arith.constant 1.000000e+00 : f32
    %17 = vector.broadcast %cst_11 : f32 to vector<16x128xf32>
    %18 = arith.addf %17, %16 : vector<16x128xf32>
    %19 = arith.divf %17, %18 : vector<16x128xf32>
    %20 = math.tanh %14 : vector<16x128xf32>
    %21 = vector.extract_strided_slice %19 {offsets = [0, 0], sizes = [16, 32], strides = [1, 1]} : vector<16x128xf32> to vector<16x32xf32>
    %22 = vector.extract_strided_slice %19 {offsets = [0, 32], sizes = [16, 32], strides = [1, 1]} : vector<16x128xf32> to vector<16x32xf32>
    %23 = vector.extract_strided_slice %20 {offsets = [0, 64], sizes = [16, 32], strides = [1, 1]} : vector<16x128xf32> to vector<16x32xf32>
    %24 = vector.extract_strided_slice %19 {offsets = [0, 96], sizes = [16, 32], strides = [1, 1]} : vector<16x128xf32> to vector<16x32xf32>
    %25 = arith.mulf %22, %10 : vector<16x32xf32>
    %26 = arith.mulf %21, %23 : vector<16x32xf32>
    %27 = arith.addf %25, %26 : vector<16x32xf32>
    %28 = math.tanh %27 : vector<16x32xf32>
    %29 = arith.mulf %24, %28 : vector<16x32xf32>
    %30 = vector.extract_strided_slice %7 {offsets = [0, 1, 0], sizes = [16, 1, 128], strides = [1, 1, 1]} : vector<16x8x128xf32> to vector<16x1x128xf32>
    %31 = vector.shape_cast %30 : vector<16x1x128xf32> to vector<16x128xf32>
    %cst_12 = arith.constant dense<0.000000e+00> : vector<16x128xf32>
    %32 = tpu.matmul %29, %8, %cst_12 {dimension_numbers = #tpu.dot_dimension_numbers<[1], [0], [0], [1], [0, 0, 1, 1], [], []>} : vector<16x32xf32>, vector<32x128xf32>, vector<16x128xf32> -> vector<16x128xf32>
    %33 = arith.addf %31, %32 : vector<16x128xf32>
    %34 = arith.negf %33 : vector<16x128xf32>
    %35 = math.exp %34 : vector<16x128xf32>
    %cst_13 = arith.constant 1.000000e+00 : f32
    %36 = vector.broadcast %cst_13 : f32 to vector<16x128xf32>
    %37 = arith.addf %36, %35 : vector<16x128xf32>
    %38 = arith.divf %36, %37 : vector<16x128xf32>
    %39 = math.tanh %33 : vector<16x128xf32>
    %40 = vector.extract_strided_slice %38 {offsets = [0, 0], sizes = [16, 32], strides = [1, 1]} : vector<16x128xf32> to vector<16x32xf32>
    %41 = vector.extract_strided_slice %38 {offsets = [0, 32], sizes = [16, 32], strides = [1, 1]} : vector<16x128xf32> to vector<16x32xf32>
    %42 = vector.extract_strided_slice %39 {offsets = [0, 64], sizes = [16, 32], strides = [1, 1]} : vector<16x128xf32> to vector<16x32xf32>
    %43 = vector.extract_strided_slice %38 {offsets = [0, 96], sizes = [16, 32], strides = [1, 1]} : vector<16x128xf32> to vector<16x32xf32>
    %44 = arith.mulf %41, %27 : vector<16x32xf32>
    %45 = arith.mulf %40, %42 : vector<16x32xf32>
    %46 = arith.addf %44, %45 : vector<16x32xf32>
    %47 = math.tanh %46 : vector<16x32xf32>
    %48 = arith.mulf %43, %47 : vector<16x32xf32>
    %49 = vector.extract_strided_slice %7 {offsets = [0, 2, 0], sizes = [16, 1, 128], strides = [1, 1, 1]} : vector<16x8x128xf32> to vector<16x1x128xf32>
    %50 = vector.shape_cast %49 : vector<16x1x128xf32> to vector<16x128xf32>
    %cst_14 = arith.constant dense<0.000000e+00> : vector<16x128xf32>
    %51 = tpu.matmul %48, %8, %cst_14 {dimension_numbers = #tpu.dot_dimension_numbers<[1], [0], [0], [1], [0, 0, 1, 1], [], []>} : vector<16x32xf32>, vector<32x128xf32>, vector<16x128xf32> -> vector<16x128xf32>
    %52 = arith.addf %50, %51 : vector<16x128xf32>
    %53 = arith.negf %52 : vector<16x128xf32>
    %54 = math.exp %53 : vector<16x128xf32>
    %cst_15 = arith.constant 1.000000e+00 : f32
    %55 = vector.broadcast %cst_15 : f32 to vector<16x128xf32>
    %56 = arith.addf %55, %54 : vector<16x128xf32>
    %57 = arith.divf %55, %56 : vector<16x128xf32>
    %58 = math.tanh %52 : vector<16x128xf32>
    %59 = vector.extract_strided_slice %57 {offsets = [0, 0], sizes = [16, 32], strides = [1, 1]} : vector<16x128xf32> to vector<16x32xf32>
    %60 = vector.extract_strided_slice %57 {offsets = [0, 32], sizes = [16, 32], strides = [1, 1]} : vector<16x128xf32> to vector<16x32xf32>
    %61 = vector.extract_strided_slice %58 {offsets = [0, 64], sizes = [16, 32], strides = [1, 1]} : vector<16x128xf32> to vector<16x32xf32>
    %62 = vector.extract_strided_slice %57 {offsets = [0, 96], sizes = [16, 32], strides = [1, 1]} : vector<16x128xf32> to vector<16x32xf32>
    %63 = arith.mulf %60, %46 : vector<16x32xf32>
    %64 = arith.mulf %59, %61 : vector<16x32xf32>
    %65 = arith.addf %63, %64 : vector<16x32xf32>
    %66 = math.tanh %65 : vector<16x32xf32>
    %67 = arith.mulf %62, %66 : vector<16x32xf32>
    %68 = vector.extract_strided_slice %7 {offsets = [0, 3, 0], sizes = [16, 1, 128], strides = [1, 1, 1]} : vector<16x8x128xf32> to vector<16x1x128xf32>
    %69 = vector.shape_cast %68 : vector<16x1x128xf32> to vector<16x128xf32>
    %cst_16 = arith.constant dense<0.000000e+00> : vector<16x128xf32>
    %70 = tpu.matmul %67, %8, %cst_16 {dimension_numbers = #tpu.dot_dimension_numbers<[1], [0], [0], [1], [0, 0, 1, 1], [], []>} : vector<16x32xf32>, vector<32x128xf32>, vector<16x128xf32> -> vector<16x128xf32>
    %71 = arith.addf %69, %70 : vector<16x128xf32>
    %72 = arith.negf %71 : vector<16x128xf32>
    %73 = math.exp %72 : vector<16x128xf32>
    %cst_17 = arith.constant 1.000000e+00 : f32
    %74 = vector.broadcast %cst_17 : f32 to vector<16x128xf32>
    %75 = arith.addf %74, %73 : vector<16x128xf32>
    %76 = arith.divf %74, %75 : vector<16x128xf32>
    %77 = math.tanh %71 : vector<16x128xf32>
    %78 = vector.extract_strided_slice %76 {offsets = [0, 0], sizes = [16, 32], strides = [1, 1]} : vector<16x128xf32> to vector<16x32xf32>
    %79 = vector.extract_strided_slice %76 {offsets = [0, 32], sizes = [16, 32], strides = [1, 1]} : vector<16x128xf32> to vector<16x32xf32>
    %80 = vector.extract_strided_slice %77 {offsets = [0, 64], sizes = [16, 32], strides = [1, 1]} : vector<16x128xf32> to vector<16x32xf32>
    %81 = vector.extract_strided_slice %76 {offsets = [0, 96], sizes = [16, 32], strides = [1, 1]} : vector<16x128xf32> to vector<16x32xf32>
    %82 = arith.mulf %79, %65 : vector<16x32xf32>
    %83 = arith.mulf %78, %80 : vector<16x32xf32>
    %84 = arith.addf %82, %83 : vector<16x32xf32>
    %85 = math.tanh %84 : vector<16x32xf32>
    %86 = arith.mulf %81, %85 : vector<16x32xf32>
    %87 = vector.extract_strided_slice %7 {offsets = [0, 4, 0], sizes = [16, 1, 128], strides = [1, 1, 1]} : vector<16x8x128xf32> to vector<16x1x128xf32>
    %88 = vector.shape_cast %87 : vector<16x1x128xf32> to vector<16x128xf32>
    %cst_18 = arith.constant dense<0.000000e+00> : vector<16x128xf32>
    %89 = tpu.matmul %86, %8, %cst_18 {dimension_numbers = #tpu.dot_dimension_numbers<[1], [0], [0], [1], [0, 0, 1, 1], [], []>} : vector<16x32xf32>, vector<32x128xf32>, vector<16x128xf32> -> vector<16x128xf32>
    %90 = arith.addf %88, %89 : vector<16x128xf32>
    %91 = arith.negf %90 : vector<16x128xf32>
    %92 = math.exp %91 : vector<16x128xf32>
    %cst_19 = arith.constant 1.000000e+00 : f32
    %93 = vector.broadcast %cst_19 : f32 to vector<16x128xf32>
    %94 = arith.addf %93, %92 : vector<16x128xf32>
    %95 = arith.divf %93, %94 : vector<16x128xf32>
    %96 = math.tanh %90 : vector<16x128xf32>
    %97 = vector.extract_strided_slice %95 {offsets = [0, 0], sizes = [16, 32], strides = [1, 1]} : vector<16x128xf32> to vector<16x32xf32>
    %98 = vector.extract_strided_slice %95 {offsets = [0, 32], sizes = [16, 32], strides = [1, 1]} : vector<16x128xf32> to vector<16x32xf32>
    %99 = vector.extract_strided_slice %96 {offsets = [0, 64], sizes = [16, 32], strides = [1, 1]} : vector<16x128xf32> to vector<16x32xf32>
    %100 = vector.extract_strided_slice %95 {offsets = [0, 96], sizes = [16, 32], strides = [1, 1]} : vector<16x128xf32> to vector<16x32xf32>
    %101 = arith.mulf %98, %84 : vector<16x32xf32>
    %102 = arith.mulf %97, %99 : vector<16x32xf32>
    %103 = arith.addf %101, %102 : vector<16x32xf32>
    %104 = math.tanh %103 : vector<16x32xf32>
    %105 = arith.mulf %100, %104 : vector<16x32xf32>
    %106 = vector.extract_strided_slice %7 {offsets = [0, 5, 0], sizes = [16, 1, 128], strides = [1, 1, 1]} : vector<16x8x128xf32> to vector<16x1x128xf32>
    %107 = vector.shape_cast %106 : vector<16x1x128xf32> to vector<16x128xf32>
    %cst_20 = arith.constant dense<0.000000e+00> : vector<16x128xf32>
    %108 = tpu.matmul %105, %8, %cst_20 {dimension_numbers = #tpu.dot_dimension_numbers<[1], [0], [0], [1], [0, 0, 1, 1], [], []>} : vector<16x32xf32>, vector<32x128xf32>, vector<16x128xf32> -> vector<16x128xf32>
    %109 = arith.addf %107, %108 : vector<16x128xf32>
    %110 = arith.negf %109 : vector<16x128xf32>
    %111 = math.exp %110 : vector<16x128xf32>
    %cst_21 = arith.constant 1.000000e+00 : f32
    %112 = vector.broadcast %cst_21 : f32 to vector<16x128xf32>
    %113 = arith.addf %112, %111 : vector<16x128xf32>
    %114 = arith.divf %112, %113 : vector<16x128xf32>
    %115 = math.tanh %109 : vector<16x128xf32>
    %116 = vector.extract_strided_slice %114 {offsets = [0, 0], sizes = [16, 32], strides = [1, 1]} : vector<16x128xf32> to vector<16x32xf32>
    %117 = vector.extract_strided_slice %114 {offsets = [0, 32], sizes = [16, 32], strides = [1, 1]} : vector<16x128xf32> to vector<16x32xf32>
    %118 = vector.extract_strided_slice %115 {offsets = [0, 64], sizes = [16, 32], strides = [1, 1]} : vector<16x128xf32> to vector<16x32xf32>
    %119 = vector.extract_strided_slice %114 {offsets = [0, 96], sizes = [16, 32], strides = [1, 1]} : vector<16x128xf32> to vector<16x32xf32>
    %120 = arith.mulf %117, %103 : vector<16x32xf32>
    %121 = arith.mulf %116, %118 : vector<16x32xf32>
    %122 = arith.addf %120, %121 : vector<16x32xf32>
    %123 = math.tanh %122 : vector<16x32xf32>
    %124 = arith.mulf %119, %123 : vector<16x32xf32>
    %125 = vector.extract_strided_slice %7 {offsets = [0, 6, 0], sizes = [16, 1, 128], strides = [1, 1, 1]} : vector<16x8x128xf32> to vector<16x1x128xf32>
    %126 = vector.shape_cast %125 : vector<16x1x128xf32> to vector<16x128xf32>
    %cst_22 = arith.constant dense<0.000000e+00> : vector<16x128xf32>
    %127 = tpu.matmul %124, %8, %cst_22 {dimension_numbers = #tpu.dot_dimension_numbers<[1], [0], [0], [1], [0, 0, 1, 1], [], []>} : vector<16x32xf32>, vector<32x128xf32>, vector<16x128xf32> -> vector<16x128xf32>
    %128 = arith.addf %126, %127 : vector<16x128xf32>
    %129 = arith.negf %128 : vector<16x128xf32>
    %130 = math.exp %129 : vector<16x128xf32>
    %cst_23 = arith.constant 1.000000e+00 : f32
    %131 = vector.broadcast %cst_23 : f32 to vector<16x128xf32>
    %132 = arith.addf %131, %130 : vector<16x128xf32>
    %133 = arith.divf %131, %132 : vector<16x128xf32>
    %134 = math.tanh %128 : vector<16x128xf32>
    %135 = vector.extract_strided_slice %133 {offsets = [0, 0], sizes = [16, 32], strides = [1, 1]} : vector<16x128xf32> to vector<16x32xf32>
    %136 = vector.extract_strided_slice %133 {offsets = [0, 32], sizes = [16, 32], strides = [1, 1]} : vector<16x128xf32> to vector<16x32xf32>
    %137 = vector.extract_strided_slice %134 {offsets = [0, 64], sizes = [16, 32], strides = [1, 1]} : vector<16x128xf32> to vector<16x32xf32>
    %138 = vector.extract_strided_slice %133 {offsets = [0, 96], sizes = [16, 32], strides = [1, 1]} : vector<16x128xf32> to vector<16x32xf32>
    %139 = arith.mulf %136, %122 : vector<16x32xf32>
    %140 = arith.mulf %135, %137 : vector<16x32xf32>
    %141 = arith.addf %139, %140 : vector<16x32xf32>
    %142 = math.tanh %141 : vector<16x32xf32>
    %143 = arith.mulf %138, %142 : vector<16x32xf32>
    %144 = vector.extract_strided_slice %7 {offsets = [0, 7, 0], sizes = [16, 1, 128], strides = [1, 1, 1]} : vector<16x8x128xf32> to vector<16x1x128xf32>
    %145 = vector.shape_cast %144 : vector<16x1x128xf32> to vector<16x128xf32>
    %cst_24 = arith.constant dense<0.000000e+00> : vector<16x128xf32>
    %146 = tpu.matmul %143, %8, %cst_24 {dimension_numbers = #tpu.dot_dimension_numbers<[1], [0], [0], [1], [0, 0, 1, 1], [], []>} : vector<16x32xf32>, vector<32x128xf32>, vector<16x128xf32> -> vector<16x128xf32>
    %147 = arith.addf %145, %146 : vector<16x128xf32>
    %148 = arith.negf %147 : vector<16x128xf32>
    %149 = math.exp %148 : vector<16x128xf32>
    %cst_25 = arith.constant 1.000000e+00 : f32
    %150 = vector.broadcast %cst_25 : f32 to vector<16x128xf32>
    %151 = arith.addf %150, %149 : vector<16x128xf32>
    %152 = arith.divf %150, %151 : vector<16x128xf32>
    %153 = math.tanh %147 : vector<16x128xf32>
    %154 = vector.extract_strided_slice %152 {offsets = [0, 0], sizes = [16, 32], strides = [1, 1]} : vector<16x128xf32> to vector<16x32xf32>
    %155 = vector.extract_strided_slice %152 {offsets = [0, 32], sizes = [16, 32], strides = [1, 1]} : vector<16x128xf32> to vector<16x32xf32>
    %156 = vector.extract_strided_slice %153 {offsets = [0, 64], sizes = [16, 32], strides = [1, 1]} : vector<16x128xf32> to vector<16x32xf32>
    %157 = vector.extract_strided_slice %152 {offsets = [0, 96], sizes = [16, 32], strides = [1, 1]} : vector<16x128xf32> to vector<16x32xf32>
    %158 = arith.mulf %155, %141 : vector<16x32xf32>
    %159 = arith.mulf %154, %156 : vector<16x32xf32>
    %160 = arith.addf %158, %159 : vector<16x32xf32>
    %161 = math.tanh %160 : vector<16x32xf32>
    %162 = arith.mulf %157, %161 : vector<16x32xf32>
    %c0_26 = arith.constant 0 : index
    %c0_27 = arith.constant 0 : index
    %163 = vector.load %arg7[%c0_26, %c0_27] : memref<1x32xf32, #tpu.memory_space<vmem>>, vector<1x32xf32>
    %164 = vector.broadcast %163 : vector<1x32xf32> to vector<16x32xf32>
    %165 = arith.addf %162, %164 : vector<16x32xf32>
    %c0_28 = arith.constant 0 : index
    %c0_29 = arith.constant 0 : index
    %166 = vector.load %arg5[%c0_28, %c0_29] : memref<32x128xf32, #tpu.memory_space<vmem>>, vector<32x128xf32>
    %cst_30 = arith.constant dense<0.000000e+00> : vector<16x128xf32>
    %167 = tpu.matmul %165, %166, %cst_30 {dimension_numbers = #tpu.dot_dimension_numbers<[1], [0], [0], [1], [0, 0, 1, 1], [], []>} : vector<16x32xf32>, vector<32x128xf32>, vector<16x128xf32> -> vector<16x128xf32>
    %c0_31 = arith.constant 0 : index
    %c0_32 = arith.constant 0 : index
    %168 = vector.load %arg6[%c0_31, %c0_32] : memref<1x128xf32, #tpu.memory_space<vmem>>, vector<1x128xf32>
    %169 = vector.broadcast %168 : vector<1x128xf32> to vector<16x128xf32>
    %170 = arith.addf %167, %169 : vector<16x128xf32>
    %c0_33 = arith.constant 0 : index
    %c0_34 = arith.constant 0 : index
    %171 = vector.load %arg10[%c0_33, %c0_34] : memref<16x128xf32, #tpu.memory_space<vmem>>, vector<16x128xf32>
    tpu.vector_store %arg10[%c0_33, %c0_34], %170 {strides = array<i32>} : memref<16x128xf32, #tpu.memory_space<vmem>>, vector<16x128xf32>,
    %c0_35 = arith.constant 0 : index
    %c0_36 = arith.constant 0 : index
    %172 = vector.load %arg8[%c0_35, %c0_36] : memref<1x128xf32, #tpu.memory_space<vmem>>, vector<1x128xf32>
    %173 = vector.broadcast %172 : vector<1x128xf32> to vector<16x128xf32>
    %174 = arith.addf %170, %173 : vector<16x128xf32>
    %c0_37 = arith.constant 0 : index
    %c0_38 = arith.constant 0 : index
    %175 = vector.load %arg9[%c0_37, %c0_38] : memref<16x128xf32, #tpu.memory_space<vmem>>, vector<16x128xf32>
    tpu.vector_store %arg9[%c0_37, %c0_38], %174 {strides = array<i32>} : memref<16x128xf32, #tpu.memory_space<vmem>>, vector<16x128xf32>,
    %cst_39 = arith.constant 0.000000e+00 : f32
    %176 = vector.broadcast %cst_39 : f32 to vector<16x96xf32>
    %177 = tpu.concatenate %165, %176 in 1 : vector<16x32xf32>, vector<16x96xf32> -> vector<16x128xf32>
    %c0_40 = arith.constant 0 : index
    %c0_41 = arith.constant 0 : index
    %178 = vector.load %arg11[%c0_40, %c0_41] : memref<16x128xf32, #tpu.memory_space<vmem>>, vector<16x128xf32>
    tpu.vector_store %arg11[%c0_40, %c0_41], %177 {strides = array<i32>} : memref<16x128xf32, #tpu.memory_space<vmem>>, vector<16x128xf32>,
    return
  }
  func.func @transform_0(%arg0: i32) -> (i32, i32, i32) {
    %c0_i32 = arith.constant 0 : i32
    %c0_i32_0 = arith.constant 0 : i32
    %c0_i32_1 = arith.constant 0 : i32
    return %arg0, %c0_i32, %c0_i32_0 : i32, i32, i32
  }
  func.func @transform_1(%arg0: i32) -> (i32, i32) {
    %c0_i32 = arith.constant 0 : i32
    %c0_i32_0 = arith.constant 0 : i32
    %c0_i32_1 = arith.constant 0 : i32
    return %c0_i32, %c0_i32_0 : i32, i32
  }
  func.func @transform_2(%arg0: i32) -> (i32, i32) {
    %c0_i32 = arith.constant 0 : i32
    %c0_i32_0 = arith.constant 0 : i32
    %c0_i32_1 = arith.constant 0 : i32
    return %c0_i32, %c0_i32_0 : i32, i32
  }
  func.func @transform_3(%arg0: i32) -> (i32, i32) {
    %c0_i32 = arith.constant 0 : i32
    %c0_i32_0 = arith.constant 0 : i32
    %c0_i32_1 = arith.constant 0 : i32
    return %c0_i32, %c0_i32_0 : i32, i32
  }
  func.func @transform_4(%arg0: i32) -> (i32, i32) {
    %c0_i32 = arith.constant 0 : i32
    %c0_i32_0 = arith.constant 0 : i32
    %c0_i32_1 = arith.constant 0 : i32
    return %c0_i32, %c0_i32_0 : i32, i32
  }
  func.func @transform_5(%arg0: i32) -> (i32, i32) {
    %c0_i32 = arith.constant 0 : i32
    %c0_i32_0 = arith.constant 0 : i32
    %c0_i32_1 = arith.constant 0 : i32
    return %c0_i32, %c0_i32_0 : i32, i32
  }
  func.func @transform_6(%arg0: i32) -> (i32, i32) {
    %c0_i32 = arith.constant 0 : i32
    %c0_i32_0 = arith.constant 0 : i32
    %c0_i32_1 = arith.constant 0 : i32
    return %c0_i32, %c0_i32_0 : i32, i32
  }
  func.func @transform_7(%arg0: i32) -> (i32, i32) {
    %c0_i32 = arith.constant 0 : i32
    %c0_i32_0 = arith.constant 0 : i32
    %c0_i32_1 = arith.constant 0 : i32
    return %c0_i32, %c0_i32_0 : i32, i32
  }
  func.func @transform_8(%arg0: i32) -> (i32, i32) {
    %c0_i32 = arith.constant 0 : i32
    %c0_i32_0 = arith.constant 0 : i32
    return %arg0, %c0_i32 : i32, i32
  }
  func.func @transform_9(%arg0: i32) -> (i32, i32) {
    %c0_i32 = arith.constant 0 : i32
    %c0_i32_0 = arith.constant 0 : i32
    return %arg0, %c0_i32 : i32, i32
  }
  func.func @transform_10(%arg0: i32) -> (i32, i32) {
    %c0_i32 = arith.constant 0 : i32
    %c0_i32_0 = arith.constant 0 : i32
    return %arg0, %c0_i32 : i32, i32
  }
}

</mosaic_0001>

<bundles_post_ra>
// kernel: tpu_custom_call.1
= control target key start
LH: loop header
LB: loop body
LE: loop exit
PB: predicated region body
PF: predicated region fallthrough
CT: control target
= control target key end

     0   :  { %16 = vsyncpa [#allocation3], 0  ;;  %s9729_s0 = inlined_call_operand.hbm [shape: f32[16,8,16], index: 0, kind: input, shape index: {}]   ;;  %s9730_s1 = inlined_call_operand.hbm [shape: f32[16,128], index: 1, kind: input, shape index: {}]   ;;  %s9731_s2 = inlined_call_operand.hbm [shape: f32[32,128], index: 2, kind: input, shape index: {}]   ;;  %s9732_s3 = inlined_call_operand.vmem [shape: f32[1,128], index: 3, kind: input, shape index: {}]   ;;  %s9733_s4 = inlined_call_operand.hbm [shape: f32[32,128], index: 4, kind: input, shape index: {}]   ;;  %s9734_s5 = inlined_call_operand.vmem [shape: f32[1,128], index: 5, kind: input, shape index: {}]   ;;  %s9735_s6 = inlined_call_operand.vmem [shape: f32[1,32], index: 6, kind: input, shape index: {}]   ;;  %s9736_s7 = inlined_call_operand.vmem [shape: f32[1,128], index: 7, kind: input, shape index: {}]   ;;  %s9737_s8 = inlined_call_operand.hbm [shape: f32[16,128], index: 8, kind: output, shape index: {0}]   ;;  %s9738_s9 = inlined_call_operand.hbm [shape: f32[16,128], index: 9, kind: output, shape index: {1}]   ;;  %s9739_s10 = inlined_call_operand.hbm [shape: f32[16,128], index: 10, kind: output, shape index: {2}]  }
   0x1   :  { %17 = vsyncpa [#allocation6], 0 }
   0x2   :  { %18 = vsyncpa [#allocation9], 0 }
   0x3   :  { %19 = vsyncpa [#allocation4], 0 }
   0x4   :  { %20 = vsyncpa [#allocation12], 0  ;;  %s6987_s13 = smov [#allocation5]   ;;  %s6988_s15 = smov [#allocation2]  }
   0x5   :  { %s38_s14 = sshll.u32 %s6987_s13, 4  ;;  %s26_s16 = sshll.u32 %s6988_s15, 4  ;;  %s39_s14 = int_to_ptr.vmem [resolvable:$true] %s38_s14  ;;  %s7055_s16 = int_to_ptr.vmem [resolvable:$true] %s26_s16 }
   0x6   :  { %s6823_s19 = scalar_lea.hbm %s9730_s1, 256 }
   0x7   :  { %p6824_p0 = scmp.ne.s32.totalorder %s9730_s1, %s6823_s19  ;;  %p6827_p1 = scmp.lt.u32.totalorder %s6823_s19, %s9730_s1 }
   0x9   :  { %p6829_p2 = pnand %p6827_p1, %p6824_p0 }
   0xb   :  { %6832 = shalt.err (!%p6829_p2)
}
   0xc   :  { %s6833_s24 = scalar_lea.vmem %s39_s14, 256  ;;  %p6838_p4 = scmp.lt.s32.totalorder %s39_s14, %s39_s14 }
   0xd   :  { %p6834_p3 = scmp.ne.s32.totalorder %s39_s14, %s6833_s24  ;;  %p6839_p5 = scmp.lt.s32.totalorder %s6833_s24, %s6833_s24 }
   0xf   :  { %p6840_p6 = por %p6839_p5, %p6838_p4 }
  0x11   :  { %p6841_p7 = pnand %p6840_p6, %p6834_p3 }
  0x13   :  { %6844 = shalt.err (!%p6841_p7)
}
  0x14   :  { %s6989_s25 = smov 128   ;;  %s6990_s26 = smov 8  }
  0x15   :  { %44 = dma.hbm_to_vmem [thread:$0]  %s9730_s1, 256, %s39_s14, [#allocation6], %s6989_s25, %s6989_s25, %s6990_s26  }
  0x16   :  { %s6845_s11 = scalar_lea.hbm %s9729_s0, 2048 }
  0x17   :  { %p6846_p8 = scmp.ne.s32.totalorder %s9729_s0, %s6845_s11  ;;  %p6849_p9 = scmp.lt.u32.totalorder %s6845_s11, %s9729_s0 }
  0x19   :  { %p6851_p10 = pnand %p6849_p9, %p6846_p8 }
  0x1b   :  { %6854 = shalt.err (!%p6851_p10)
}
  0x1c   :  { %s6855_s18 = scalar_lea.vmem %s7055_s16, 2048  ;;  %p6860_p12 = scmp.lt.s32.totalorder %s7055_s16, %s7055_s16 }
  0x1d   :  { %p6856_p11 = scmp.ne.s32.totalorder %s7055_s16, %s6855_s18  ;;  %p6861_p13 = scmp.lt.s32.totalorder %s6855_s18, %s6855_s18 }
  0x1f   :  { %p6862_p0 = por %p6861_p13, %p6860_p12 }
  0x21   :  { %p6863_p1 = pnand %p6862_p0, %p6856_p11 }
  0x23   :  { %6866 = shalt.err (!%p6863_p1)
}
  0x24   :  { %32 = dma.hbm_to_vmem [thread:$0]  %s9729_s0, 2048, %s7055_s16, [#allocation3], %s6989_s25, %s6989_s25, %s6990_s26  }
  0x25   :  { %s6991_s19 = smov [#allocation7]   ;;  %s6992_s21 = smov [#allocation8]  }
  0x26   :  { %s50_s20 = sshll.u32 %s6991_s19, 4  ;;  %s64_s22 = sshll.u32 %s6992_s21, 4  ;;  %s51_s20 = int_to_ptr.vmem [resolvable:$true] %s50_s20  ;;  %s7092_s22 = int_to_ptr.vmem [resolvable:$true] %s64_s22 }
  0x27   :  { %s6867_s27 = scalar_lea.hbm %s9731_s2, 512 }
  0x28   :  { %p6868_p2 = scmp.ne.s32.totalorder %s9731_s2, %s6867_s27  ;;  %p6871_p3 = scmp.lt.u32.totalorder %s6867_s27, %s9731_s2 }
  0x2a   :  { %p6873_p4 = pnand %p6871_p3, %p6868_p2 }
  0x2c   :  { %6876 = shalt.err (!%p6873_p4)
}
  0x2d   :  { %s6877_s0 = scalar_lea.vmem %s51_s20, 512  ;;  %p6882_p6 = scmp.lt.s32.totalorder %s51_s20, %s51_s20 }
  0x2e   :  { %p6878_p5 = scmp.ne.s32.totalorder %s51_s20, %s6877_s0  ;;  %p6883_p7 = scmp.lt.s32.totalorder %s6877_s0, %s6877_s0 }
  0x30   :  { %p6884_p8 = por %p6883_p7, %p6882_p6 }
  0x32   :  { %p6885_p9 = pnand %p6884_p8, %p6878_p5 }
  0x34   :  { %6888 = shalt.err (!%p6885_p9)
}
  0x35   :  { %56 = dma.hbm_to_vmem [thread:$0]  %s9731_s2, 512, %s51_s20, [#allocation6], %s6989_s25, %s6989_s25, %s6990_s26  }
  0x36   :  { %s6889_s17 = scalar_lea.hbm %s9733_s4, 512 }
  0x37   :  { %p6890_p10 = scmp.ne.s32.totalorder %s9733_s4, %s6889_s17  ;;  %p6893_p11 = scmp.lt.u32.totalorder %s6889_s17, %s9733_s4 }
  0x39   :  { %p6895_p12 = pnand %p6893_p11, %p6890_p10 }
  0x3b   :  { %6898 = shalt.err (!%p6895_p12)
}
  0x3c   :  { %s6899_s21 = scalar_lea.vmem %s7092_s22, 512  ;;  %p6904_p0 = scmp.lt.s32.totalorder %s7092_s22, %s7092_s22 }
  0x3d   :  { %p6900_p13 = scmp.ne.s32.totalorder %s7092_s22, %s6899_s21  ;;  %p6905_p1 = scmp.lt.s32.totalorder %s6899_s21, %s6899_s21 }
  0x3f   :  { %p6906_p2 = por %p6905_p1, %p6904_p0 }
  0x41   :  { %p6907_p3 = pnand %p6906_p2, %p6900_p13 }
  0x43   :  { %6910 = shalt.err (!%p6907_p3)
}
  0x44   :  { %70 = dma.hbm_to_vmem [thread:$0]  %s9733_s4, 512, %s7092_s22, [#allocation9], %s6989_s25, %s6989_s25, %s6990_s26  }
  0x45   :  { %6977 = dma.done.wait [#allocation3], 2048  }
  0x46   :  { %6978 = vsyncadd [#allocation3], 4294965248 }
  0x47   :  { %6979 = dma.done.wait [#allocation6], 768  }
  0x48   :  { %6980 = vsyncadd [#allocation6], 4294966528 }
  0x49   :  { %6981 = dma.done.wait [#allocation9], 512  }
  0x4a   :  { %6982 = vsyncadd [#allocation9], 4294966784  ;;  %v6993_v0 = vmov 0.0   ;;  %vm114_vm0 = vcmask 130048   ;;  %v105_v1 = vld [vmem:[#allocation5] sm:$0xff]  ;;  %v106_v2 = vld [vmem:[#allocation5 + $0x8] sm:$0xff] }
  0x4b   :  { %5619 = vmatprep.mubr.f32.mxu1 %v6993_v0  ;;  %v308_v3 = vld [vmem:[#allocation7] sm:$0xff]  ;;  %v5710_v4 = vpack.c.bf16 %v106_v2, %v105_v1  ;;  %v309_v5 = vld [vmem:[#allocation7 + $0x8] sm:$0xff]  ;;  %v89_v6 = vld [vmem:[#allocation2] sm:$0xff]  ;;  %s6995_s23 = smov 32   ;;  %vm840_vm1 = vcmask 1041409   ;;  %vm843_vm2 = vcmask 1042434  }
  0x4c   :  { %v7129_v7 = vpack.c.bf16 %v309_v5, %v308_v3  ;;  %5587 = vmatprep.mubr.msk.f32.mxu0 %vm114_vm0, %v89_v6  ;;  %v310_v8 = vld [vmem:[#allocation7 + $0x10] sm:$0xff]  ;;  %v311_v9 = vld [vmem:[#allocation7 + $0x18] sm:$0xff]  ;;  %v91_v12 = vld [vmem:[#allocation2 + $0x10] sm:$0xff]  ;;  %vm846_vm3 = vcmask 1043459   ;;  %vm849_vm4 = vcmask 1044484   ;;  %vm852_vm5 = vcmask 1045509  }
  0x4d   :  { %5711 = vmatprep.subr.bf16.mxu0 %v5710_v4  ;;  %v7132_v10 = vpack.c.bf16 %v311_v9, %v310_v8  ;;  %v90_v11 = vld [vmem:[#allocation2 + $0x8] sm:$0xff]  ;;  %v92_v13 = vld [vmem:[#allocation2 + $0x18] sm:$0xff]  ;;  %v93_v14 = vld [vmem:[#allocation2 + $0x20] sm:$0xff]  ;;  %vm855_vm6 = vcmask 1046534   ;;  %vm858_vm7 = vcmask 1047559   ;;  %vm312_vm8 = vcmask 261120  }
  0x4e   :  { %5715 = vmatprep.subr.bf16.mxu1 %v7129_v7  ;;  %5713 = vmatpush3.bf16.msra.mxu0 %v5710_v4  ;;  %v94_v15 = vld [vmem:[#allocation2 + $0x28] sm:$0xff]  ;;  %v95_v16 = vld [vmem:[#allocation2 + $0x30] sm:$0xff]  ;;  %v96_v17 = vld [vmem:[#allocation2 + $0x38] sm:$0xff]  ;;  %s6996_s28 = smov 96   ;;  %s6997_s30 = smov [#allocation11]  }
  0x4f   :  { %5717 = vmatpush3.bf16.msra.mxu1 %v7129_v7  ;;  %5747 = vmatprep.subr.bf16.mxu0 %v7129_v7  ;;  %v97_v18 = vld [vmem:[#allocation2 + $0x40] sm:$0xff]  ;;  %v98_v19 = vld [vmem:[#allocation2 + $0x48] sm:$0xff]  ;;  %v99_v20 = vld [vmem:[#allocation2 + $0x50] sm:$0xff]  ;;  %s5314_s11 = sshll.u32 %s6997_s30, 4  ;;  %s6998_s12 = smov [#allocation13]   ;;  %s5315_s11 = int_to_ptr.vmem [resolvable:$true] %s5314_s11 }
  0x50   :  { %5719 = vmatprep.subr.bf16.mxu1 %v7132_v10  ;;  %v100_v21 = vld [vmem:[#allocation2 + $0x58] sm:$0xff]  ;;  %v101_v22 = vld [vmem:[#allocation2 + $0x60] sm:$0xff]  ;;  %v102_v23 = vld [vmem:[#allocation2 + $0x68] sm:$0xff]  ;;  %s5326_s13 = sshll.u32 %s6998_s12, 4  ;;  %s6999_s15 = smov [#allocation10]   ;;  %s9670_s13 = int_to_ptr.vmem [resolvable:$true] %s5326_s13 }
  0x51   :  { %5588 = vmatmul.mubr.msk.f32.vlgmr.msra.gmra.mrb[0].mxu0 %vm114_vm0, %v90_v11  ;;  %v103_v24 = vld [vmem:[#allocation2 + $0x70] sm:$0xff]  ;;  %v104_v25 = vld [vmem:[#allocation2 + $0x78] sm:$0xff]  ;;  %v7166_v28 = vld [vmem:[%s9732_s3] ss:$0 sm:$0xff]  ;;  %s6994_s3 = smov 64   ;;  %s5302_s17 = sshll.u32 %s6999_s15, 4  ;;  %s9672_s17 = int_to_ptr.vmem [resolvable:$true] %s5302_s17 }
  0x52   :  { %5590 = vmatprep.mubr.msk.f32.mxu0 %vm114_vm0, %v91_v12  ;;  %5749 = vmatpush3.bf16.msra.mxu0 %v7129_v7  ;;  %p6916_p5 = scmp.lt.s32.totalorder %s5315_s11, %s5315_s11 }
  0x53   :  { %5721 = vmatpush3.bf16.msra.mxu1 %v7132_v10  ;;  %5751 = vmatprep.subr.bf16.mxu0 %v7132_v10 }
  0x54   :  { %5723 = vmatprep.subr.bf16.mxu1 %v7129_v7 }
  0x55   :  { %5591 = vmatmul.mubr.msk.f32.gmra.mrb[2].mxu0 %vm114_vm0, %v92_v13 }
  0x56   :  { %5620 = vmatmul.mubr.f32.vlgmr.msra.gmra.mrb[0].mxu1 %v6993_v0  ;;  %5593 = vmatprep.mubr.msk.f32.mxu0 %vm114_vm0, %v93_v14 }
  0x57   :  { %5725 = vmatpush3.bf16.msra.mxu1 %v7129_v7  ;;  %5753 = vmatpush3.bf16.msra.mxu0 %v7132_v10 }
  0x58   :  { %5727 = vmatprep.subr.bf16.mxu1 %v7132_v10  ;;  %5763 = vmatprep.subr.bf16.mxu0 %v7129_v7 }
  0x59   :  { %5594 = vmatmul.mubr.msk.f32.gmra.mrb[4].mxu0 %vm114_vm0, %v94_v15 }
  0x5a   :  { %5596 = vmatprep.mubr.msk.f32.mxu0 %vm114_vm0, %v95_v16 }
  0x5b   :  { %5729 = vmatpush3.bf16.msra.mxu1 %v7132_v10 }
  0x5c   :  { %5731 = vmatprep.subr.bf16.mxu1 %v7129_v7 }
  0x5d   :  { %5597 = vmatmul.mubr.msk.f32.gmra.mrb[6].mxu0 %vm114_vm0, %v96_v17 }
  0x5e   :  { %5599 = vmatprep.mubr.msk.f32.mxu0 %vm114_vm0, %v97_v18 }
  0x61   :  { %5600 = vmatmul.mubr.msk.f32.gmra.mrb[8].mxu0 %vm114_vm0, %v98_v19 }
  0x62   :  { %5602 = vmatprep.mubr.msk.f32.mxu0 %vm114_vm0, %v99_v20 }
  0x65   :  { %5603 = vmatmul.mubr.msk.f32.gmra.mrb[10].mxu0 %vm114_vm0, %v100_v21 }
  0x66   :  { %5605 = vmatprep.mubr.msk.f32.mxu0 %vm114_vm0, %v101_v22 }
  0x69   :  { %5606 = vmatmul.mubr.msk.f32.gmra.mrb[12].mxu0 %vm114_vm0, %v102_v23 }
  0x6a   :  { %5608 = vmatprep.mubr.msk.f32.mxu0 %vm114_vm0, %v103_v24 }
  0x6d   :  { %5609 = vmatmul.mubr.msk.f32.gmra.mrb[14].mxu0 %vm114_vm0, %v104_v25 }
 0x124   :  { %v5589_v26 = vpop.f32.mrb[0].mxu0 }
 0x125   :  { %v229_v27 = vpop.f32.mrb[1].mxu0  ;;  %v7176_v35 = vadd.f32 %v5589_v26, %v7166_v28 }
 0x126   :  { %v7169_v30 = vadd.f32 %v7166_v28, %v229_v27 }
 0x128   :  { %v5592_v29 = vpop.f32.mrb[2].mxu0 }
 0x129   :  { %v7171_v31 = vpop.f32.mrb[0].mxu1  ;;  %v239_v32 = vpop.f32.mrb[3].mxu0  ;;  %v7203_v50 = vadd.f32 %v5592_v29, %v7166_v28 }
 0x12a   :  { %v7173_v33 = vpop.f32.mrb[1].mxu1  ;;  %v7188_v41 = vadd.f32 %v7166_v28, %v239_v32  ;;  %v400_v56 = vrot.slane %v7171_v31, 1  ;;  %v402_v3 = vrot.slane %v7171_v31, 3  ;;  %v404_v14 = vrot.slane %v7171_v31, 5 }
 0x12b   :  { %v7180_v37 = vadd.f32 %v7173_v33, %v7169_v30  ;;  %v393_v38 = vrot.slane %v7173_v33, 1  ;;  %v394_v42 = vrot.slane %v7173_v33, 2  ;;  %v397_v45 = vrot.slane %v7173_v33, 5 }
 0x12c   :  { %v5595_v34 = vpop.f32.mrb[4].mxu0  ;;  %v398_v47 = vrot.slane %v7173_v33, 6  ;;  %v395_v51 = vrot.slane %v7173_v33, 3  ;;  %v396_v63 = vrot.slane %v7173_v33, 4  ;;  %v401_v17 = vrot.slane %v7171_v31, 2 }
 0x12d   :  { %v249_v36 = vpop.f32.mrb[5].mxu0  ;;  %5799 = vtanh.f32 %v7180_v37  ;;  %v7185_v39 = vadd.f32 %v5595_v34, %v7166_v28  ;;  %v7192_v44 = vadd.f32 %v393_v38, %v7176_v35  ;;  %v7207_v52 = vadd.f32 %v394_v42, %v7188_v41 }
 0x12e   :  { %v7219_v59 = vadd.f32 %v395_v51, %v7203_v50  ;;  %v7223_v60 = vadd.f32 %v7166_v28, %v249_v36  ;;  %v399_v24 = vrot.slane %v7173_v33, 7  ;;  %v403_v26 = vrot.slane %v7171_v31, 4 }
 0x12f   :  { %v7200_v49 = vadd.f32 %v397_v45, %v7185_v39  ;;  %5801 = vtanh.f32 %v7192_v44  ;;  %v406_v36 = vrot.slane %v7171_v31, 7 }
 0x130   :  { %v5598_v40 = vpop.f32.mrb[6].mxu0  ;;  %v7240_v5 = vadd.f32 %v396_v63, %v7223_v60 }
 0x131   :  { %v259_v43 = vpop.f32.mrb[7].mxu0  ;;  %5803 = vtanh.f32 %v7200_v49  ;;  %v7266_v21 = vadd.f32 %v5598_v40, %v7166_v28  ;;  %v405_v40 = vrot.slane %v7171_v31, 6  ;;  %v5369_v63 = vmul.f32 -1.442695, %v7200_v49 }
 0x132   :  { %v7196_v46 = vadd.f32 %v7166_v28, %v259_v43  ;;  %5805 = vtanh.f32 %v7207_v52 }
 0x133   :  { %v430_v32 = vadd.f32 %v399_v24, %v7266_v21 }
 0x134   :  { %v5601_v48 = vpop.f32.mrb[8].mxu0  ;;  %v7214_v55 = vadd.f32 %v398_v47, %v7196_v46 }
 0x135   :  { %v269_v53 = vpop.f32.mrb[9].mxu0  ;;  %v7211_v54 = vadd.f32 %v5601_v48, %v7166_v28 }
 0x136   :  { %5807 = vtanh.f32 %v7214_v55  ;;  %v7235_v1 = vadd.f32 %v7166_v28, %v269_v53 }
 0x137   :  { %v5800_v58 = vpop.eup %5799  ;;  %v7228_v62 = vadd.f32 %v400_v56, %v7211_v54  ;;  %5809 = vtanh.f32 %v7219_v59 }
 0x138   :  { %v5604_v57 = vpop.f32.mrb[10].mxu0  ;;  %583 = vrot.lane.b32.xlu1 %v5800_v58, %s6994_s3  ;;  %v7255_v13 = vadd.f32 %v7171_v31, %v7235_v1  ;;  %v5365_v58 = vmul.f32 -1.442695, %v7192_v44 }
 0x139   :  { %v279_v61 = vpop.f32.mrb[11].mxu0  ;;  %v7232_v0 = vadd.f32 %v5604_v57, %v7166_v28  ;;  %5811 = vtanh.f32 %v7228_v62  ;;  %v5802_v6 = vpop.eup %5801  ;;  %v5364_v57 = vmul.f32 -1.442695, %v7180_v37 }
 0x13a   :  { %585 = vrot.lane.b32.xlu0 %v5802_v6, %s6994_s3  ;;  %v7251_v11 = vadd.f32 %v7166_v28, %v279_v61  ;;  %5813 = vtanh.f32 %v7240_v5  ;;  %v5366_v61 = vmul.f32 -1.442695, %v7207_v52  ;;  %v5372_v44 = vmul.f32 -1.442695, %v7255_v13 }
 0x13b   :  { %v7247_v9 = vadd.f32 %v402_v3, %v7232_v0  ;;  %v5804_v16 = vpop.eup %5803  ;;  %v5367_v3 = vmul.f32 -1.442695, %v7219_v59  ;;  %v5373_v52 = vmul.f32 -1.442695, %v7228_v62 }
 0x13c   :  { %v5607_v2 = vpop.f32.mrb[12].mxu0  ;;  %v5806_v18 = vpop.eup %5805  ;;  %593 = vrot.lane.b32.xlu1 %v5804_v16, %s6994_s3  ;;  %v7271_v22 = vadd.f32 %v401_v17, %v7251_v11 }
 0x13d   :  { %v289_v4 = vpop.f32.mrb[13].mxu0  ;;  %v7244_v8 = vadd.f32 %v5607_v2, %v7166_v28  ;;  %5815 = vtanh.f32 %v7247_v9 }
 0x13e   :  { %587 = vrot.lane.b32.xlu0 %v5806_v18, %s6994_s3  ;;  %5817 = vtanh.f32 %v7255_v13  ;;  %v7274_v23 = vadd.f32 %v7166_v28, %v289_v4  ;;  %v5370_v4 = vmul.f32 -1.442695, %v7214_v55  ;;  %v5374_v59 = vmul.f32 -1.442695, %v7271_v22 }
 0x13f   :  { %v7263_v19 = vadd.f32 %v404_v14, %v7244_v8  ;;  %v5375_v55 = vmul.f32 -1.442695, %v7247_v9  ;;  %v5371_v18 = vmul.f32 -1.442695, %v430_v32 }
 0x140   :  { %v5610_v12 = vpop.f32.mrb[14].mxu0  ;;  %v5808_v20 = vpop.eup %5807  ;;  %v7290_v33 = vadd.f32 %v403_v26, %v7274_v23 }
 0x141   :  { %v299_v15 = vpop.f32.mrb[15].mxu0  ;;  %v5810_v25 = vpop.eup %5809  ;;  %595 = vrot.lane.b32.xlu1 %v5808_v20, %s6994_s3  ;;  %5819 = vtanh.f32 %v7263_v19  ;;  %v7281_v29 = vadd.f32 %v5610_v12, %v7166_v28  ;;  %v5368_v12 = vmul.f32 -1.442695, %v7240_v5  ;;  %v5377_v17 = vmul.f32 -1.442695, %v7263_v19 }
 0x142   :  { %589 = vrot.lane.b32.xlu0 %v5810_v25, %s6994_s3  ;;  %5821 = vtanh.f32 %v7271_v22  ;;  %v7287_v34 = vadd.f32 %v7166_v28, %v299_v15  ;;  %v5376_v9 = vmul.f32 -1.442695, %v7290_v33 }
 0x143   :  { %v5812_v27 = vpop.eup %5811  ;;  %5823 = vtanh.f32 %v430_v32  ;;  %v7297_v42 = vadd.f32 %v406_v36, %v7281_v29 }
 0x144   :  { %v5814_v38 = vpop.eup %5813  ;;  %5825 = vtanh.f32 %v7290_v33  ;;  %v7301_v28 = vadd.f32 %v405_v40, %v7287_v34 }
 0x145   :  { %601 = vrot.lane.b32.xlu1 %v5812_v27, %s6994_s3  ;;  %5827 = vtanh.f32 %v7297_v42  ;;  %v5379_v27 = vmul.f32 -1.442695, %v7297_v42 }
 0x146   :  { %591 = vrot.lane.b32.xlu0 %v5814_v38, %s6994_s3  ;;  %5829 = vtanh.f32 %v7301_v28 }
 0x147   :  { %v5816_v43 = vpop.eup %5815  ;;  %5831 = vpow2.f32 %v5364_v57 }
 0x148   :  { %v5818_v45 = vpop.eup %5817  ;;  %5833 = vpow2.f32 %v5365_v58 }
 0x149   :  { %599 = vrot.lane.b32.xlu1 %v5818_v45, %s6994_s3  ;;  %5835 = vpow2.f32 %v5366_v61 }
 0x14a   :  { %605 = vrot.lane.b32.xlu0 %v5816_v43, %s6994_s3  ;;  %5837 = vpow2.f32 %v5369_v63  ;;  %v5378_v43 = vmul.f32 -1.442695, %v7301_v28 }
 0x14b   :  { %v5820_v31 = vpop.eup %5819  ;;  %5839 = vpow2.f32 %v5367_v3 }
 0x14c   :  { %v5822_v47 = vpop.eup %5821  ;;  %5841 = vpow2.f32 %v5370_v4 }
 0x14d   :  { %603 = vrot.lane.b32.xlu1 %v5822_v47, %s6994_s3  ;;  %v5824_v48 = vpop.eup %5823 }
 0x14e   :  { %609 = vrot.lane.b32.xlu0 %v5820_v31, %s6994_s3  ;;  %v5826_v51 = vpop.eup %5825 }
 0x14f   :  { %v5828_v53 = vpop.eup %5827 }
 0x150   :  { %v5830_v56 = vpop.eup %5829 }
 0x151   :  { %597 = vrot.lane.b32.xlu1 %v5824_v48, %s6994_s3  ;;  %v5832_v2 = vpop.eup %5831 }
 0x152   :  { %607 = vrot.lane.b32.xlu0 %v5826_v51, %s6994_s3  ;;  %v487_v6 = vadd.f32 1.0, %v5832_v2  ;;  %v5834_v37 = vpop.eup %5833 }
 0x153   :  { %v488_v49 = vadd.f32 1.0, %v5834_v37  ;;  %v5836_v14 = vpop.eup %5835 }
 0x154   :  { %5843 = vrcp.f32 %v487_v6  ;;  %v5838_v15 = vpop.eup %5837  ;;  %v489_v16 = vadd.f32 1.0, %v5836_v14 }
 0x155   :  { %613 = vrot.lane.b32.xlu1 %v5828_v53, %s6994_s3  ;;  %5845 = vpow2.f32 %v5368_v12  ;;  %v5840_v5 = vpop.eup %5839  ;;  %v492_v20 = vadd.f32 1.0, %v5838_v15 }
 0x156   :  { %611 = vrot.lane.b32.xlu0 %v5830_v56, %s6994_s3  ;;  %5847 = vpow2.f32 %v5372_v44  ;;  %v5842_v13 = vpop.eup %5841  ;;  %v490_v25 = vadd.f32 1.0, %v5840_v5 }
 0x157   :  { %5849 = vpow2.f32 %v5373_v52  ;;  %v493_v19 = vadd.f32 1.0, %v5842_v13 }
 0x158   :  { %5851 = vrcp.f32 %v488_v49 }
 0x159   :  { %5853 = vpow2.f32 %v5374_v59 }
 0x15a   :  { %5855 = vpow2.f32 %v5375_v55 }
 0x15b   :  { %5857 = vrcp.f32 %v489_v16 }
 0x15c   :  { %5859 = vpow2.f32 %v5377_v17 }
 0x15d   :  { %5861 = vpow2.f32 %v5371_v18 }
 0x15e   :  { %v7325_v62 = vpop.eup %5843  ;;  %5863 = vrcp.f32 %v492_v20 }
 0x15f   :  { %v5846_v22 = vpop.eup %5845  ;;  %5865 = vrcp.f32 %v490_v25 }
 0x160   :  { %v5848_v32 = vpop.eup %5847  ;;  %v491_v36 = vadd.f32 1.0, %v5846_v22  ;;  %5867 = vpow2.f32 %v5376_v9 }
 0x161   :  { %v5850_v38 = vpop.eup %5849  ;;  %5869 = vpow2.f32 %v5379_v27  ;;  %v495_v42 = vadd.f32 1.0, %v5848_v32 }
 0x162   :  { %v7331_v40 = vpop.eup %5851  ;;  %5871 = vrcp.f32 %v493_v19  ;;  %v496_v47 = vadd.f32 1.0, %v5850_v38 }
 0x163   :  { %v5854_v31 = vpop.eup %5853  ;;  %5873 = vrcp.f32 %v491_v36 }
 0x164   :  { %v5856_v48 = vpop.eup %5855  ;;  %5875 = vpow2.f32 %v5378_v43  ;;  %v497_v58 = vadd.f32 1.0, %v5854_v31 }
 0x165   :  { %v7336_v53 = vpop.eup %5857  ;;  %5877 = vrcp.f32 %v495_v42  ;;  %v498_v63 = vadd.f32 1.0, %v5856_v48 }
 0x166   :  { %v5860_v57 = vpop.eup %5859  ;;  %5879 = vrcp.f32 %v496_v47 }
 0x167   :  { %v5862_v61 = vpop.eup %5861  ;;  %5881 = vrcp.f32 %v497_v58  ;;  %v500_v14 = vadd.f32 1.0, %v5860_v57 }
 0x168   :  { %v7339_v2 = vpop.eup %5863  ;;  %v494_v52 = vadd.f32 1.0, %v5862_v61  ;;  %5883 = vrcp.f32 %v498_v63 }
 0x169   :  { %v7342_v4 = vpop.eup %5865 }
 0x16a   :  { %v5868_v12 = vpop.eup %5867  ;;  %5885 = vrcp.f32 %v494_v52 }
 0x16b   :  { %v5870_v49 = vpop.eup %5869  ;;  %5887 = vrcp.f32 %v500_v14  ;;  %v499_v20 = vadd.f32 1.0, %v5868_v12 }
 0x16c   :  { %v7346_v59 = vpop.eup %5871  ;;  %v502_v18 = vadd.f32 1.0, %v5870_v49  ;;  %v552_v49 = vmul.f32 0.0, %v7331_v40 }
 0x16d   :  { %v7350_v15 = vpop.eup %5873 }
 0x16e   :  { %v5876_v13 = vpop.eup %5875  ;;  %5889 = vrcp.f32 %v502_v18 }
 0x16f   :  { %5891 = vrcp.f32 %v499_v20  ;;  %v501_v19 = vadd.f32 1.0, %v5876_v13  ;;  %v554_v13 = vmul.f32 0.0, %v7342_v4  ;;  %v556_v20 = vmul.f32 0.0, %v7339_v2 }
 0x171   :  { %5893 = vrcp.f32 %v501_v19  ;;  %v555_v19 = vmul.f32 0.0, %v7350_v15 }
 0x1aa   :  { %v584_v24 = vpop.permute.xlu1 %583 }
 0x1ab   :  { %v631_v26 = vmul.f32 %v7325_v62, %v584_v24  ;;  %v7354_v24 = vpop.eup %5877 }
 0x1ac   :  { %v586_v33 = vpop.permute.xlu0 %585  ;;  %v7358_v22 = vpop.eup %5879 }
 0x1ad   :  { %663 = vrot.lane.b32.xlu1 %v631_v26, %s6995_s23  ;;  %v632_v45 = vmul.f32 %v7331_v40, %v586_v33  ;;  %v7362_v32 = vpop.eup %5881 }
 0x1ae   :  { %v594_v51 = vpop.permute.xlu1 %593  ;;  %v7366_v38 = vpop.eup %5883 }
 0x1af   :  { %665 = vrot.lane.b32.xlu0 %v632_v45, %s6995_s23  ;;  %v636_v37 = vmul.f32 %v7339_v2, %v594_v51  ;;  %v7370_v42 = vpop.eup %5885 }
 0x1b0   :  { %v588_v56 = vpop.permute.xlu0 %587  ;;  %v7374_v47 = vpop.eup %5887 }
 0x1b1   :  { %v633_v28 = vmul.f32 %v7336_v53, %v588_v56  ;;  %v7378_v57 = vpop.eup %5889 }
 0x1b2   :  { %v7382_v58 = vpop.eup %5891 }
 0x1b3   :  { %667 = vrot.lane.b32.xlu1 %v633_v28, %s6995_s23  ;;  %v596_v3 = vpop.permute.xlu1 %595 }
 0x1b4   :  { %v590_v6 = vpop.permute.xlu0 %589  ;;  %v637_v5 = vmul.f32 %v7346_v59, %v596_v3 }
 0x1b5   :  { %v634_v44 = vmul.f32 %v7342_v4, %v590_v6  ;;  %v7388_v6 = vpop.eup %5893 }
 0x1b7   :  { %669 = vrot.lane.b32.xlu0 %v634_v44, %s6995_s23  ;;  %673 = vrot.lane.b32.xlu1 %v636_v37, %s6995_s23  ;;  %v602_v55 = vpop.permute.xlu1 %601  ;;  %v551_v37 = vmul.f32 0.0, %v7325_v62 }
 0x1b8   :  { %v592_v16 = vpop.permute.xlu0 %591  ;;  %v640_v27 = vmul.f32 %v7358_v22, %v602_v55 }
 0x1b9   :  { %v635_v17 = vmul.f32 %v7350_v15, %v592_v16  ;;  %v553_v16 = vmul.f32 0.0, %v7336_v53 }
 0x1bb   :  { %671 = vrot.lane.b32.xlu0 %v635_v17, %s6995_s23  ;;  %675 = vrot.lane.b32.xlu1 %v637_v5, %s6995_s23  ;;  %v600_v25 = vpop.permute.xlu1 %599 }
 0x1bc   :  { %v606_v9 = vpop.permute.xlu0 %605  ;;  %v639_v26 = vmul.f32 %v7354_v24, %v600_v25 }
 0x1bd   :  { %v642_v45 = vmul.f32 %v7366_v38, %v606_v9 }
 0x1bf   :  { %681 = vrot.lane.b32.xlu0 %v640_v27, %s6995_s23  ;;  %679 = vrot.lane.b32.xlu1 %v639_v26, %s6995_s23  ;;  %v604_v36 = vpop.permute.xlu1 %603 }
 0x1c0   :  { %v610_v43 = vpop.permute.xlu0 %609  ;;  %v641_v33 = vmul.f32 %v7362_v32, %v604_v36  ;;  %v557_v36 = vmul.f32 0.0, %v7346_v59 }
 0x1c1   :  { %v644_v56 = vmul.f32 %v7374_v47, %v610_v43 }
 0x1c3   :  { %685 = vrot.lane.b32.xlu0 %v642_v45, %s6995_s23  ;;  %683 = vrot.lane.b32.xlu1 %v641_v33, %s6995_s23  ;;  %v598_v31 = vpop.permute.xlu1 %597 }
 0x1c4   :  { %v608_v48 = vpop.permute.xlu0 %607  ;;  %v638_v51 = vmul.f32 %v7370_v42, %v598_v31 }
 0x1c5   :  { %v643_v63 = vmul.f32 %v7382_v58, %v608_v48 }
 0x1c7   :  { %689 = vrot.lane.b32.xlu0 %v644_v56, %s6995_s23  ;;  %677 = vrot.lane.b32.xlu1 %v638_v51, %s6995_s23  ;;  %v614_v28 = vpop.permute.xlu1 %613  ;;  %v560_v51 = vmul.f32 0.0, %v7358_v22  ;;  %v559_v56 = vmul.f32 0.0, %v7354_v24 }
 0x1c8   :  { %v646_v61 = vmul.f32 %v7378_v57, %v614_v28  ;;  %v612_v3 = vpop.permute.xlu0 %611 }
 0x1c9   :  { %v645_v12 = vmul.f32 %v7388_v6, %v612_v3 }
 0x1cb   :  { %687 = vrot.lane.b32.xlu0 %v643_v63, %s6995_s23  ;;  %693 = vrot.lane.b32.xlu1 %v646_v61, %s6995_s23 }
 0x1cf   :  { %691 = vrot.lane.b32.xlu0 %v645_v12, %s6995_s23 }
 0x21f   :  { %v664_v44 = vpop.permute.xlu1 %663 }
 0x220   :  { %v7393_v52 = vadd.f32 %v664_v44, %v551_v37  ;;  %v562_v37 = vmul.f32 0.0, %v7366_v38  ;;  %v561_v44 = vmul.f32 0.0, %v7362_v32 }
 0x221   :  { %v666_v14 = vpop.permute.xlu0 %665 }
 0x222   :  { %5895 = vtanh.f32 %v7393_v52  ;;  %v7397_v55 = vadd.f32 %v666_v14, %v552_v49 }
 0x224   :  { %5897 = vtanh.f32 %v7397_v55 }
 0x225   :  { %v668_v5 = vpop.permute.xlu1 %667 }
 0x226   :  { %v7401_v17 = vadd.f32 %v668_v5, %v553_v16 }
 0x228   :  { %5899 = vtanh.f32 %v7401_v17 }
 0x229   :  { %v670_v25 = vpop.permute.xlu0 %669  ;;  %v674_v9 = vpop.permute.xlu1 %673 }
 0x22a   :  { %v7407_v26 = vadd.f32 %v670_v25, %v554_v13  ;;  %v7409_v27 = vadd.f32 %v674_v9, %v556_v20  ;;  %v564_v20 = vmul.f32 0.0, %v7374_v47  ;;  %v558_v25 = vmul.f32 0.0, %v7370_v42 }
 0x22c   :  { %v5896_v18 = vpop.eup %5895  ;;  %9794 = vst [vmem:[#allocation19_spill] sm:$0xff] %v7409_v27  ;;  %5901 = vtanh.f32 %v7407_v26 }
 0x22d   :  { %759 = vrot.lane.b32.xlu1 %v5896_v18, %s6994_s3  ;;  %5903 = vtanh.f32 %v7409_v27  ;;  %v672_v43 = vpop.permute.xlu0 %671  ;;  %v676_v33 = vpop.permute.xlu1 %675 }
 0x22e   :  { %v5898_v45 = vpop.eup %5897  ;;  %v7415_v31 = vadd.f32 %v672_v43, %v555_v19  ;;  %v7417_v48 = vadd.f32 %v676_v33, %v557_v36 }
 0x22f   :  { %761 = vrot.lane.b32.xlu0 %v5898_v45, %s6994_s3 }
 0x230   :  { %9795 = vst [vmem:[#allocation20_spill] sm:$0xff] %v7417_v48  ;;  %5905 = vtanh.f32 %v7415_v31 }
 0x231   :  { %5907 = vtanh.f32 %v7417_v48  ;;  %v682_v28 = vpop.permute.xlu0 %681  ;;  %v680_v61 = vpop.permute.xlu1 %679 }
 0x232   :  { %v5900_v63 = vpop.eup %5899  ;;  %v7424_v3 = vadd.f32 %v682_v28, %v560_v51  ;;  %v7426_v12 = vadd.f32 %v680_v61, %v559_v56  ;;  %v563_v51 = vmul.f32 0.0, %v7382_v58  ;;  %v566_v56 = vmul.f32 0.0, %v7378_v57 }
 0x233   :  { %763 = vrot.lane.b32.xlu1 %v5900_v63, %s6994_s3 }
 0x234   :  { %5909 = vtanh.f32 %v7424_v3 }
 0x235   :  { %5911 = vtanh.f32 %v7426_v12  ;;  %v686_v49 = vpop.permute.xlu0 %685  ;;  %v684_v14 = vpop.permute.xlu1 %683 }
 0x236   :  { %v5902_v16 = vpop.eup %5901  ;;  %v7433_v5 = vadd.f32 %v686_v49, %v562_v37  ;;  %v7435_v18 = vadd.f32 %v684_v14, %v561_v44  ;;  %v565_v14 = vmul.f32 0.0, %v7388_v6 }
 0x237   :  { %v5904_v13 = vpop.eup %5903  ;;  %765 = vrot.lane.b32.xlu0 %v5902_v16, %s6994_s3 }
 0x238   :  { %5913 = vtanh.f32 %v7433_v5  ;;  %769 = vrot.lane.b32.xlu1 %v5904_v13, %s6994_s3 }
 0x239   :  { %5915 = vtanh.f32 %v7435_v18  ;;  %v690_v9 = vpop.permute.xlu0 %689  ;;  %v678_v19 = vpop.permute.xlu1 %677 }
 0x23a   :  { %v5906_v36 = vpop.eup %5905  ;;  %v7443_v43 = vadd.f32 %v690_v9, %v564_v20  ;;  %v7445_v33 = vadd.f32 %v678_v19, %v558_v25 }
 0x23b   :  { %v5908_v45 = vpop.eup %5907  ;;  %767 = vrot.lane.b32.xlu0 %v5906_v36, %s6994_s3 }
 0x23c   :  { %9796 = vst [vmem:[#allocation21_spill] sm:$0xff] %v7445_v33  ;;  %5917 = vtanh.f32 %v7443_v43  ;;  %771 = vrot.lane.b32.xlu1 %v5908_v45, %s6994_s3 }
 0x23d   :  { %5919 = vtanh.f32 %v7445_v33  ;;  %v688_v28 = vpop.permute.xlu0 %687  ;;  %v694_v61 = vpop.permute.xlu1 %693 }
 0x23e   :  { %v5910_v63 = vpop.eup %5909  ;;  %v7453_v37 = vadd.f32 %v688_v28, %v563_v51  ;;  %v7455_v44 = vadd.f32 %v694_v61, %v566_v56 }
 0x23f   :  { %v5912_v49 = vpop.eup %5911  ;;  %777 = vrot.lane.b32.xlu0 %v5910_v63, %s6994_s3 }
 0x240   :  { %9797 = vst [vmem:[#allocation22_spill] sm:$0xff] %v7455_v44  ;;  %5921 = vtanh.f32 %v7453_v37  ;;  %775 = vrot.lane.b32.xlu1 %v5912_v49, %s6994_s3 }
 0x241   :  { %5923 = vtanh.f32 %v7455_v44  ;;  %v692_v16 = vpop.permute.xlu0 %691 }
 0x242   :  { %v5914_v13 = vpop.eup %5913  ;;  %v7462_v20 = vadd.f32 %v692_v16, %v565_v14 }
 0x243   :  { %v5916_v25 = vpop.eup %5915  ;;  %781 = vrot.lane.b32.xlu0 %v5914_v13, %s6994_s3 }
 0x244   :  { %5925 = vtanh.f32 %v7462_v20  ;;  %779 = vrot.lane.b32.xlu1 %v5916_v25, %s6994_s3 }
 0x246   :  { %v5918_v9 = vpop.eup %5917 }
 0x247   :  { %v5920_v19 = vpop.eup %5919  ;;  %785 = vrot.lane.b32.xlu0 %v5918_v9, %s6994_s3 }
 0x248   :  { %773 = vrot.lane.b32.xlu1 %v5920_v19, %s6994_s3 }
 0x24a   :  { %v5922_v36 = vpop.eup %5921 }
 0x24b   :  { %v5924_v45 = vpop.eup %5923  ;;  %783 = vrot.lane.b32.xlu0 %v5922_v36, %s6994_s3 }
 0x24c   :  { %789 = vrot.lane.b32.xlu1 %v5924_v45, %s6994_s3 }
 0x24e   :  { %v5926_v51 = vpop.eup %5925 }
 0x24f   :  { %787 = vrot.lane.b32.xlu0 %v5926_v51, %s6994_s3 }
 0x29f   :  { %v760_v56 = vpop.permute.xlu1 %759 }
 0x2a0   :  { %v807_v33 = vmul.f32 %v7325_v62, %v760_v56 }
 0x2a1   :  { %v762_v28 = vpop.permute.xlu0 %761 }
 0x2a2   :  { %v808_v14 = vmul.f32 %v7331_v40, %v762_v28 }
 0x2a4   :  { %v839_v36 = vrot.slane %v808_v14, 7 }
 0x2a5   :  { %v764_v61 = vpop.permute.xlu1 %763 }
 0x2a6   :  { %v809_v13 = vmul.f32 %v7336_v53, %v764_v61  ;;  %v841_v40 = vsel %vm840_vm1, %v839_v36, %v807_v33 }
 0x2a8   :  { %v842_v44 = vrot.slane %v809_v13, 6 }
 0x2a9   :  { %v766_v63 = vpop.permute.xlu0 %765 }
 0x2aa   :  { %v770_v49 = vpop.permute.xlu1 %769  ;;  %v810_v9 = vmul.f32 %v7342_v4, %v766_v63 }
 0x2ab   :  { %v812_v53 = vmul.f32 %v7339_v2, %v770_v49 }
 0x2ac   :  { %v845_v48 = vrot.slane %v810_v9, 5 }
 0x2ad   :  { %v768_v16 = vpop.permute.xlu0 %767 }
 0x2ae   :  { %v772_v25 = vpop.permute.xlu1 %771  ;;  %v811_v19 = vmul.f32 %v7350_v15, %v768_v16  ;;  %v844_v15 = vsel %vm843_vm2, %v842_v44, %v841_v40  ;;  %v851_v16 = vrot.slane %v812_v53, 3 }
 0x2af   :  { %v847_v63 = vsel %vm846_vm3, %v845_v48, %v844_v15  ;;  %v813_v56 = vmul.f32 %v7346_v59, %v772_v25 }
 0x2b0   :  { %v848_v27 = vrot.slane %v811_v19, 4 }
 0x2b1   :  { %v778_v45 = vpop.permute.xlu0 %777 }
 0x2b2   :  { %v776_v51 = vpop.permute.xlu1 %775  ;;  %v816_v4 = vmul.f32 %v7358_v22, %v778_v45  ;;  %v850_v62 = vsel %vm849_vm4, %v848_v27, %v847_v63 }
 0x2b3   :  { %v815_v9 = vmul.f32 %v7354_v24, %v776_v51  ;;  %v853_v48 = vsel %vm852_vm5, %v851_v16, %v850_v62 }
 0x2b4   :  { %v860_v33 = vrot.slane %v816_v4, 7 }
 0x2b5   :  { %v782_v28 = vpop.permute.xlu0 %781 }
 0x2b6   :  { %v780_v61 = vpop.permute.xlu1 %779  ;;  %v818_v2 = vmul.f32 %v7366_v38, %v782_v28  ;;  %v861_v27 = vsel %vm840_vm1, %v860_v33, %v815_v9 }
 0x2b7   :  { %v817_v14 = vmul.f32 %v7362_v32, %v780_v61  ;;  %v854_v32 = vrot.slane %v813_v56, 2 }
 0x2b8   :  { %v864_v59 = vrot.slane %v818_v2, 5 }
 0x2b9   :  { %v786_v49 = vpop.permute.xlu0 %785  ;;  %v862_v13 = vrot.slane %v817_v14, 6  ;;  %v856_v40 = vsel %vm855_vm6, %v854_v32, %v853_v48 }
 0x2ba   :  { %v774_v22 = vpop.permute.xlu1 %773  ;;  %v820_v24 = vmul.f32 %v7374_v47, %v786_v49 }
 0x2bb   :  { %v814_v44 = vmul.f32 %v7370_v42, %v774_v22  ;;  %v863_v36 = vsel %vm843_vm2, %v862_v13, %v861_v27 }
 0x2bc   :  { %v865_v53 = vsel %vm846_vm3, %v864_v59, %v863_v36 }
 0x2bd   :  { %v857_v25 = vrot.slane %v814_v44, 1  ;;  %v784_v19 = vpop.permute.xlu0 %783 }
 0x2be   :  { %v819_v38 = vmul.f32 %v7382_v58, %v784_v19  ;;  %v790_v45 = vpop.permute.xlu1 %789  ;;  %v868_v58 = vrot.slane %v820_v24, 3 }
 0x2bf   :  { %v859_v42 = vsel %vm858_vm7, %v857_v25, %v856_v40  ;;  %v822_v4 = vmul.f32 %v7378_v57, %v790_v45 }
 0x2c0   :  { %v866_v51 = vrot.slane %v819_v38, 4  ;;  %874 = vrot.lane.b32.xlu0 %v859_v42, %s6995_s23 }
 0x2c1   :  { %v788_v28 = vpop.permute.xlu0 %787  ;;  %v872_v14 = vrot.slane %v822_v4, 1 }
 0x2c2   :  { %v867_v15 = vsel %vm849_vm4, %v866_v51, %v865_v53  ;;  %v821_v61 = vmul.f32 %v7388_v6, %v788_v28 }
 0x2c3   :  { %v869_v62 = vsel %vm852_vm5, %v868_v58, %v867_v15 }
 0x2c4   :  { %v870_v63 = vrot.slane %v821_v61, 2 }
 0x2c6   :  { %v871_v47 = vsel %vm855_vm6, %v870_v63, %v869_v62 }
 0x2c7   :  { %v873_v56 = vsel %vm858_vm7, %v872_v14, %v871_v47 }
 0x2c8   :  { %876 = vrot.lane.b32.xlu1 %v873_v56, %s6995_s23 }
 0x332   :  { %v875_v16 = vpop.permute.xlu0 %874 }
 0x333   :  { %5630 = vmatprep.mubr.msk.f32.mxu1 %vm312_vm8, %v875_v16 }
 0x33a   :  { %v877_v57 = vpop.permute.xlu1 %876 }
 0x33b   :  { %5631 = vmatmul.mubr.msk.f32.vlgmr.msra.gmra.mrb[2].mxu1 %vm312_vm8, %v877_v57 }
 0x33c   :  { %5733 = vmatpush3.bf16.msra.mxu1 %v7129_v7 }
 0x33d   :  { %5735 = vmatprep.subr.bf16.mxu1 %v7132_v10 }
 0x340   :  { %5737 = vmatpush3.bf16.msra.mxu1 %v7132_v10 }
 0x341   :  { %5739 = vmatprep.subr.bf16.mxu1 %v7129_v7 }
 0x40e   :  { %v7510_v6 = vpop.f32.mrb[2].mxu1 }
 0x40f   :  { %v966_v33 = vrot.slane %v7510_v6, 7  ;;  %v948_v2 = vpop.f32.mrb[3].mxu1  ;;  %v968_v13 = vrot.slane %v7510_v6, 2  ;;  %v7520_v22 = vadd.f32 %v7510_v6, %v7211_v54  ;;  %v969_v9 = vrot.slane %v7510_v6, 3 }
 0x410   :  { %v970_v32 = vrot.slane %v7510_v6, 4  ;;  %v959_v25 = vrot.slane %v948_v2, 7  ;;  %v961_v38 = vrot.slane %v948_v2, 2  ;;  %v967_v40 = vrot.slane %v7510_v6, 1 }
 0x411   :  { %v7514_v49 = vadd.f32 %v966_v33, %v7235_v1  ;;  %v7524_v44 = vadd.f32 %v968_v13, %v7232_v0  ;;  %v7529_v27 = vadd.f32 %v969_v9, %v7274_v23  ;;  %v7544_v24 = vadd.f32 %v948_v2, %v7176_v35 }
 0x412   :  { %v7534_v59 = vadd.f32 %v970_v32, %v7244_v8  ;;  %v7540_v45 = vadd.f32 %v959_v25, %v7169_v30  ;;  %v962_v51 = vrot.slane %v948_v2, 3  ;;  %v7548_v53 = vadd.f32 %v961_v38, %v7203_v50 }
 0x413   :  { %5927 = vtanh.f32 %v7514_v49  ;;  %v7552_v4 = vadd.f32 %v967_v40, %v7251_v11  ;;  %v960_v28 = vrot.slane %v948_v2, 1  ;;  %v971_v61 = vrot.slane %v7510_v6, 5 }
 0x414   :  { %5929 = vtanh.f32 %v7520_v22  ;;  %v7558_v58 = vadd.f32 %v962_v51, %v7223_v60  ;;  %v963_v63 = vrot.slane %v948_v2, 4  ;;  %v964_v47 = vrot.slane %v948_v2, 5 }
 0x415   :  { %5931 = vtanh.f32 %v7524_v44  ;;  %v7563_v14 = vadd.f32 %v960_v28, %v7188_v41  ;;  %v7567_v62 = vadd.f32 %v971_v61, %v7287_v34  ;;  %v965_v33 = vrot.slane %v948_v2, 6 }
 0x416   :  { %5933 = vtanh.f32 %v7529_v27  ;;  %v7571_v56 = vadd.f32 %v963_v63, %v7185_v39  ;;  %v7578_v13 = vadd.f32 %v964_v47, %v7196_v46  ;;  %v972_v32 = vrot.slane %v7510_v6, 6 }
 0x417   :  { %5935 = vtanh.f32 %v7534_v59  ;;  %v7585_v25 = vadd.f32 %v965_v33, %v7266_v21  ;;  %v5390_v28 = vmul.f32 -1.442695, %v7514_v49  ;;  %v5393_v61 = vmul.f32 -1.442695, %v7524_v44 }
 0x418   :  { %5937 = vtanh.f32 %v7540_v45  ;;  %v5394_v47 = vmul.f32 -1.442695, %v7529_v27  ;;  %v5382_v49 = vmul.f32 -1.442695, %v7540_v45  ;;  %v5392_v27 = vmul.f32 -1.442695, %v7552_v4 }
 0x419   :  { %5939 = vtanh.f32 %v7544_v24  ;;  %v5386_v45 = vmul.f32 -1.442695, %v7558_v58 }
 0x41a   :  { %5941 = vtanh.f32 %v7548_v53 }
 0x41b   :  { %5943 = vtanh.f32 %v7552_v4  ;;  %v5396_v4 = vmul.f32 -1.442695, %v7567_v62 }
 0x41c   :  { %5945 = vtanh.f32 %v7558_v58  ;;  %v5388_v58 = vmul.f32 -1.442695, %v7578_v13 }
 0x41d   :  { %v5928_v48 = vpop.eup %5927  ;;  %5947 = vtanh.f32 %v7563_v14 }
 0x41e   :  { %1213 = vrot.lane.b32.xlu0 %v5928_v48, %s6994_s3  ;;  %v5930_v19 = vpop.eup %5929  ;;  %5949 = vtanh.f32 %v7567_v62 }
 0x41f   :  { %1215 = vrot.lane.b32.xlu1 %v5930_v19, %s6994_s3  ;;  %v5932_v36 = vpop.eup %5931  ;;  %5951 = vtanh.f32 %v7571_v56 }
 0x420   :  { %v5934_v42 = vpop.eup %5933  ;;  %5953 = vtanh.f32 %v7578_v13 }
 0x421   :  { %v5936_v15 = vpop.eup %5935  ;;  %5955 = vtanh.f32 %v7585_v25 }
 0x422   :  { %1219 = vrot.lane.b32.xlu0 %v5932_v36, %s6994_s3  ;;  %v5938_v16 = vpop.eup %5937  ;;  %v7591_v36 = vadd.f32 %v972_v32, %v7281_v29 }
 0x423   :  { %v5940_v57 = vpop.eup %5939 }
 0x424   :  { %1199 = vrot.lane.b32.xlu1 %v5940_v57, %s6994_s3  ;;  %v5942_v9 = vpop.eup %5941  ;;  %5957 = vtanh.f32 %v7591_v36  ;;  %v5395_v57 = vmul.f32 -1.442695, %v7534_v59 }
 0x425   :  { %v5944_v48 = vpop.eup %5943  ;;  %5959 = vpow2.f32 %v5390_v28 }
 0x426   :  { %1221 = vrot.lane.b32.xlu0 %v5934_v42, %s6994_s3  ;;  %v5946_v19 = vpop.eup %5945 }
 0x427   :  { %v5948_v2 = vpop.eup %5947 }
 0x428   :  { %1217 = vrot.lane.b32.xlu1 %v5944_v48, %s6994_s3  ;;  %v5950_v38 = vpop.eup %5949 }
 0x429   :  { %v5952_v40 = vpop.eup %5951 }
 0x42a   :  { %1223 = vrot.lane.b32.xlu0 %v5936_v15, %s6994_s3  ;;  %v5954_v6 = vpop.eup %5953  ;;  %v5391_v15 = vmul.f32 -1.442695, %v7520_v22  ;;  %v5383_v22 = vmul.f32 -1.442695, %v7544_v24  ;;  %v5384_v24 = vmul.f32 -1.442695, %v7563_v14 }
 0x42b   :  { %v5956_v42 = vpop.eup %5955 }
 0x42c   :  { %1201 = vrot.lane.b32.xlu1 %v5948_v2, %s6994_s3  ;;  %5961 = vpow2.f32 %v5391_v15 }
 0x42d   :  { %5963 = vpow2.f32 %v5393_v61 }
 0x42e   :  { %1197 = vrot.lane.b32.xlu0 %v5938_v16, %s6994_s3  ;;  %v5958_v51 = vpop.eup %5957  ;;  %5965 = vpow2.f32 %v5394_v47 }
 0x42f   :  { %v5960_v63 = vpop.eup %5959 }
 0x430   :  { %1207 = vrot.lane.b32.xlu1 %v5952_v40, %s6994_s3  ;;  %v1061_v16 = vadd.f32 1.0, %v5960_v63 }
 0x432   :  { %1203 = vrot.lane.b32.xlu0 %v5942_v9, %s6994_s3  ;;  %5967 = vrcp.f32 %v1061_v16 }
 0x433   :  { %5969 = vpow2.f32 %v5395_v57 }
 0x434   :  { %1209 = vrot.lane.b32.xlu1 %v5954_v6, %s6994_s3 }
 0x436   :  { %1205 = vrot.lane.b32.xlu0 %v5946_v19, %s6994_s3  ;;  %v5962_v33 = vpop.eup %5961  ;;  %v5385_v19 = vmul.f32 -1.442695, %v7548_v53 }
 0x437   :  { %v1062_v9 = vadd.f32 1.0, %v5962_v33  ;;  %v5964_v48 = vpop.eup %5963 }
 0x438   :  { %1211 = vrot.lane.b32.xlu1 %v5956_v42, %s6994_s3  ;;  %v1064_v32 = vadd.f32 1.0, %v5964_v48  ;;  %v5966_v44 = vpop.eup %5965 }
 0x439   :  { %5971 = vrcp.f32 %v1062_v9  ;;  %v1065_v40 = vadd.f32 1.0, %v5966_v44  ;;  %v5389_v9 = vmul.f32 -1.442695, %v7585_v25 }
 0x43a   :  { %1225 = vrot.lane.b32.xlu0 %v5950_v38, %s6994_s3  ;;  %5973 = vpow2.f32 %v5382_v49 }
 0x43b   :  { %5975 = vpow2.f32 %v5383_v22 }
 0x43c   :  { %1227 = vrot.lane.b32.xlu1 %v5958_v51, %s6994_s3  ;;  %v7609_v2 = vpop.eup %5967  ;;  %5977 = vrcp.f32 %v1064_v32  ;;  %v5387_v51 = vmul.f32 -1.442695, %v7571_v56 }
 0x43d   :  { %v5970_v6 = vpop.eup %5969  ;;  %5979 = vpow2.f32 %v5385_v19 }
 0x43e   :  { %5981 = vpow2.f32 %v5392_v27  ;;  %v1066_v53 = vadd.f32 1.0, %v5970_v6  ;;  %v5397_v27 = vmul.f32 -1.442695, %v7591_v36 }
 0x43f   :  { %5983 = vrcp.f32 %v1065_v40 }
 0x440   :  { %5985 = vpow2.f32 %v5386_v45 }
 0x441   :  { %5987 = vpow2.f32 %v5384_v24 }
 0x442   :  { %5989 = vrcp.f32 %v1066_v53 }
 0x443   :  { %v7616_v42 = vpop.eup %5971  ;;  %5991 = vpow2.f32 %v5396_v4 }
 0x444   :  { %v5974_v28 = vpop.eup %5973  ;;  %5993 = vpow2.f32 %v5387_v51 }
 0x445   :  { %v5976_v15 = vpop.eup %5975  ;;  %v1053_v62 = vadd.f32 1.0, %v5974_v28  ;;  %5995 = vpow2.f32 %v5388_v58 }
 0x446   :  { %v7621_v63 = vpop.eup %5977  ;;  %v1054_v57 = vadd.f32 1.0, %v5976_v15 }
 0x447   :  { %v5980_v16 = vpop.eup %5979  ;;  %5997 = vrcp.f32 %v1053_v62 }
 0x448   :  { %v5982_v33 = vpop.eup %5981  ;;  %v1056_v49 = vadd.f32 1.0, %v5980_v16  ;;  %5999 = vrcp.f32 %v1054_v57 }
 0x449   :  { %v7627_v13 = vpop.eup %5983  ;;  %v1063_v32 = vadd.f32 1.0, %v5982_v33  ;;  %6001 = vpow2.f32 %v5389_v9 }
 0x44a   :  { %v5986_v22 = vpop.eup %5985  ;;  %6003 = vrcp.f32 %v1056_v49 }
 0x44b   :  { %v5988_v19 = vpop.eup %5987  ;;  %6005 = vrcp.f32 %v1063_v32 }
 0x44c   :  { %v1055_v6 = vadd.f32 1.0, %v5988_v19  ;;  %6007 = vpow2.f32 %v5397_v27 }
 0x490   :  { %v1214_v59 = vpop.permute.xlu0 %1213 }
 0x491   :  { %v1253_v38 = vmul.f32 %v7609_v2, %v1214_v59  ;;  %v1216_v61 = vpop.permute.xlu1 %1215  ;;  %v7632_v59 = vpop.eup %5989 }
 0x492   :  { %v1254_v14 = vmul.f32 %v7616_v42, %v1216_v61  ;;  %v5992_v40 = vpop.eup %5991 }
 0x493   :  { %1293 = vrot.lane.b32.xlu0 %v1253_v38, %s6995_s23  ;;  %v1057_v38 = vadd.f32 1.0, %v5986_v22  ;;  %v5994_v24 = vpop.eup %5993  ;;  %v1067_v53 = vadd.f32 1.0, %v5992_v40 }
 0x494   :  { %v1220_v47 = vpop.permute.xlu0 %1219  ;;  %1295 = vrot.lane.b32.xlu1 %v1254_v14, %s6995_s23  ;;  %v5996_v36 = vpop.eup %5995  ;;  %v1058_v4 = vadd.f32 1.0, %v5994_v24 }
 0x495   :  { %v1256_v56 = vmul.f32 %v7621_v63, %v1220_v47  ;;  %6009 = vrcp.f32 %v1057_v38  ;;  %v7636_v51 = vpop.eup %5997  ;;  %v1059_v62 = vadd.f32 1.0, %v5996_v36 }
 0x496   :  { %6011 = vrcp.f32 %v1055_v6  ;;  %v7638_v15 = vpop.eup %5999  ;;  %v1200_v61 = vpop.permute.xlu1 %1199 }
 0x497   :  { %1299 = vrot.lane.b32.xlu0 %v1256_v56, %s6995_s23  ;;  %v1246_v14 = vmul.f32 %v7638_v15, %v1200_v61  ;;  %6013 = vrcp.f32 %v1067_v53  ;;  %v6002_v47 = vpop.eup %6001 }
 0x498   :  { %v1222_v48 = vpop.permute.xlu0 %1221  ;;  %6015 = vrcp.f32 %v1058_v4  ;;  %v7643_v16 = vpop.eup %6003  ;;  %v1060_v22 = vadd.f32 1.0, %v6002_v47 }
 0x499   :  { %v1257_v44 = vmul.f32 %v7627_v13, %v1222_v48  ;;  %1279 = vrot.lane.b32.xlu1 %v1246_v14, %s6995_s23  ;;  %v7646_v56 = vpop.eup %6005  ;;  %6017 = vrcp.f32 %v1059_v62 }
 0x49a   :  { %v1218_v33 = vpop.permute.xlu1 %1217  ;;  %v6008_v49 = vpop.eup %6007  ;;  %6019 = vrcp.f32 %v1060_v22 }
 0x49b   :  { %1301 = vrot.lane.b32.xlu0 %v1257_v44, %s6995_s23  ;;  %v1255_v48 = vmul.f32 %v7646_v56, %v1218_v33  ;;  %v1068_v40 = vadd.f32 1.0, %v6008_v49 }
 0x49c   :  { %v1224_v25 = vpop.permute.xlu0 %1223 }
 0x49d   :  { %v1258_v45 = vmul.f32 %v7632_v59, %v1224_v25  ;;  %1297 = vrot.lane.b32.xlu1 %v1255_v48, %s6995_s23  ;;  %6021 = vrcp.f32 %v1068_v40  ;;  %v1141_v48 = vrot.slane %v7426_v12, 7  ;;  %v1145_v12 = vrot.slane %v7453_v37, 7 }
 0x49e   :  { %v1202_v27 = vpop.permute.xlu1 %1201 }
 0x49f   :  { %1303 = vrot.lane.b32.xlu0 %v1258_v45, %s6995_s23  ;;  %v7651_v32 = vpop.eup %6009  ;;  %v1173_v49 = vmul.f32 %v7609_v2, %v1141_v48  ;;  %v1133_v48 = vrot.slane %v7393_v52, 7  ;;  %v1143_v52 = vrot.slane %v7435_v18, 7  ;;  %v1135_v18 = vrot.slane %v7401_v17, 7  ;;  %v9801_v17 = vld [vmem:[#allocation19_spill] sm:$0xff] }
 0x4a0   :  { %v1198_v28 = vpop.permute.xlu0 %1197  ;;  %v7654_v19 = vpop.eup %6011 }
 0x4a1   :  { %v1245_v58 = vmul.f32 %v7636_v51, %v1198_v28  ;;  %v1247_v38 = vmul.f32 %v7654_v19, %v1202_v27  ;;  %v7659_v6 = vpop.eup %6013  ;;  %v1142_v27 = vrot.slane %v7424_v3, 7  ;;  %v1177_v3 = vmul.f32 %v7627_v13, %v1145_v12 }
 0x4a2   :  { %v7662_v24 = vpop.eup %6015  ;;  %v1208_v53 = vpop.permute.xlu1 %1207 }
 0x4a3   :  { %1277 = vrot.lane.b32.xlu0 %v1245_v58, %s6995_s23  ;;  %1281 = vrot.lane.b32.xlu1 %v1247_v38, %s6995_s23  ;;  %v1250_v4 = vmul.f32 %v7662_v24, %v1208_v53  ;;  %v7668_v28 = vpop.eup %6017  ;;  %v1174_v38 = vmul.f32 %v7616_v42, %v1142_v27 }
 0x4a4   :  { %v1204_v57 = vpop.permute.xlu0 %1203  ;;  %v7672_v14 = vpop.eup %6019 }
 0x4a5   :  { %v1248_v9 = vmul.f32 %v7643_v16, %v1204_v57 }
 0x4a6   :  { %v1210_v61 = vpop.permute.xlu1 %1209 }
 0x4a7   :  { %1283 = vrot.lane.b32.xlu0 %v1248_v9, %s6995_s23  ;;  %1287 = vrot.lane.b32.xlu1 %v1250_v4, %s6995_s23  ;;  %v1251_v58 = vmul.f32 %v7668_v28, %v1210_v61  ;;  %v7676_v57 = vpop.eup %6021 }
 0x4a8   :  { %v1206_v44 = vpop.permute.xlu0 %1205 }
 0x4a9   :  { %v1249_v25 = vmul.f32 %v7651_v32, %v1206_v44 }
 0x4aa   :  { %v1212_v47 = vpop.permute.xlu1 %1211 }
 0x4ab   :  { %1285 = vrot.lane.b32.xlu0 %v1249_v25, %s6995_s23  ;;  %1289 = vrot.lane.b32.xlu1 %v1251_v58, %s6995_s23  ;;  %v1252_v62 = vmul.f32 %v7672_v14, %v1212_v47  ;;  %v1144_v25 = vrot.slane %v7433_v5, 7  ;;  %v1146_v58 = vrot.slane %v7443_v43, 7  ;;  %v1165_v43 = vmul.f32 %v7636_v51, %v1133_v48 }
 0x4ac   :  { %v1226_v45 = vpop.permute.xlu0 %1225  ;;  %v1167_v48 = vmul.f32 %v7654_v19, %v1135_v18 }
 0x4ad   :  { %v1259_v36 = vmul.f32 %v7659_v6, %v1226_v45  ;;  %v1176_v53 = vmul.f32 %v7621_v63, %v1144_v25  ;;  %v1178_v37 = vmul.f32 %v7632_v59, %v1146_v58 }
 0x4ae   :  { %v1228_v33 = vpop.permute.xlu1 %1227 }
 0x4af   :  { %1305 = vrot.lane.b32.xlu0 %v1259_v36, %s6995_s23  ;;  %1291 = vrot.lane.b32.xlu1 %v1252_v62, %s6995_s23  ;;  %v1260_v9 = vmul.f32 %v7676_v57, %v1228_v33 }
 0x4b3   :  { %1307 = vrot.lane.b32.xlu1 %v1260_v9, %s6995_s23 }
 0x505   :  { %v1294_v22 = vpop.permute.xlu0 %1293 }
 0x506   :  { %v7682_v44 = vadd.f32 %v1294_v22, %v1173_v49  ;;  %v1296_v40 = vpop.permute.xlu1 %1295  ;;  %v1134_v49 = vrot.slane %v7397_v55, 7 }
 0x507   :  { %v7688_v45 = vadd.f32 %v1296_v40, %v1174_v38  ;;  %v1136_v38 = vrot.slane %v7407_v26, 7  ;;  %v1137_v26 = vrot.slane %v7415_v31, 7  ;;  %v1147_v31 = vrot.slane %v7462_v20, 7 }
 0x508   :  { %6023 = vtanh.f32 %v7682_v44  ;;  %v1166_v27 = vmul.f32 %v7638_v15, %v1134_v49 }
 0x509   :  { %v1300_v36 = vpop.permute.xlu0 %1299  ;;  %6025 = vtanh.f32 %v7688_v45  ;;  %v1168_v12 = vmul.f32 %v7643_v16, %v1136_v38  ;;  %v1179_v38 = vmul.f32 %v7659_v6, %v1147_v31 }
 0x50a   :  { %v7693_v4 = vadd.f32 %v1300_v36, %v1176_v53 }
 0x50b   :  { %v1280_v40 = vpop.permute.xlu1 %1279 }
 0x50c   :  { %9798 = vst [vmem:[#allocation23_spill] sm:$0xff] %v7693_v4  ;;  %6027 = vtanh.f32 %v7693_v4  ;;  %v7716_v36 = vadd.f32 %v1280_v40, %v1166_v27  ;;  %v1138_v27 = vrot.slane %v9801_v17, 7 }
 0x50d   :  { %v1302_v5 = vpop.permute.xlu0 %1301 }
 0x50e   :  { %v7699_v47 = vadd.f32 %v1302_v5, %v1177_v3  ;;  %9799 = vst [vmem:[#allocation24_spill] sm:$0xff] %v7716_v36  ;;  %v1170_v40 = vmul.f32 %v7662_v24, %v1138_v27 }
 0x50f   :  { %v1298_v5 = vpop.permute.xlu1 %1297 }
 0x510   :  { %6029 = vtanh.f32 %v7699_v47 }
 0x511   :  { %v1304_v62 = vpop.permute.xlu0 %1303 }
 0x512   :  { %v6024_v61 = vpop.eup %6023  ;;  %v7703_v33 = vadd.f32 %v1304_v62, %v1178_v37 }
 0x513   :  { %1389 = vrot.lane.b32.xlu0 %v6024_v61, %s6994_s3  ;;  %v6026_v9 = vpop.eup %6025  ;;  %v1175_v61 = vmul.f32 %v7646_v56, %v1143_v52 }
 0x514   :  { %6031 = vtanh.f32 %v7703_v33  ;;  %1391 = vrot.lane.b32.xlu1 %v6026_v9, %s6994_s3  ;;  %v1169_v9 = vmul.f32 %v7651_v32, %v1137_v26 }
 0x515   :  { %v1278_v25 = vpop.permute.xlu0 %1277  ;;  %v7727_v37 = vadd.f32 %v1298_v5, %v1175_v61 }
 0x516   :  { %v6028_v22 = vpop.eup %6027  ;;  %v7713_v53 = vadd.f32 %v1278_v25, %v1165_v43 }
 0x517   :  { %1395 = vrot.lane.b32.xlu0 %v6028_v22, %s6994_s3  ;;  %v1282_v22 = vpop.permute.xlu1 %1281 }
 0x518   :  { %6033 = vtanh.f32 %v7713_v53  ;;  %v7738_v25 = vadd.f32 %v1282_v22, %v1167_v48 }
 0x519   :  { %6035 = vtanh.f32 %v7716_v36  ;;  %v1284_v3 = vpop.permute.xlu0 %1283 }
 0x51a   :  { %v6030_v55 = vpop.eup %6029  ;;  %v7724_v58 = vadd.f32 %v1284_v3, %v1168_v12  ;;  %v9803_v3 = vld [vmem:[#allocation20_spill] sm:$0xff] }
 0x51b   :  { %1397 = vrot.lane.b32.xlu0 %v6030_v55, %s6994_s3  ;;  %v1288_v12 = vpop.permute.xlu1 %1287  ;;  %v1139_v26 = vrot.slane %v9803_v3, 7 }
 0x51c   :  { %6037 = vtanh.f32 %v7724_v58  ;;  %v7747_v5 = vadd.f32 %v1288_v12, %v1170_v40 }
 0x51d   :  { %6039 = vtanh.f32 %v7727_v37  ;;  %v1286_v49 = vpop.permute.xlu0 %1285  ;;  %v1171_v18 = vmul.f32 %v7668_v28, %v1139_v26 }
 0x51e   :  { %v6032_v62 = vpop.eup %6031  ;;  %v7735_v43 = vadd.f32 %v1286_v49, %v1169_v9  ;;  %9804 = vst [vmem:[#allocation20_spill] sm:$0xff] %v7747_v5  ;;  %v9805_v49 = vld [vmem:[#allocation21_spill] sm:$0xff] }
 0x51f   :  { %1399 = vrot.lane.b32.xlu0 %v6032_v62, %s6994_s3  ;;  %v1290_v9 = vpop.permute.xlu1 %1289  ;;  %v1140_v31 = vrot.slane %v9805_v49, 7 }
 0x520   :  { %9800 = vst [vmem:[#allocation25_spill] sm:$0xff] %v7735_v43  ;;  %6041 = vtanh.f32 %v7735_v43  ;;  %v7755_v22 = vadd.f32 %v1290_v9, %v1171_v18 }
 0x521   :  { %6043 = vtanh.f32 %v7738_v25  ;;  %v1306_v52 = vpop.permute.xlu0 %1305  ;;  %v1172_v17 = vmul.f32 %v7672_v14, %v1140_v31 }
 0x522   :  { %v6034_v55 = vpop.eup %6033  ;;  %v7744_v61 = vadd.f32 %v1306_v52, %v1179_v38  ;;  %9806 = vst [vmem:[#allocation21_spill] sm:$0xff] %v7755_v22  ;;  %v9807_v52 = vld [vmem:[#allocation22_spill] sm:$0xff] }
 0x523   :  { %v6036_v20 = vpop.eup %6035  ;;  %1373 = vrot.lane.b32.xlu0 %v6034_v55, %s6994_s3  ;;  %v1292_v38 = vpop.permute.xlu1 %1291  ;;  %v1148_v55 = vrot.slane %v9807_v52, 7 }
 0x524   :  { %9802 = vst [vmem:[#allocation19_spill] sm:$0xff] %v7744_v61  ;;  %1375 = vrot.lane.b32.xlu1 %v6036_v20, %s6994_s3  ;;  %6045 = vtanh.f32 %v7744_v61  ;;  %v7762_v12 = vadd.f32 %v1292_v38, %v1172_v17 }
 0x525   :  { %6047 = vtanh.f32 %v7747_v5  ;;  %v1180_v20 = vmul.f32 %v7676_v57, %v1148_v55 }
 0x526   :  { %v6038_v62 = vpop.eup %6037  ;;  %6049 = vtanh.f32 %v7755_v22  ;;  %9808 = vst [vmem:[#allocation22_spill] sm:$0xff] %v7762_v12 }
 0x527   :  { %v6040_v48 = vpop.eup %6039  ;;  %1379 = vrot.lane.b32.xlu0 %v6038_v62, %s6994_s3  ;;  %6051 = vtanh.f32 %v7762_v12  ;;  %v1308_v26 = vpop.permute.xlu1 %1307 }
 0x528   :  { %1393 = vrot.lane.b32.xlu1 %v6040_v48, %s6994_s3  ;;  %v7768_v62 = vadd.f32 %v1308_v26, %v1180_v20 }
 0x52a   :  { %v6042_v27 = vpop.eup %6041  ;;  %9809 = vst [vmem:[#allocation26_spill] sm:$0xff] %v7768_v62  ;;  %6053 = vtanh.f32 %v7768_v62 }
 0x52b   :  { %v6044_v40 = vpop.eup %6043  ;;  %1381 = vrot.lane.b32.xlu0 %v6042_v27, %s6994_s3 }
 0x52c   :  { %1377 = vrot.lane.b32.xlu1 %v6044_v40, %s6994_s3 }
 0x52e   :  { %v6046_v3 = vpop.eup %6045 }
 0x52f   :  { %v6048_v18 = vpop.eup %6047  ;;  %1401 = vrot.lane.b32.xlu0 %v6046_v3, %s6994_s3 }
 0x530   :  { %1383 = vrot.lane.b32.xlu1 %v6048_v18, %s6994_s3  ;;  %v6050_v9 = vpop.eup %6049 }
 0x531   :  { %v6052_v48 = vpop.eup %6051 }
 0x534   :  { %1385 = vrot.lane.b32.xlu1 %v6050_v9, %s6994_s3  ;;  %v6054_v49 = vpop.eup %6053 }
 0x538   :  { %1387 = vrot.lane.b32.xlu1 %v6052_v48, %s6994_s3 }
 0x53c   :  { %1403 = vrot.lane.b32.xlu1 %v6054_v49, %s6994_s3 }
 0x585   :  { %v1390_v31 = vpop.permute.xlu0 %1389 }
 0x586   :  { %v1392_v40 = vpop.permute.xlu1 %1391  ;;  %v1429_v49 = vmul.f32 %v7609_v2, %v1390_v31 }
 0x587   :  { %v1430_v2 = vmul.f32 %v7616_v42, %v1392_v40 }
 0x588   :  { %v1467_v43 = vrot.slane %v1429_v49, 1 }
 0x589   :  { %v1396_v17 = vpop.permute.xlu0 %1395 }
 0x58d   :  { %v1398_v27 = vpop.permute.xlu0 %1397 }
 0x591   :  { %v1400_v38 = vpop.permute.xlu0 %1399 }
 0x592   :  { %v1434_v31 = vmul.f32 %v7632_v59, %v1400_v38 }
 0x595   :  { %v1374_v52 = vpop.permute.xlu0 %1373 }
 0x596   :  { %v1376_v55 = vpop.permute.xlu1 %1375  ;;  %v1421_v20 = vmul.f32 %v7636_v51, %v1374_v52 }
 0x597   :  { %v1422_v22 = vmul.f32 %v7638_v15, %v1376_v55  ;;  %v1432_v15 = vmul.f32 %v7621_v63, %v1396_v17  ;;  %v1475_v55 = vrot.slane %v1434_v31, 4 }
 0x598   :  { %v1453_v18 = vrot.slane %v1421_v20, 1 }
 0x599   :  { %v1380_v3 = vpop.permute.xlu0 %1379  ;;  %v1471_v63 = vrot.slane %v1432_v15, 6 }
 0x59a   :  { %v1394_v26 = vpop.permute.xlu1 %1393  ;;  %v1424_v9 = vmul.f32 %v7643_v16, %v1380_v3  ;;  %v1454_v5 = vsel %vm840_vm1, %v1422_v22, %v1453_v18 }
 0x59b   :  { %v1431_v36 = vmul.f32 %v7646_v56, %v1394_v26  ;;  %v1433_v56 = vmul.f32 %v7627_v13, %v1398_v27 }
 0x59c   :  { %v1457_v51 = vrot.slane %v1424_v9, 6 }
 0x59d   :  { %v1382_v62 = vpop.permute.xlu0 %1381  ;;  %v1469_v3 = vrot.slane %v1431_v36, 7  ;;  %v1473_v17 = vrot.slane %v1433_v56, 5 }
 0x59e   :  { %v1378_v12 = vpop.permute.xlu1 %1377  ;;  %v1425_v48 = vmul.f32 %v7651_v32, %v1382_v62  ;;  %v1468_v62 = vsel %vm840_vm1, %v1430_v2, %v1467_v43 }
 0x59f   :  { %v1423_v61 = vmul.f32 %v7654_v19, %v1378_v12  ;;  %v1470_v36 = vsel %vm843_vm2, %v1469_v3, %v1468_v62 }
 0x5a0   :  { %v1459_v20 = vrot.slane %v1425_v48, 5  ;;  %v1472_v27 = vsel %vm846_vm3, %v1471_v63, %v1470_v36 }
 0x5a1   :  { %v1455_v52 = vrot.slane %v1423_v61, 7  ;;  %v1402_v12 = vpop.permute.xlu0 %1401 }
 0x5a2   :  { %v1384_v4 = vpop.permute.xlu1 %1383  ;;  %v1435_v42 = vmul.f32 %v7659_v6, %v1402_v12 }
 0x5a3   :  { %v1426_v16 = vmul.f32 %v7662_v24, %v1384_v4  ;;  %v1456_v32 = vsel %vm843_vm2, %v1455_v52, %v1454_v5 }
 0x5a4   :  { %v1458_v19 = vsel %vm846_vm3, %v1457_v51, %v1456_v32  ;;  %v1477_v26 = vrot.slane %v1435_v42, 3 }
 0x5a5   :  { %v1460_v61 = vsel %vm849_vm4, %v1459_v20, %v1458_v19  ;;  %v1461_v24 = vrot.slane %v1426_v16, 4 }
 0x5a6   :  { %v1386_v22 = vpop.permute.xlu1 %1385 }
 0x5a7   :  { %v1427_v4 = vmul.f32 %v7668_v28, %v1386_v22  ;;  %v1462_v5 = vsel %vm852_vm5, %v1461_v24, %v1460_v61  ;;  %v1474_v28 = vsel %vm849_vm4, %v1473_v17, %v1472_v27 }
 0x5a8   :  { %v1476_v6 = vsel %vm852_vm5, %v1475_v55, %v1474_v28 }
 0x5a9   :  { %v1463_v40 = vrot.slane %v1427_v4, 3  ;;  %v1478_v49 = vsel %vm855_vm6, %v1477_v26, %v1476_v6 }
 0x5aa   :  { %v1388_v13 = vpop.permute.xlu1 %1387 }
 0x5ab   :  { %v1428_v43 = vmul.f32 %v7672_v14, %v1388_v13  ;;  %v1464_v59 = vsel %vm855_vm6, %v1463_v40, %v1462_v5 }
 0x5ad   :  { %v1465_v38 = vrot.slane %v1428_v43, 2 }
 0x5ae   :  { %v1404_v18 = vpop.permute.xlu1 %1403 }
 0x5af   :  { %v1436_v9 = vmul.f32 %v7676_v57, %v1404_v18  ;;  %v1466_v48 = vsel %vm858_vm7, %v1465_v38, %v1464_v59 }
 0x5b0   :  { %1481 = vrot.lane.b32.xlu0 %v1466_v48, %s6995_s23 }
 0x5b1   :  { %v1479_v51 = vrot.slane %v1436_v9, 2 }
 0x5b3   :  { %v1480_v14 = vsel %vm858_vm7, %v1479_v51, %v1478_v49 }
 0x5b4   :  { %1483 = vrot.lane.b32.xlu1 %v1480_v14, %s6995_s23 }
 0x622   :  { %v1482_v52 = vpop.permute.xlu0 %1481 }
 0x623   :  { %5641 = vmatprep.mubr.msk.f32.mxu1 %vm312_vm8, %v1482_v52 }
 0x626   :  { %v1484_v20 = vpop.permute.xlu1 %1483 }
 0x627   :  { %5642 = vmatmul.mubr.msk.f32.vlgmr.msra.gmra.mrb[4].mxu1 %vm312_vm8, %v1484_v20 }
 0x628   :  { %5741 = vmatpush3.bf16.msra.mxu1 %v7129_v7 }
 0x629   :  { %5743 = vmatprep.subr.bf16.mxu1 %v7132_v10 }
 0x62c   :  { %5745 = vmatpush3.bf16.msra.mxu1 %v7132_v10 }
 0x62d   :  { %5755 = vmatprep.subr.bf16.mxu1 %v7129_v7 }
 0x6fa   :  { %v7814_v57 = vpop.f32.mrb[4].mxu1 }
 0x6fb   :  { %v1573_v16 = vrot.slane %v7814_v57, 6  ;;  %v1555_v3 = vpop.f32.mrb[5].mxu1  ;;  %v1576_v2 = vrot.slane %v7814_v57, 2  ;;  %v7824_v15 = vadd.f32 %v7814_v57, %v7251_v11  ;;  %v1577_v19 = vrot.slane %v7814_v57, 3 }
 0x6fc   :  { %v1566_v61 = vrot.slane %v1555_v3, 6  ;;  %v1568_v31 = vrot.slane %v1555_v3, 1  ;;  %v1574_v36 = vrot.slane %v7814_v57, 7  ;;  %v7843_v42 = vadd.f32 %v1555_v3, %v7188_v41 }
 0x6fd   :  { %v7818_v32 = vadd.f32 %v1573_v16, %v7235_v1  ;;  %v7828_v12 = vadd.f32 %v1576_v2, %v7274_v23  ;;  %v7833_v22 = vadd.f32 %v1577_v19, %v7244_v8  ;;  %v1569_v63 = vrot.slane %v1555_v3, 2 }
 0x6fe   :  { %v7838_v24 = vadd.f32 %v1566_v61, %v7169_v30  ;;  %v7847_v5 = vadd.f32 %v1568_v31, %v7203_v50  ;;  %v1575_v40 = vrot.slane %v7814_v57, 1  ;;  %v7852_v13 = vadd.f32 %v1574_v36, %v7211_v54 }
 0x6ff   :  { %6055 = vtanh.f32 %v7818_v32  ;;  %v1570_v27 = vrot.slane %v1555_v3, 3  ;;  %v7857_v55 = vadd.f32 %v1569_v63, %v7223_v60  ;;  %v1567_v26 = vrot.slane %v1555_v3, 7 }
 0x700   :  { %6057 = vtanh.f32 %v7824_v15  ;;  %v7861_v43 = vadd.f32 %v1575_v40, %v7232_v0  ;;  %v1578_v59 = vrot.slane %v7814_v57, 4  ;;  %v1571_v18 = vrot.slane %v1555_v3, 4 }
 0x701   :  { %6059 = vtanh.f32 %v7828_v12  ;;  %v7866_v38 = vadd.f32 %v1570_v27, %v7185_v39  ;;  %v7871_v6 = vadd.f32 %v1567_v26, %v7176_v35  ;;  %v1572_v51 = vrot.slane %v1555_v3, 5 }
 0x702   :  { %6061 = vtanh.f32 %v7833_v22  ;;  %v7875_v48 = vadd.f32 %v1578_v59, %v7287_v34  ;;  %v7880_v14 = vadd.f32 %v1571_v18, %v7196_v46  ;;  %v1579_v16 = vrot.slane %v7814_v57, 5 }
 0x703   :  { %6063 = vtanh.f32 %v7838_v24  ;;  %v7888_v2 = vadd.f32 %v1572_v51, %v7266_v21  ;;  %v5408_v36 = vmul.f32 -1.442695, %v7818_v32  ;;  %v5410_v63 = vmul.f32 -1.442695, %v7824_v15 }
 0x704   :  { %6065 = vtanh.f32 %v7843_v42  ;;  %v5413_v27 = vmul.f32 -1.442695, %v7833_v22  ;;  %v5402_v32 = vmul.f32 -1.442695, %v7843_v42  ;;  %v5409_v22 = vmul.f32 -1.442695, %v7852_v13 }
 0x705   :  { %6067 = vtanh.f32 %v7847_v5  ;;  %v5411_v42 = vmul.f32 -1.442695, %v7861_v43 }
 0x706   :  { %6069 = vtanh.f32 %v7852_v13  ;;  %v5401_v13 = vmul.f32 -1.442695, %v7871_v6 }
 0x707   :  { %6071 = vtanh.f32 %v7857_v55 }
 0x708   :  { %6073 = vtanh.f32 %v7861_v43 }
 0x709   :  { %v6056_v56 = vpop.eup %6055  ;;  %6075 = vtanh.f32 %v7866_v38 }
 0x70a   :  { %1820 = vrot.lane.b32.xlu0 %v6056_v56, %s6994_s3  ;;  %v6058_v62 = vpop.eup %6057  ;;  %6077 = vtanh.f32 %v7871_v6  ;;  %v7894_v56 = vadd.f32 %v1579_v16, %v7281_v29 }
 0x70b   :  { %1824 = vrot.lane.b32.xlu1 %v6058_v62, %s6994_s3  ;;  %v6060_v4 = vpop.eup %6059  ;;  %6079 = vtanh.f32 %v7875_v48 }
 0x70c   :  { %v6062_v17 = vpop.eup %6061  ;;  %6081 = vtanh.f32 %v7880_v14 }
 0x70d   :  { %v6064_v28 = vpop.eup %6063  ;;  %6083 = vtanh.f32 %v7888_v2 }
 0x70e   :  { %1828 = vrot.lane.b32.xlu0 %v6060_v4, %s6994_s3  ;;  %v6066_v9 = vpop.eup %6065  ;;  %6085 = vtanh.f32 %v7894_v56 }
 0x70f   :  { %1808 = vrot.lane.b32.xlu1 %v6066_v9, %s6994_s3  ;;  %v6068_v49 = vpop.eup %6067  ;;  %6087 = vpow2.f32 %v5408_v36 }
 0x710   :  { %v6070_v52 = vpop.eup %6069  ;;  %6089 = vpow2.f32 %v5410_v63 }
 0x711   :  { %v6072_v20 = vpop.eup %6071 }
 0x712   :  { %1830 = vrot.lane.b32.xlu0 %v6062_v17, %s6994_s3  ;;  %v6074_v3 = vpop.eup %6073  ;;  %v5412_v17 = vmul.f32 -1.442695, %v7828_v12 }
 0x713   :  { %1822 = vrot.lane.b32.xlu1 %v6070_v52, %s6994_s3  ;;  %v6076_v19 = vpop.eup %6075 }
 0x714   :  { %v6078_v61 = vpop.eup %6077  ;;  %6091 = vpow2.f32 %v5412_v17 }
 0x715   :  { %v6080_v57 = vpop.eup %6079  ;;  %6093 = vpow2.f32 %v5413_v27 }
 0x716   :  { %1804 = vrot.lane.b32.xlu0 %v6064_v28, %s6994_s3  ;;  %v6082_v62 = vpop.eup %6081  ;;  %v5400_v28 = vmul.f32 -1.442695, %v7838_v24 }
 0x717   :  { %1826 = vrot.lane.b32.xlu1 %v6074_v3, %s6994_s3  ;;  %v6084_v31 = vpop.eup %6083 }
 0x718   :  { %v6086_v4 = vpop.eup %6085 }
 0x719   :  { %v6088_v40 = vpop.eup %6087 }
 0x71a   :  { %1810 = vrot.lane.b32.xlu0 %v6068_v49, %s6994_s3  ;;  %v1668_v26 = vadd.f32 1.0, %v6088_v40  ;;  %v6090_v59 = vpop.eup %6089  ;;  %v5403_v49 = vmul.f32 -1.442695, %v7847_v5  ;;  %v5405_v5 = vmul.f32 -1.442695, %v7866_v38 }
 0x71b   :  { %1806 = vrot.lane.b32.xlu1 %v6078_v61, %s6994_s3  ;;  %v1670_v9 = vadd.f32 1.0, %v6090_v59  ;;  %v5414_v61 = vmul.f32 -1.442695, %v7875_v48  ;;  %v5406_v38 = vmul.f32 -1.442695, %v7880_v14 }
 0x71c   :  { %6095 = vrcp.f32 %v1668_v26  ;;  %v5407_v26 = vmul.f32 -1.442695, %v7888_v2 }
 0x71d   :  { %6097 = vpow2.f32 %v5400_v28 }
 0x71e   :  { %1812 = vrot.lane.b32.xlu0 %v6072_v20, %s6994_s3  ;;  %v6092_v18 = vpop.eup %6091  ;;  %6099 = vrcp.f32 %v1670_v9  ;;  %v5404_v20 = vmul.f32 -1.442695, %v7857_v55 }
 0x71f   :  { %1816 = vrot.lane.b32.xlu1 %v6082_v62, %s6994_s3  ;;  %v1672_v15 = vadd.f32 1.0, %v6092_v18  ;;  %v6094_v12 = vpop.eup %6093  ;;  %6101 = vpow2.f32 %v5402_v32 }
 0x720   :  { %6103 = vpow2.f32 %v5403_v49  ;;  %v1673_v16 = vadd.f32 1.0, %v6094_v12  ;;  %v5415_v49 = vmul.f32 -1.442695, %v7894_v56 }
 0x721   :  { %6105 = vrcp.f32 %v1672_v15 }
 0x722   :  { %1814 = vrot.lane.b32.xlu0 %v6076_v19, %s6994_s3  ;;  %6107 = vpow2.f32 %v5409_v22 }
 0x723   :  { %1818 = vrot.lane.b32.xlu1 %v6084_v31, %s6994_s3  ;;  %6109 = vpow2.f32 %v5404_v20 }
 0x724   :  { %6111 = vrcp.f32 %v1673_v16 }
 0x725   :  { %6113 = vpow2.f32 %v5411_v42 }
 0x726   :  { %1832 = vrot.lane.b32.xlu0 %v6080_v57, %s6994_s3  ;;  %v7911_v51 = vpop.eup %6095  ;;  %6115 = vpow2.f32 %v5405_v5 }
 0x727   :  { %1834 = vrot.lane.b32.xlu1 %v6086_v4, %s6994_s3  ;;  %v6098_v3 = vpop.eup %6097  ;;  %6117 = vpow2.f32 %v5401_v13 }
 0x728   :  { %v7920_v19 = vpop.eup %6099  ;;  %v1660_v4 = vadd.f32 1.0, %v6098_v3  ;;  %6119 = vpow2.f32 %v5414_v61 }
 0x729   :  { %v6102_v55 = vpop.eup %6101 }
 0x72a   :  { %v6104_v62 = vpop.eup %6103  ;;  %v1662_v63 = vadd.f32 1.0, %v6102_v55  ;;  %6121 = vrcp.f32 %v1660_v4 }
 0x72b   :  { %v7924_v43 = vpop.eup %6105  ;;  %v1663_v40 = vadd.f32 1.0, %v6104_v62  ;;  %6123 = vpow2.f32 %v5406_v38 }
 0x72c   :  { %v6108_v17 = vpop.eup %6107  ;;  %6125 = vrcp.f32 %v1662_v63 }
 0x72d   :  { %v6110_v48 = vpop.eup %6109  ;;  %v1669_v14 = vadd.f32 1.0, %v6108_v17  ;;  %6127 = vrcp.f32 %v1663_v40 }
 0x72e   :  { %v7930_v27 = vpop.eup %6111  ;;  %v1664_v9 = vadd.f32 1.0, %v6110_v48  ;;  %6129 = vpow2.f32 %v5407_v26 }
 0x72f   :  { %v6114_v18 = vpop.eup %6113  ;;  %6131 = vrcp.f32 %v1669_v14 }
 0x730   :  { %v6116_v32 = vpop.eup %6115  ;;  %v1671_v15 = vadd.f32 1.0, %v6114_v18  ;;  %6133 = vrcp.f32 %v1664_v9 }
 0x731   :  { %v6118_v12 = vpop.eup %6117  ;;  %v1665_v22 = vadd.f32 1.0, %v6116_v32  ;;  %6135 = vpow2.f32 %v5415_v49 }
 0x732   :  { %v6120_v2 = vpop.eup %6119  ;;  %6137 = vrcp.f32 %v1671_v15 }
 0x733   :  { %6139 = vrcp.f32 %v1665_v22  ;;  %v1674_v56 = vadd.f32 1.0, %v6120_v2 }
 0x77c   :  { %v1821_v52 = vpop.permute.xlu0 %1820 }
 0x77d   :  { %v1860_v24 = vmul.f32 %v7911_v51, %v1821_v52  ;;  %v1825_v57 = vpop.permute.xlu1 %1824  ;;  %v7936_v52 = vpop.eup %6121 }
 0x77e   :  { %v1862_v31 = vmul.f32 %v7920_v19, %v1825_v57  ;;  %v6124_v16 = vpop.eup %6123 }
 0x77f   :  { %1900 = vrot.lane.b32.xlu0 %v1860_v24, %s6995_s23  ;;  %v1661_v24 = vadd.f32 1.0, %v6118_v12  ;;  %v7939_v5 = vpop.eup %6125  ;;  %v1666_v57 = vadd.f32 1.0, %v6124_v16 }
 0x780   :  { %v1829_v36 = vpop.permute.xlu0 %1828  ;;  %1904 = vrot.lane.b32.xlu1 %v1862_v31, %s6995_s23  ;;  %v7943_v55 = vpop.eup %6127 }
 0x781   :  { %v1864_v6 = vmul.f32 %v7924_v43, %v1829_v36  ;;  %v1809_v3 = vpop.permute.xlu1 %1808  ;;  %6141 = vrcp.f32 %v1661_v24  ;;  %v6130_v62 = vpop.eup %6129 }
 0x782   :  { %v1854_v13 = vmul.f32 %v7939_v5, %v1809_v3  ;;  %v7947_v4 = vpop.eup %6131  ;;  %6143 = vrcp.f32 %v1674_v56  ;;  %v1667_v17 = vadd.f32 1.0, %v6130_v62 }
 0x783   :  { %1908 = vrot.lane.b32.xlu0 %v1864_v6, %s6995_s23  ;;  %v7951_v63 = vpop.eup %6133  ;;  %6145 = vrcp.f32 %v1666_v57 }
 0x784   :  { %v1831_v59 = vpop.permute.xlu0 %1830  ;;  %1888 = vrot.lane.b32.xlu1 %v1854_v13, %s6995_s23  ;;  %v6136_v48 = vpop.eup %6135  ;;  %6147 = vrcp.f32 %v1667_v17  ;;  %v1750_v17 = vrot.slane %v7727_v37, 7 }
 0x785   :  { %v1865_v28 = vmul.f32 %v7930_v27, %v1831_v59  ;;  %v1823_v38 = vpop.permute.xlu1 %1822  ;;  %v7955_v26 = vpop.eup %6137  ;;  %v1675_v9 = vadd.f32 1.0, %v6136_v48  ;;  %v1752_v48 = vrot.slane %v7699_v47, 7 }
 0x786   :  { %v1861_v36 = vmul.f32 %v7947_v4, %v1823_v38 }
 0x787   :  { %1910 = vrot.lane.b32.xlu0 %v1865_v28, %s6995_s23  ;;  %v7959_v28 = vpop.eup %6139  ;;  %6149 = vrcp.f32 %v1675_v9 }
 0x788   :  { %v1805_v20 = vpop.permute.xlu0 %1804  ;;  %1902 = vrot.lane.b32.xlu1 %v1861_v36, %s6995_s23 }
 0x789   :  { %v1852_v42 = vmul.f32 %v7936_v52, %v1805_v20  ;;  %v1827_v59 = vpop.permute.xlu1 %1826 }
 0x78a   :  { %v1863_v14 = vmul.f32 %v7955_v26, %v1827_v59 }
 0x78b   :  { %1884 = vrot.lane.b32.xlu0 %v1852_v42, %s6995_s23  ;;  %v7963_v49 = vpop.eup %6141 }
 0x78c   :  { %v1811_v61 = vpop.permute.xlu0 %1810  ;;  %1906 = vrot.lane.b32.xlu1 %v1863_v14, %s6995_s23  ;;  %v7967_v22 = vpop.eup %6143 }
 0x78d   :  { %v1855_v31 = vmul.f32 %v7943_v55, %v1811_v61  ;;  %v1807_v15 = vpop.permute.xlu1 %1806  ;;  %v7971_v24 = vpop.eup %6145 }
 0x78e   :  { %v1853_v12 = vmul.f32 %v7963_v49, %v1807_v15  ;;  %v7976_v3 = vpop.eup %6147 }
 0x78f   :  { %1890 = vrot.lane.b32.xlu0 %v1855_v31, %s6995_s23  ;;  %v1748_v31 = vrot.slane %v7682_v44, 7 }
 0x790   :  { %v1813_v6 = vpop.permute.xlu0 %1812  ;;  %1886 = vrot.lane.b32.xlu1 %v1853_v12, %s6995_s23 }
 0x791   :  { %v1856_v40 = vmul.f32 %v7951_v63, %v1813_v6  ;;  %v1817_v16 = vpop.permute.xlu1 %1816  ;;  %v7980_v61 = vpop.eup %6149  ;;  %v1780_v38 = vmul.f32 %v7911_v51, %v1748_v31 }
 0x792   :  { %v1858_v42 = vmul.f32 %v7971_v24, %v1817_v16 }
 0x793   :  { %1892 = vrot.lane.b32.xlu0 %v1856_v40, %s6995_s23  ;;  %v1782_v40 = vmul.f32 %v7920_v19, %v1750_v17 }
 0x794   :  { %v1815_v18 = vpop.permute.xlu0 %1814  ;;  %1896 = vrot.lane.b32.xlu1 %v1858_v42, %s6995_s23 }
 0x795   :  { %v1857_v32 = vmul.f32 %v7959_v28, %v1815_v18  ;;  %v1819_v56 = vpop.permute.xlu1 %1818  ;;  %v1784_v18 = vmul.f32 %v7924_v43, %v1752_v48  ;;  %v9812_v48 = vld [vmem:[#allocation25_spill] sm:$0xff] }
 0x796   :  { %v1859_v13 = vmul.f32 %v7976_v3, %v1819_v56 }
 0x797   :  { %1894 = vrot.lane.b32.xlu0 %v1857_v32, %s6995_s23  ;;  %v1753_v32 = vrot.slane %v7703_v33, 7  ;;  %v1742_v33 = vrot.slane %v7738_v25, 7 }
 0x798   :  { %v1833_v2 = vpop.permute.xlu0 %1832  ;;  %1898 = vrot.lane.b32.xlu1 %v1859_v13, %s6995_s23  ;;  %v1743_v13 = vrot.slane %v7724_v58, 7 }
 0x799   :  { %v1866_v20 = vmul.f32 %v7967_v22, %v1833_v2  ;;  %v1835_v57 = vpop.permute.xlu1 %1834  ;;  %v1785_v47 = vmul.f32 %v7930_v27, %v1753_v32  ;;  %v1740_v2 = vrot.slane %v7713_v53, 7  ;;  %v1749_v53 = vrot.slane %v7688_v45, 7  ;;  %v9813_v45 = vld [vmem:[#allocation23_spill] sm:$0xff] }
 0x79a   :  { %v1867_v62 = vmul.f32 %v7980_v61, %v1835_v57  ;;  %v1774_v57 = vmul.f32 %v7939_v5, %v1742_v33  ;;  %v1775_v25 = vmul.f32 %v7943_v55, %v1743_v13 }
 0x79b   :  { %1912 = vrot.lane.b32.xlu0 %v1866_v20, %s6995_s23  ;;  %v1772_v16 = vmul.f32 %v7936_v52, %v1740_v2  ;;  %v1781_v58 = vmul.f32 %v7947_v4, %v1749_v53 }
 0x79c   :  { %1914 = vrot.lane.b32.xlu1 %v1867_v62, %s6995_s23 }
 0x7f1   :  { %v1901_v36 = vpop.permute.xlu0 %1900 }
 0x7f2   :  { %v7986_v6 = vadd.f32 %v1901_v36, %v1780_v38  ;;  %v1905_v59 = vpop.permute.xlu1 %1904 }
 0x7f3   :  { %v7992_v14 = vadd.f32 %v1905_v59, %v1782_v40  ;;  %v1744_v40 = vrot.slane %v9812_v48, 7 }
 0x7f4   :  { %6151 = vtanh.f32 %v7986_v6 }
 0x7f5   :  { %9810 = vst [vmem:[#allocation27_spill] sm:$0xff] %v7992_v14  ;;  %v1909_v9 = vpop.permute.xlu0 %1908  ;;  %6153 = vtanh.f32 %v7992_v14  ;;  %v1776_v32 = vmul.f32 %v7951_v63, %v1744_v40 }
 0x7f6   :  { %v7997_v15 = vadd.f32 %v1909_v9, %v1784_v18  ;;  %v1889_v31 = vpop.permute.xlu1 %1888  ;;  %v1751_v9 = vrot.slane %v9813_v45, 7 }
 0x7f7   :  { %v8015_v38 = vadd.f32 %v1889_v31, %v1774_v57 }
 0x7f8   :  { %9811 = vst [vmem:[#allocation28_spill] sm:$0xff] %v7997_v15  ;;  %6155 = vtanh.f32 %v7997_v15 }
 0x7f9   :  { %v1911_v37 = vpop.permute.xlu0 %1910 }
 0x7fa   :  { %v8002_v12 = vadd.f32 %v1911_v37, %v1785_v47  ;;  %v1903_v18 = vpop.permute.xlu1 %1902  ;;  %v9814_v37 = vld [vmem:[#allocation20_spill] sm:$0xff] }
 0x7fb   :  { %v1745_v2 = vrot.slane %v9814_v37, 7 }
 0x7fc   :  { %6157 = vtanh.f32 %v8002_v12 }
 0x7fd   :  { %v1885_v56 = vpop.permute.xlu0 %1884  ;;  %v1777_v57 = vmul.f32 %v7959_v28, %v1745_v2 }
 0x7fe   :  { %v6152_v44 = vpop.eup %6151  ;;  %v8011_v62 = vadd.f32 %v1885_v56, %v1772_v16  ;;  %v1907_v16 = vpop.permute.xlu1 %1906 }
 0x7ff   :  { %1996 = vrot.lane.b32.xlu0 %v6152_v44, %s6994_s3  ;;  %v6154_v20 = vpop.eup %6153  ;;  %v8026_v44 = vadd.f32 %v1903_v18, %v1781_v58  ;;  %v9818_v18 = vld [vmem:[#allocation21_spill] sm:$0xff] }
 0x800   :  { %2000 = vrot.lane.b32.xlu1 %v6154_v20, %s6994_s3  ;;  %6159 = vtanh.f32 %v8011_v62  ;;  %v1783_v20 = vmul.f32 %v7955_v26, %v1751_v9  ;;  %v1746_v45 = vrot.slane %v9818_v18, 7 }
 0x801   :  { %v1891_v17 = vpop.permute.xlu0 %1890  ;;  %6161 = vtanh.f32 %v8015_v38 }
 0x802   :  { %v6156_v42 = vpop.eup %6155  ;;  %v8022_v59 = vadd.f32 %v1891_v17, %v1775_v25  ;;  %v8036_v13 = vadd.f32 %v1907_v16, %v1783_v20  ;;  %v9816_v25 = vld [vmem:[#allocation19_spill] sm:$0xff]  ;;  %v1887_v40 = vpop.permute.xlu1 %1886  ;;  %v1778_v2 = vmul.f32 %v7971_v24, %v1746_v45 }
 0x803   :  { %2004 = vrot.lane.b32.xlu0 %v6156_v42, %s6994_s3  ;;  %v9815_v42 = vld [vmem:[#allocation24_spill] sm:$0xff] }
 0x804   :  { %6163 = vtanh.f32 %v8022_v59  ;;  %v1741_v56 = vrot.slane %v9815_v42, 7 }
 0x805   :  { %v1893_v47 = vpop.permute.xlu0 %1892  ;;  %6165 = vtanh.f32 %v8026_v44 }
 0x806   :  { %v6158_v36 = vpop.eup %6157  ;;  %v8033_v33 = vadd.f32 %v1893_v47, %v1776_v32  ;;  %v1773_v17 = vmul.f32 %v7963_v49, %v1741_v56  ;;  %v1897_v16 = vpop.permute.xlu1 %1896  ;;  %v9821_v56 = vld [vmem:[#allocation22_spill] sm:$0xff] }
 0x807   :  { %2006 = vrot.lane.b32.xlu0 %v6158_v36, %s6994_s3  ;;  %v1754_v36 = vrot.slane %v9816_v25, 7 }
 0x808   :  { %6167 = vtanh.f32 %v8033_v33  ;;  %v8047_v9 = vadd.f32 %v1887_v40, %v1773_v17  ;;  %v9823_v40 = vld [vmem:[#allocation26_spill] sm:$0xff] }
 0x809   :  { %v1895_v31 = vpop.permute.xlu0 %1894  ;;  %6169 = vtanh.f32 %v8036_v13  ;;  %v1786_v32 = vmul.f32 %v7967_v22, %v1754_v36 }
 0x80a   :  { %v6160_v53 = vpop.eup %6159  ;;  %v8043_v48 = vadd.f32 %v1895_v31, %v1777_v57  ;;  %9819 = vst [vmem:[#allocation23_spill] sm:$0xff] %v8047_v9  ;;  %v1747_v57 = vrot.slane %v9821_v56, 7  ;;  %v8058_v31 = vadd.f32 %v1897_v16, %v1778_v2  ;;  %v1899_v36 = vpop.permute.xlu1 %1898 }
 0x80b   :  { %1980 = vrot.lane.b32.xlu0 %v6160_v53, %s6994_s3  ;;  %v6162_v58 = vpop.eup %6161 }
 0x80c   :  { %9817 = vst [vmem:[#allocation25_spill] sm:$0xff] %v8043_v48  ;;  %6171 = vtanh.f32 %v8043_v48  ;;  %1984 = vrot.lane.b32.xlu1 %v6162_v58, %s6994_s3  ;;  %9822 = vst [vmem:[#allocation24_spill] sm:$0xff] %v8058_v31  ;;  %v1779_v25 = vmul.f32 %v7976_v3, %v1747_v57  ;;  %v1755_v58 = vrot.slane %v9823_v40, 7 }
 0x80d   :  { %v1913_v47 = vpop.permute.xlu0 %1912  ;;  %6173 = vtanh.f32 %v8047_v9 }
 0x80e   :  { %v6164_v37 = vpop.eup %6163  ;;  %v8054_v20 = vadd.f32 %v1913_v47, %v1786_v32  ;;  %v8066_v18 = vadd.f32 %v1899_v36, %v1779_v25  ;;  %v1787_v32 = vmul.f32 %v7980_v61, %v1755_v58  ;;  %v1915_v47 = vpop.permute.xlu1 %1914 }
 0x80f   :  { %1986 = vrot.lane.b32.xlu0 %v6164_v37, %s6994_s3  ;;  %v6166_v42 = vpop.eup %6165 }
 0x810   :  { %9820 = vst [vmem:[#allocation20_spill] sm:$0xff] %v8054_v20  ;;  %6175 = vtanh.f32 %v8054_v20  ;;  %1998 = vrot.lane.b32.xlu1 %v6166_v42, %s6994_s3  ;;  %9824 = vst [vmem:[#allocation19_spill] sm:$0xff] %v8066_v18  ;;  %v8072_v2 = vadd.f32 %v1915_v47, %v1787_v32 }
 0x811   :  { %6177 = vtanh.f32 %v8058_v31 }
 0x812   :  { %v6168_v53 = vpop.eup %6167  ;;  %6179 = vtanh.f32 %v8066_v18  ;;  %9825 = vst [vmem:[#allocation21_spill] sm:$0xff] %v8072_v2 }
 0x813   :  { %1988 = vrot.lane.b32.xlu0 %v6168_v53, %s6994_s3  ;;  %v6170_v17 = vpop.eup %6169  ;;  %6181 = vtanh.f32 %v8072_v2 }
 0x814   :  { %2002 = vrot.lane.b32.xlu1 %v6170_v17, %s6994_s3 }
 0x816   :  { %v6172_v45 = vpop.eup %6171 }
 0x817   :  { %1990 = vrot.lane.b32.xlu0 %v6172_v45, %s6994_s3  ;;  %v6174_v37 = vpop.eup %6173 }
 0x818   :  { %1982 = vrot.lane.b32.xlu1 %v6174_v37, %s6994_s3 }
 0x81a   :  { %v6176_v16 = vpop.eup %6175 }
 0x81b   :  { %2008 = vrot.lane.b32.xlu0 %v6176_v16, %s6994_s3  ;;  %v6178_v42 = vpop.eup %6177 }
 0x81c   :  { %1992 = vrot.lane.b32.xlu1 %v6178_v42, %s6994_s3  ;;  %v6180_v56 = vpop.eup %6179 }
 0x81d   :  { %v6182_v57 = vpop.eup %6181 }
 0x820   :  { %1994 = vrot.lane.b32.xlu1 %v6180_v56, %s6994_s3 }
 0x824   :  { %2010 = vrot.lane.b32.xlu1 %v6182_v57, %s6994_s3 }
 0x871   :  { %v1997_v53 = vpop.permute.xlu0 %1996 }
 0x872   :  { %v2001_v17 = vpop.permute.xlu1 %2000  ;;  %v2036_v42 = vmul.f32 %v7911_v51, %v1997_v53 }
 0x874   :  { %v2074_v15 = vrot.slane %v2036_v42, 2 }
 0x875   :  { %v2005_v25 = vpop.permute.xlu0 %2004 }
 0x879   :  { %v2007_v36 = vpop.permute.xlu0 %2006 }
 0x87d   :  { %v1981_v40 = vpop.permute.xlu0 %1980 }
 0x87e   :  { %v1985_v58 = vpop.permute.xlu1 %1984  ;;  %v2028_v2 = vmul.f32 %v7936_v52, %v1981_v40 }
 0x881   :  { %v1987_v45 = vpop.permute.xlu0 %1986 }
 0x882   :  { %v1999_v32 = vpop.permute.xlu1 %1998  ;;  %v2031_v20 = vmul.f32 %v7943_v55, %v1987_v45  ;;  %v2040_v55 = vmul.f32 %v7924_v43, %v2005_v25 }
 0x883   :  { %v2037_v37 = vmul.f32 %v7947_v4, %v1999_v32  ;;  %v2060_v4 = vrot.slane %v2028_v2, 2 }
 0x884   :  { %v2064_v52 = vrot.slane %v2031_v20, 7  ;;  %v2041_v20 = vmul.f32 %v7930_v27, %v2007_v36  ;;  %v2080_v43 = vrot.slane %v2040_v55, 6 }
 0x885   :  { %v1989_v47 = vpop.permute.xlu0 %1988  ;;  %v2075_v18 = vrot.slane %v2037_v37, 1  ;;  %v2038_v37 = vmul.f32 %v7920_v19, %v2001_v17 }
 0x886   :  { %v2003_v16 = vpop.permute.xlu1 %2002  ;;  %v2032_v31 = vmul.f32 %v7951_v63, %v1989_v47 }
 0x887   :  { %v2039_v57 = vmul.f32 %v7955_v26, %v2003_v16  ;;  %v2076_v32 = vsel %vm840_vm1, %v2075_v18, %v2074_v15  ;;  %v2030_v26 = vmul.f32 %v7939_v5, %v1985_v58  ;;  %v2082_v58 = vrot.slane %v2041_v20, 5 }
 0x888   :  { %v2066_v63 = vrot.slane %v2032_v31, 6 }
 0x889   :  { %v1991_v56 = vpop.permute.xlu0 %1990  ;;  %v2078_v51 = vrot.slane %v2039_v57, 7 }
 0x88a   :  { %v1983_v9 = vpop.permute.xlu1 %1982  ;;  %v2033_v14 = vmul.f32 %v7959_v28, %v1991_v56 }
 0x88b   :  { %v2029_v48 = vmul.f32 %v7963_v49, %v1983_v9  ;;  %v2077_v9 = vsel %vm843_vm2, %v2038_v37, %v2076_v32 }
 0x88c   :  { %v2068_v28 = vrot.slane %v2033_v14, 5  ;;  %v2079_v19 = vsel %vm846_vm3, %v2078_v51, %v2077_v9 }
 0x88d   :  { %v2061_v53 = vrot.slane %v2029_v48, 1  ;;  %v2009_v40 = vpop.permute.xlu0 %2008  ;;  %v2081_v25 = vsel %vm849_vm4, %v2080_v43, %v2079_v19 }
 0x88e   :  { %v1993_v45 = vpop.permute.xlu1 %1992  ;;  %v2042_v48 = vmul.f32 %v7967_v22, %v2009_v40  ;;  %v2083_v56 = vsel %vm852_vm5, %v2082_v58, %v2081_v25 }
 0x88f   :  { %v2062_v47 = vsel %vm840_vm1, %v2061_v53, %v2060_v4  ;;  %v2034_v49 = vmul.f32 %v7971_v24, %v1993_v45 }
 0x890   :  { %v2063_v15 = vsel %vm843_vm2, %v2030_v26, %v2062_v47  ;;  %v2084_v17 = vrot.slane %v2042_v48, 4 }
 0x891   :  { %v2065_v5 = vsel %vm846_vm3, %v2064_v52, %v2063_v15  ;;  %v2070_v18 = vrot.slane %v2034_v49, 4 }
 0x892   :  { %v2067_v31 = vsel %vm849_vm4, %v2066_v63, %v2065_v5  ;;  %v1995_v2 = vpop.permute.xlu1 %1994 }
 0x893   :  { %v2035_v24 = vmul.f32 %v7976_v3, %v1995_v2  ;;  %v2069_v14 = vsel %vm852_vm5, %v2068_v28, %v2067_v31  ;;  %v2085_v3 = vsel %vm855_vm6, %v2084_v17, %v2083_v56 }
 0x894   :  { %v2071_v22 = vsel %vm855_vm6, %v2070_v18, %v2069_v14 }
 0x895   :  { %v2072_v27 = vrot.slane %v2035_v24, 3 }
 0x896   :  { %v2011_v36 = vpop.permute.xlu1 %2010 }
 0x897   :  { %v2043_v16 = vmul.f32 %v7980_v61, %v2011_v36  ;;  %v2073_v42 = vsel %vm858_vm7, %v2072_v27, %v2071_v22 }
 0x898   :  { %2088 = vrot.lane.b32.xlu0 %v2073_v42, %s6995_s23 }
 0x899   :  { %v2086_v57 = vrot.slane %v2043_v16, 3 }
 0x89b   :  { %v2087_v4 = vsel %vm858_vm7, %v2086_v57, %v2085_v3 }
 0x89c   :  { %2090 = vrot.lane.b32.xlu1 %v2087_v4, %s6995_s23 }
 0x90a   :  { %v2089_v32 = vpop.permute.xlu0 %2088 }
 0x90b   :  { %5652 = vmatprep.mubr.msk.f32.mxu1 %vm312_vm8, %v2089_v32 }
 0x90e   :  { %v2091_v51 = vpop.permute.xlu1 %2090 }
 0x90f   :  { %5653 = vmatmul.mubr.msk.f32.vlgmr.msra.gmra.mrb[6].mxu1 %vm312_vm8, %v2091_v51 }
 0x910   :  { %5757 = vmatpush3.bf16.msra.mxu1 %v7129_v7 }
 0x911   :  { %5759 = vmatprep.subr.bf16.mxu1 %v7132_v10 }
 0x914   :  { %5761 = vmatpush3.bf16.msra.mxu1 %v7132_v10 }
 0x915   :  { %5771 = vmatprep.subr.bf16.mxu1 %v7129_v7 }
 0x9e2   :  { %v8118_v61 = vpop.f32.mrb[6].mxu1 }
 0x9e3   :  { %v2162_v53 = vpop.f32.mrb[7].mxu1  ;;  %v2181_v52 = vrot.slane %v8118_v61, 6  ;;  %v2184_v40 = vrot.slane %v8118_v61, 2  ;;  %v8127_v26 = vadd.f32 %v8118_v61, %v7232_v0  ;;  %v2180_v15 = vrot.slane %v8118_v61, 5 }
 0x9e4   :  { %v2173_v45 = vrot.slane %v2162_v53, 5  ;;  %v2175_v49 = vrot.slane %v2162_v53, 7  ;;  %v8142_v48 = vadd.f32 %v2162_v53, %v7203_v50  ;;  %v2176_v20 = vrot.slane %v2162_v53, 1 }
 0x9e5   :  { %v8123_v37 = vadd.f32 %v2181_v52, %v7211_v54  ;;  %v8130_v55 = vadd.f32 %v2184_v40, %v7244_v8  ;;  %v2182_v5 = vrot.slane %v8118_v61, 7  ;;  %v8151_v43 = vadd.f32 %v2180_v15, %v7235_v1 }
 0x9e6   :  { %v8137_v28 = vadd.f32 %v2173_v45, %v7169_v30  ;;  %v8146_v19 = vadd.f32 %v2175_v49, %v7188_v41  ;;  %v2177_v18 = vrot.slane %v2162_v53, 2  ;;  %v8155_v31 = vadd.f32 %v2176_v20, %v7223_v60 }
 0x9e7   :  { %6183 = vtanh.f32 %v8123_v37  ;;  %v2183_v2 = vrot.slane %v8118_v61, 1  ;;  %v8160_v24 = vadd.f32 %v2182_v5, %v7251_v11  ;;  %v2178_v14 = vrot.slane %v2162_v53, 3 }
 0x9e8   :  { %6185 = vtanh.f32 %v8127_v26  ;;  %v8164_v25 = vadd.f32 %v2177_v18, %v7185_v39  ;;  %v2174_v58 = vrot.slane %v2162_v53, 6  ;;  %v2185_v27 = vrot.slane %v8118_v61, 3 }
 0x9e9   :  { %6187 = vtanh.f32 %v8130_v55  ;;  %v8168_v22 = vadd.f32 %v2183_v2, %v7274_v23  ;;  %v8174_v36 = vadd.f32 %v2178_v14, %v7196_v46  ;;  %v2179_v56 = vrot.slane %v2162_v53, 4 }
 0x9ea   :  { %6189 = vtanh.f32 %v8137_v28  ;;  %v8180_v3 = vadd.f32 %v2174_v58, %v7176_v35  ;;  %v8184_v57 = vadd.f32 %v2185_v27, %v7287_v34  ;;  %v2186_v51 = vrot.slane %v8118_v61, 4 }
 0x9eb   :  { %6191 = vtanh.f32 %v8142_v48  ;;  %v8190_v52 = vadd.f32 %v2179_v56, %v7266_v21  ;;  %v5427_v20 = vmul.f32 -1.442695, %v8123_v37  ;;  %v5429_v5 = vmul.f32 -1.442695, %v8127_v26 }
 0x9ec   :  { %6193 = vtanh.f32 %v8146_v19  ;;  %v8197_v45 = vadd.f32 %v2186_v51, %v7281_v29  ;;  %v5431_v18 = vmul.f32 -1.442695, %v8130_v55  ;;  %v5420_v56 = vmul.f32 -1.442695, %v8146_v19 }
 0x9ed   :  { %6195 = vtanh.f32 %v8151_v43  ;;  %v5426_v26 = vmul.f32 -1.442695, %v8151_v43  ;;  %v5422_v55 = vmul.f32 -1.442695, %v8155_v31  ;;  %v5430_v19 = vmul.f32 -1.442695, %v8168_v22 }
 0x9ee   :  { %6197 = vtanh.f32 %v8155_v31  ;;  %v5424_v43 = vmul.f32 -1.442695, %v8174_v36 }
 0x9ef   :  { %6199 = vtanh.f32 %v8160_v24 }
 0x9f0   :  { %6201 = vtanh.f32 %v8164_v25 }
 0x9f1   :  { %v6184_v63 = vpop.eup %6183  ;;  %6203 = vtanh.f32 %v8168_v22  ;;  %v5419_v22 = vmul.f32 -1.442695, %v8180_v3 }
 0x9f2   :  { %2429 = vrot.lane.b32.xlu0 %v6184_v63, %s6994_s3  ;;  %v6186_v47 = vpop.eup %6185  ;;  %6205 = vtanh.f32 %v8174_v36 }
 0x9f3   :  { %2433 = vrot.lane.b32.xlu1 %v6186_v47, %s6994_s3  ;;  %v6188_v9 = vpop.eup %6187  ;;  %6207 = vtanh.f32 %v8180_v3 }
 0x9f4   :  { %v6190_v17 = vpop.eup %6189  ;;  %6209 = vtanh.f32 %v8184_v57 }
 0x9f5   :  { %v6192_v16 = vpop.eup %6191  ;;  %6211 = vtanh.f32 %v8190_v52 }
 0x9f6   :  { %2437 = vrot.lane.b32.xlu0 %v6188_v9, %s6994_s3  ;;  %v6194_v42 = vpop.eup %6193  ;;  %6213 = vtanh.f32 %v8197_v45 }
 0x9f7   :  { %2417 = vrot.lane.b32.xlu1 %v6192_v16, %s6994_s3  ;;  %v6196_v4 = vpop.eup %6195  ;;  %6215 = vpow2.f32 %v5427_v20 }
 0x9f8   :  { %v6198_v32 = vpop.eup %6197  ;;  %6217 = vpow2.f32 %v5429_v5 }
 0x9f9   :  { %v6200_v53 = vpop.eup %6199  ;;  %6219 = vpow2.f32 %v5431_v18  ;;  %v5425_v18 = vmul.f32 -1.442695, %v8190_v52 }
 0x9fa   :  { %2411 = vrot.lane.b32.xlu0 %v6190_v17, %s6994_s3  ;;  %v6202_v40 = vpop.eup %6201  ;;  %v5418_v17 = vmul.f32 -1.442695, %v8137_v28  ;;  %v5428_v28 = vmul.f32 -1.442695, %v8160_v24 }
 0x9fb   :  { %2427 = vrot.lane.b32.xlu1 %v6196_v4, %s6994_s3  ;;  %v6204_v61 = vpop.eup %6203  ;;  %v5423_v4 = vmul.f32 -1.442695, %v8164_v25  ;;  %v5432_v25 = vmul.f32 -1.442695, %v8184_v57 }
 0x9fc   :  { %v6206_v63 = vpop.eup %6205  ;;  %6221 = vpow2.f32 %v5418_v17 }
 0x9fd   :  { %v6208_v47 = vpop.eup %6207 }
 0x9fe   :  { %2415 = vrot.lane.b32.xlu0 %v6194_v42, %s6994_s3  ;;  %v6210_v49 = vpop.eup %6209  ;;  %v5421_v42 = vmul.f32 -1.442695, %v8142_v48 }
 0x9ff   :  { %2431 = vrot.lane.b32.xlu1 %v6200_v53, %s6994_s3  ;;  %v6212_v9 = vpop.eup %6211 }
 0xa00   :  { %v6214_v15 = vpop.eup %6213 }
 0xa01   :  { %v6216_v2 = vpop.eup %6215 }
 0xa02   :  { %2419 = vrot.lane.b32.xlu0 %v6198_v32, %s6994_s3  ;;  %v6218_v14 = vpop.eup %6217  ;;  %v2276_v58 = vadd.f32 1.0, %v6216_v2 }
 0xa03   :  { %2435 = vrot.lane.b32.xlu1 %v6204_v61, %s6994_s3  ;;  %v6220_v27 = vpop.eup %6219  ;;  %v2278_v16 = vadd.f32 1.0, %v6218_v14 }
 0xa04   :  { %6223 = vrcp.f32 %v2276_v58  ;;  %v2280_v37 = vadd.f32 1.0, %v6220_v27  ;;  %v5433_v58 = vmul.f32 -1.442695, %v8197_v45 }
 0xa05   :  { %6225 = vrcp.f32 %v2278_v16 }
 0xa06   :  { %2421 = vrot.lane.b32.xlu0 %v6202_v40, %s6994_s3  ;;  %6227 = vpow2.f32 %v5421_v42  ;;  %v6222_v48 = vpop.eup %6221 }
 0xa07   :  { %2413 = vrot.lane.b32.xlu1 %v6208_v47, %s6994_s3  ;;  %6229 = vpow2.f32 %v5420_v56  ;;  %v2267_v24 = vadd.f32 1.0, %v6222_v48 }
 0xa08   :  { %6231 = vrcp.f32 %v2280_v37 }
 0xa09   :  { %6233 = vpow2.f32 %v5426_v26 }
 0xa0a   :  { %2423 = vrot.lane.b32.xlu0 %v6206_v63, %s6994_s3  ;;  %6235 = vpow2.f32 %v5422_v55 }
 0xa0b   :  { %2425 = vrot.lane.b32.xlu1 %v6212_v9, %s6994_s3  ;;  %6237 = vpow2.f32 %v5428_v28 }
 0xa0c   :  { %6239 = vpow2.f32 %v5423_v4 }
 0xa0d   :  { %6241 = vpow2.f32 %v5430_v19 }
 0xa0e   :  { %2439 = vrot.lane.b32.xlu0 %v6210_v49, %s6994_s3  ;;  %v8218_v32 = vpop.eup %6223  ;;  %6243 = vpow2.f32 %v5424_v43 }
 0xa0f   :  { %2441 = vrot.lane.b32.xlu1 %v6214_v15, %s6994_s3  ;;  %v8221_v53 = vpop.eup %6225  ;;  %6245 = vrcp.f32 %v2267_v24 }
 0xa10   :  { %v6228_v40 = vpop.eup %6227  ;;  %6247 = vpow2.f32 %v5432_v25 }
 0xa11   :  { %v6230_v63 = vpop.eup %6229  ;;  %v2270_v36 = vadd.f32 1.0, %v6228_v40  ;;  %6249 = vpow2.f32 %v5419_v22 }
 0xa12   :  { %v8228_v49 = vpop.eup %6231  ;;  %v2269_v5 = vadd.f32 1.0, %v6230_v63 }
 0xa13   :  { %v6234_v20 = vpop.eup %6233  ;;  %6251 = vrcp.f32 %v2270_v36 }
 0xa14   :  { %v6236_v57 = vpop.eup %6235  ;;  %v2275_v2 = vadd.f32 1.0, %v6234_v20  ;;  %6253 = vrcp.f32 %v2269_v5 }
 0xa15   :  { %v6238_v3 = vpop.eup %6237  ;;  %v2271_v14 = vadd.f32 1.0, %v6236_v57  ;;  %6255 = vpow2.f32 %v5425_v18 }
 0xa16   :  { %v6240_v17 = vpop.eup %6239  ;;  %6257 = vrcp.f32 %v2275_v2  ;;  %v2277_v27 = vadd.f32 1.0, %v6238_v3 }
 0xa17   :  { %v6242_v16 = vpop.eup %6241  ;;  %6259 = vrcp.f32 %v2271_v14  ;;  %v2272_v42 = vadd.f32 1.0, %v6240_v17 }
 0xa18   :  { %v6244_v56 = vpop.eup %6243  ;;  %6261 = vpow2.f32 %v5433_v58  ;;  %v2279_v28 = vadd.f32 1.0, %v6242_v16 }
 0xa19   :  { %v8236_v37 = vpop.eup %6245  ;;  %6263 = vrcp.f32 %v2277_v27  ;;  %v2273_v48 = vadd.f32 1.0, %v6244_v56 }
 0xa1a   :  { %v6248_v52 = vpop.eup %6247  ;;  %6265 = vrcp.f32 %v2272_v42 }
 0xa1b   :  { %v6250_v4 = vpop.eup %6249  ;;  %6267 = vrcp.f32 %v2279_v28  ;;  %v2281_v63 = vadd.f32 1.0, %v6248_v52 }
 0xa1c   :  { %6269 = vrcp.f32 %v2273_v48 }
 0xa1d   :  { %v8239_v45 = vpop.eup %6251 }
 0xa64   :  { %v2430_v51 = vpop.permute.xlu0 %2429 }
 0xa65   :  { %v2468_v31 = vmul.f32 %v8218_v32, %v2430_v51  ;;  %v2434_v61 = vpop.permute.xlu1 %2433  ;;  %v8242_v51 = vpop.eup %6253 }
 0xa66   :  { %v2470_v47 = vmul.f32 %v8221_v53, %v2434_v61  ;;  %v2268_v61 = vadd.f32 1.0, %v6250_v4  ;;  %v6256_v24 = vpop.eup %6255 }
 0xa67   :  { %2509 = vrot.lane.b32.xlu0 %v2468_v31, %s6995_s23  ;;  %v8247_v25 = vpop.eup %6257  ;;  %v2274_v20 = vadd.f32 1.0, %v6256_v24 }
 0xa68   :  { %v2438_v9 = vpop.permute.xlu0 %2437  ;;  %2513 = vrot.lane.b32.xlu1 %v2470_v47, %s6995_s23  ;;  %v8250_v22 = vpop.eup %6259  ;;  %6271 = vrcp.f32 %v2268_v61 }
 0xa69   :  { %v2472_v15 = vmul.f32 %v8228_v49, %v2438_v9  ;;  %v2418_v19 = vpop.permute.xlu1 %2417  ;;  %v6262_v5 = vpop.eup %6261  ;;  %6273 = vrcp.f32 %v2281_v63 }
 0xa6a   :  { %v2462_v43 = vmul.f32 %v8239_v45, %v2418_v19  ;;  %v8255_v57 = vpop.eup %6263  ;;  %6275 = vrcp.f32 %v2274_v20  ;;  %v2282_v58 = vadd.f32 1.0, %v6262_v5  ;;  %v2360_v5 = vrot.slane %v8002_v12, 7 }
 0xa6b   :  { %2517 = vrot.lane.b32.xlu0 %v2472_v15, %s6995_s23  ;;  %v8258_v2 = vpop.eup %6265  ;;  %v2347_v12 = vrot.slane %v8011_v62, 7 }
 0xa6c   :  { %v2412_v26 = vpop.permute.xlu0 %2411  ;;  %2497 = vrot.lane.b32.xlu1 %v2462_v43, %s6995_s23  ;;  %v8263_v27 = vpop.eup %6267  ;;  %6277 = vrcp.f32 %v2282_v58  ;;  %v2392_v58 = vmul.f32 %v8228_v49, %v2360_v5  ;;  %v9829_v5 = vld [vmem:[#allocation27_spill] sm:$0xff] }
 0xa6d   :  { %v2459_v55 = vmul.f32 %v8236_v37, %v2412_v26  ;;  %v2428_v47 = vpop.permute.xlu1 %2427  ;;  %v8266_v42 = vpop.eup %6269 }
 0xa6e   :  { %v2467_v9 = vmul.f32 %v8247_v25, %v2428_v47 }
 0xa6f   :  { %2491 = vrot.lane.b32.xlu0 %v2459_v55, %s6995_s23 }
 0xa70   :  { %v2416_v31 = vpop.permute.xlu0 %2415  ;;  %2507 = vrot.lane.b32.xlu1 %v2467_v9, %s6995_s23  ;;  %v2356_v9 = vrot.slane %v8026_v44, 7 }
 0xa71   :  { %v2461_v40 = vmul.f32 %v8242_v51, %v2416_v31  ;;  %v2432_v18 = vpop.permute.xlu1 %2431 }
 0xa72   :  { %v2469_v3 = vmul.f32 %v8255_v57, %v2432_v18  ;;  %v8271_v55 = vpop.eup %6271 }
 0xa73   :  { %2495 = vrot.lane.b32.xlu0 %v2461_v40, %s6995_s23  ;;  %v8274_v4 = vpop.eup %6273 }
 0xa74   :  { %v2420_v36 = vpop.permute.xlu0 %2419  ;;  %2511 = vrot.lane.b32.xlu1 %v2469_v3, %s6995_s23  ;;  %v8279_v31 = vpop.eup %6275 }
 0xa75   :  { %v2463_v15 = vmul.f32 %v8250_v22, %v2420_v36  ;;  %v2436_v16 = vpop.permute.xlu1 %2435  ;;  %v2358_v36 = vrot.slane %v8036_v13, 7 }
 0xa76   :  { %v2471_v56 = vmul.f32 %v8263_v27, %v2436_v16  ;;  %v8284_v24 = vpop.eup %6277 }
 0xa77   :  { %2499 = vrot.lane.b32.xlu0 %v2463_v15, %s6995_s23  ;;  %v2388_v15 = vmul.f32 %v8218_v32, %v2356_v9  ;;  %v2390_v18 = vmul.f32 %v8221_v53, %v2358_v36  ;;  %v2351_v9 = vrot.slane %v8033_v33, 7 }
 0xa78   :  { %v2422_v14 = vpop.permute.xlu0 %2421  ;;  %2515 = vrot.lane.b32.xlu1 %v2471_v56, %s6995_s23 }
 0xa79   :  { %v2464_v17 = vmul.f32 %v8258_v2, %v2422_v14  ;;  %v2414_v28 = vpop.permute.xlu1 %2413 }
 0xa7a   :  { %v2460_v48 = vmul.f32 %v8271_v55, %v2414_v28 }
 0xa7b   :  { %2501 = vrot.lane.b32.xlu0 %v2464_v17, %s6995_s23 }
 0xa7c   :  { %v2424_v26 = vpop.permute.xlu0 %2423  ;;  %2493 = vrot.lane.b32.xlu1 %v2460_v48, %s6995_s23 }
 0xa7d   :  { %v2465_v52 = vmul.f32 %v8266_v42, %v2424_v26  ;;  %v2426_v40 = vpop.permute.xlu1 %2425  ;;  %v2379_v26 = vmul.f32 %v8236_v37, %v2347_v12 }
 0xa7e   :  { %v2466_v61 = vmul.f32 %v8279_v31, %v2426_v40 }
 0xa7f   :  { %2503 = vrot.lane.b32.xlu0 %v2465_v52, %s6995_s23  ;;  %v2350_v52 = vrot.slane %v8022_v59, 7 }
 0xa80   :  { %v2440_v19 = vpop.permute.xlu0 %2439  ;;  %2505 = vrot.lane.b32.xlu1 %v2466_v61, %s6995_s23 }
 0xa81   :  { %v2473_v43 = vmul.f32 %v8274_v4, %v2440_v19  ;;  %v2442_v63 = vpop.permute.xlu1 %2441  ;;  %v2349_v19 = vrot.slane %v8015_v38, 7  ;;  %v2382_v40 = vmul.f32 %v8239_v45, %v2350_v52 }
 0xa82   :  { %v2474_v47 = vmul.f32 %v8284_v24, %v2442_v63  ;;  %v2355_v63 = vrot.slane %v7986_v6, 7 }
 0xa83   :  { %2519 = vrot.lane.b32.xlu0 %v2473_v43, %s6995_s23  ;;  %v2381_v61 = vmul.f32 %v8242_v51, %v2349_v19 }
 0xa84   :  { %2521 = vrot.lane.b32.xlu1 %v2474_v47, %s6995_s23  ;;  %v2387_v38 = vmul.f32 %v8247_v25, %v2355_v63 }
 0xad9   :  { %v2510_v20 = vpop.permute.xlu0 %2509 }
 0xada   :  { %v8293_v3 = vadd.f32 %v2510_v20, %v2388_v15  ;;  %v2514_v14 = vpop.permute.xlu1 %2513  ;;  %v2383_v20 = vmul.f32 %v8250_v22, %v2351_v9 }
 0xadb   :  { %v8295_v17 = vadd.f32 %v2514_v14, %v2390_v18  ;;  %v2357_v18 = vrot.slane %v9829_v5, 7 }
 0xadc   :  { %6279 = vtanh.f32 %v8293_v3 }
 0xadd   :  { %9826 = vst [vmem:[#allocation22_spill] sm:$0xff] %v8295_v17  ;;  %v2518_v16 = vpop.permute.xlu0 %2517  ;;  %6281 = vtanh.f32 %v8295_v17  ;;  %v2389_v33 = vmul.f32 %v8255_v57, %v2357_v18 }
 0xade   :  { %v8300_v44 = vadd.f32 %v2518_v16, %v2392_v58  ;;  %v2498_v62 = vpop.permute.xlu1 %2497  ;;  %v9830_v58 = vld [vmem:[#allocation25_spill] sm:$0xff] }
 0xadf   :  { %v8316_v59 = vadd.f32 %v2498_v62, %v2382_v40  ;;  %v2352_v16 = vrot.slane %v9830_v58, 7  ;;  %v9832_v40 = vld [vmem:[#allocation24_spill] sm:$0xff] }
 0xae0   :  { %9827 = vst [vmem:[#allocation26_spill] sm:$0xff] %v8300_v44  ;;  %6283 = vtanh.f32 %v8300_v44  ;;  %v2353_v62 = vrot.slane %v9832_v40, 7  ;;  %v9835_v58 = vld [vmem:[#allocation20_spill] sm:$0xff] }
 0xae1   :  { %v2492_v28 = vpop.permute.xlu0 %2491  ;;  %9828 = vst [vmem:[#allocation29_spill] sm:$0xff] %v8316_v59 }
 0xae2   :  { %v8309_v43 = vadd.f32 %v2492_v28, %v2379_v26  ;;  %v2508_v15 = vpop.permute.xlu1 %2507  ;;  %v9831_v26 = vld [vmem:[#allocation28_spill] sm:$0xff]  ;;  %v2385_v9 = vmul.f32 %v8266_v42, %v2353_v62 }
 0xae3   :  { %v8326_v14 = vadd.f32 %v2508_v15, %v2387_v38  ;;  %v2359_v52 = vrot.slane %v9831_v26, 7  ;;  %v9833_v15 = vld [vmem:[#allocation23_spill] sm:$0xff] }
 0xae4   :  { %6285 = vtanh.f32 %v8309_v43 }
 0xae5   :  { %v2496_v47 = vpop.permute.xlu0 %2495  ;;  %6287 = vtanh.f32 %v8316_v59  ;;  %v2391_v63 = vmul.f32 %v8263_v27, %v2359_v52 }
 0xae6   :  { %v6280_v13 = vpop.eup %6279  ;;  %v8319_v36 = vadd.f32 %v2496_v47, %v2381_v61  ;;  %v2512_v12 = vpop.permute.xlu1 %2511 }
 0xae7   :  { %2605 = vrot.lane.b32.xlu0 %v6280_v13, %s6994_s3  ;;  %v6282_v56 = vpop.eup %6281  ;;  %v8336_v28 = vadd.f32 %v2512_v12, %v2389_v33 }
 0xae8   :  { %2609 = vrot.lane.b32.xlu1 %v6282_v56, %s6994_s3  ;;  %6289 = vtanh.f32 %v8319_v36  ;;  %v2384_v56 = vmul.f32 %v8258_v2, %v2352_v16  ;;  %v2361_v16 = vrot.slane %v9835_v58, 7 }
 0xae9   :  { %v2500_v6 = vpop.permute.xlu0 %2499  ;;  %6291 = vtanh.f32 %v8326_v14 }
 0xaea   :  { %v6284_v48 = vpop.eup %6283  ;;  %v8329_v13 = vadd.f32 %v2500_v6, %v2383_v20  ;;  %v2516_v47 = vpop.permute.xlu1 %2515  ;;  %v2348_v20 = vrot.slane %v9833_v15, 7  ;;  %v2393_v26 = vmul.f32 %v8274_v4, %v2361_v16 }
 0xaeb   :  { %2613 = vrot.lane.b32.xlu0 %v6284_v48, %s6994_s3  ;;  %v8347_v5 = vadd.f32 %v2516_v47, %v2391_v63 }
 0xaec   :  { %6293 = vtanh.f32 %v8329_v13  ;;  %v2380_v12 = vmul.f32 %v8271_v55, %v2348_v20  ;;  %v9840_v20 = vld [vmem:[#allocation21_spill] sm:$0xff] }
 0xaed   :  { %v2502_v48 = vpop.permute.xlu0 %2501  ;;  %6295 = vtanh.f32 %v8336_v28  ;;  %9834 = vst [vmem:[#allocation27_spill] sm:$0xff] %v8347_v5 }
 0xaee   :  { %v6286_v19 = vpop.eup %6285  ;;  %v8339_v61 = vadd.f32 %v2502_v48, %v2384_v56  ;;  %v2494_v56 = vpop.permute.xlu1 %2493  ;;  %v9837_v48 = vld [vmem:[#allocation19_spill] sm:$0xff] }
 0xaef   :  { %2587 = vrot.lane.b32.xlu0 %v6286_v19, %s6994_s3  ;;  %v6288_v38 = vpop.eup %6287  ;;  %v2354_v19 = vrot.slane %v9837_v48, 7  ;;  %v8359_v40 = vadd.f32 %v2494_v56, %v2380_v12 }
 0xaf0   :  { %6297 = vtanh.f32 %v8339_v61  ;;  %2593 = vrot.lane.b32.xlu1 %v6288_v38, %s6994_s3 }
 0xaf1   :  { %v2504_v18 = vpop.permute.xlu0 %2503  ;;  %6299 = vtanh.f32 %v8347_v5  ;;  %9838 = vst [vmem:[#allocation28_spill] sm:$0xff] %v8359_v40 }
 0xaf2   :  { %v6290_v6 = vpop.eup %6289  ;;  %v8351_v33 = vadd.f32 %v2504_v18, %v2385_v9  ;;  %v2386_v9 = vmul.f32 %v8279_v31, %v2354_v19  ;;  %v2506_v38 = vpop.permute.xlu1 %2505  ;;  %v2362_v18 = vrot.slane %v9840_v20, 7 }
 0xaf3   :  { %2591 = vrot.lane.b32.xlu0 %v6290_v6, %s6994_s3  ;;  %v6292_v52 = vpop.eup %6291 }
 0xaf4   :  { %9836 = vst [vmem:[#allocation25_spill] sm:$0xff] %v8351_v33  ;;  %6301 = vtanh.f32 %v8351_v33  ;;  %2603 = vrot.lane.b32.xlu1 %v6292_v52, %s6994_s3  ;;  %v8369_v6 = vadd.f32 %v2506_v38, %v2386_v9  ;;  %v2394_v16 = vmul.f32 %v8284_v24, %v2362_v18 }
 0xaf5   :  { %v2520_v62 = vpop.permute.xlu0 %2519  ;;  %6303 = vtanh.f32 %v8359_v40 }
 0xaf6   :  { %v6294_v63 = vpop.eup %6293  ;;  %v8362_v47 = vadd.f32 %v2520_v62, %v2393_v26  ;;  %9841 = vst [vmem:[#allocation23_spill] sm:$0xff] %v8369_v6  ;;  %v2522_v12 = vpop.permute.xlu1 %2521 }
 0xaf7   :  { %2595 = vrot.lane.b32.xlu0 %v6294_v63, %s6994_s3  ;;  %v6296_v15 = vpop.eup %6295  ;;  %v8375_v26 = vadd.f32 %v2522_v12, %v2394_v16 }
 0xaf8   :  { %9839 = vst [vmem:[#allocation24_spill] sm:$0xff] %v8362_v47  ;;  %6305 = vtanh.f32 %v8362_v47  ;;  %2607 = vrot.lane.b32.xlu1 %v6296_v15, %s6994_s3 }
 0xaf9   :  { %6307 = vtanh.f32 %v8369_v6  ;;  %9842 = vst [vmem:[#allocation20_spill] sm:$0xff] %v8375_v26 }
 0xafa   :  { %v6298_v58 = vpop.eup %6297  ;;  %6309 = vtanh.f32 %v8375_v26 }
 0xafb   :  { %2597 = vrot.lane.b32.xlu0 %v6298_v58, %s6994_s3  ;;  %v6300_v56 = vpop.eup %6299 }
 0xafc   :  { %2611 = vrot.lane.b32.xlu1 %v6300_v56, %s6994_s3 }
 0xafe   :  { %v6302_v52 = vpop.eup %6301 }
 0xaff   :  { %2599 = vrot.lane.b32.xlu0 %v6302_v52, %s6994_s3  ;;  %v6304_v48 = vpop.eup %6303 }
 0xb00   :  { %2589 = vrot.lane.b32.xlu1 %v6304_v48, %s6994_s3 }
 0xb02   :  { %v6306_v19 = vpop.eup %6305 }
 0xb03   :  { %2615 = vrot.lane.b32.xlu0 %v6306_v19, %s6994_s3  ;;  %v6308_v62 = vpop.eup %6307 }
 0xb04   :  { %2601 = vrot.lane.b32.xlu1 %v6308_v62, %s6994_s3  ;;  %v6310_v63 = vpop.eup %6309 }
 0xb08   :  { %2617 = vrot.lane.b32.xlu1 %v6310_v63, %s6994_s3 }
 0xb59   :  { %v2606_v9 = vpop.permute.xlu0 %2605 }
 0xb5a   :  { %v2610_v15 = vpop.permute.xlu1 %2609  ;;  %v2644_v26 = vmul.f32 %v8218_v32, %v2606_v9 }
 0xb5b   :  { %v2646_v17 = vmul.f32 %v8221_v53, %v2610_v15 }
 0xb5c   :  { %v2682_v40 = vrot.slane %v2644_v26, 2 }
 0xb5d   :  { %v2614_v38 = vpop.permute.xlu0 %2613 }
 0xb61   :  { %v2588_v20 = vpop.permute.xlu0 %2587 }
 0xb62   :  { %v2594_v18 = vpop.permute.xlu1 %2593  ;;  %v2635_v6 = vmul.f32 %v8236_v37, %v2588_v20  ;;  %v2648_v37 = vmul.f32 %v8228_v49, %v2614_v38 }
 0xb65   :  { %v2592_v58 = vpop.permute.xlu0 %2591 }
 0xb66   :  { %v2604_v16 = vpop.permute.xlu1 %2603  ;;  %v2637_v44 = vmul.f32 %v8242_v51, %v2592_v58  ;;  %v2667_v51 = vrot.slane %v2635_v6, 3  ;;  %v2689_v6 = vrot.slane %v2648_v37, 6 }
 0xb67   :  { %v2643_v52 = vmul.f32 %v8247_v25, %v2604_v16 }
 0xb69   :  { %v2596_v12 = vpop.permute.xlu0 %2595  ;;  %v2681_v5 = vrot.slane %v2643_v52, 3 }
 0xb6a   :  { %v2608_v56 = vpop.permute.xlu1 %2607 }
 0xb6b   :  { %v2645_v19 = vmul.f32 %v8255_v57, %v2608_v56  ;;  %v2683_v25 = vsel %vm840_vm1, %v2682_v40, %v2681_v5  ;;  %v2639_v57 = vmul.f32 %v8250_v22, %v2596_v12  ;;  %v2638_v5 = vmul.f32 %v8239_v45, %v2594_v18 }
 0xb6c   :  { %v2670_v40 = vrot.slane %v2637_v44, 1 }
 0xb6d   :  { %v2598_v48 = vpop.permute.xlu0 %2597  ;;  %v2684_v63 = vrot.slane %v2645_v19, 1 }
 0xb6e   :  { %v2612_v62 = vpop.permute.xlu1 %2611  ;;  %v2640_v53 = vmul.f32 %v8258_v2, %v2598_v48 }
 0xb6f   :  { %v2647_v47 = vmul.f32 %v8263_v27, %v2612_v62  ;;  %v2685_v16 = vsel %vm843_vm2, %v2684_v63, %v2683_v25 }
 0xb70   :  { %v2675_v38 = vrot.slane %v2640_v53, 6 }
 0xb71   :  { %v2600_v59 = vpop.permute.xlu0 %2599  ;;  %v2687_v56 = vrot.slane %v2647_v47, 7 }
 0xb72   :  { %v2590_v33 = vpop.permute.xlu1 %2589  ;;  %v2641_v27 = vmul.f32 %v8266_v42, %v2600_v59 }
 0xb73   :  { %v2636_v32 = vmul.f32 %v8271_v55, %v2590_v33  ;;  %v2686_v55 = vsel %vm846_vm3, %v2646_v17, %v2685_v16  ;;  %v2673_v33 = vrot.slane %v2639_v57, 7 }
 0xb74   :  { %v2688_v42 = vsel %vm849_vm4, %v2687_v56, %v2686_v55  ;;  %v2677_v49 = vrot.slane %v2641_v27, 5 }
 0xb75   :  { %v2616_v9 = vpop.permute.xlu0 %2615  ;;  %v2668_v20 = vrot.slane %v2636_v32, 2 }
 0xb76   :  { %v2649_v26 = vmul.f32 %v8274_v4, %v2616_v9  ;;  %v2602_v22 = vpop.permute.xlu1 %2601 }
 0xb77   :  { %v2669_v15 = vsel %vm840_vm1, %v2668_v20, %v2667_v51  ;;  %v2642_v47 = vmul.f32 %v8279_v31, %v2602_v22  ;;  %v2690_v31 = vsel %vm852_vm5, %v2689_v6, %v2688_v42 }
 0xb78   :  { %v2671_v4 = vsel %vm843_vm2, %v2670_v40, %v2669_v15  ;;  %v2691_v59 = vrot.slane %v2649_v26, 5 }
 0xb79   :  { %v2672_v2 = vsel %vm846_vm3, %v2638_v5, %v2671_v4  ;;  %v2679_v18 = vrot.slane %v2642_v47, 4 }
 0xb7a   :  { %v2674_v45 = vsel %vm849_vm4, %v2673_v33, %v2672_v2  ;;  %v2618_v44 = vpop.permute.xlu1 %2617  ;;  %v2692_v52 = vsel %vm855_vm6, %v2691_v59, %v2690_v31 }
 0xb7b   :  { %v2676_v17 = vsel %vm852_vm5, %v2675_v38, %v2674_v45  ;;  %v2650_v58 = vmul.f32 %v8284_v24, %v2618_v44 }
 0xb7c   :  { %v2678_v12 = vsel %vm855_vm6, %v2677_v49, %v2676_v17 }
 0xb7d   :  { %v2693_v48 = vrot.slane %v2650_v58, 4  ;;  %v2680_v19 = vsel %vm858_vm7, %v2679_v18, %v2678_v12 }
 0xb7e   :  { %2695 = vrot.lane.b32.xlu0 %v2680_v19, %s6995_s23 }
 0xb7f   :  { %v2694_v62 = vsel %vm858_vm7, %v2693_v48, %v2692_v52 }
 0xb80   :  { %2697 = vrot.lane.b32.xlu1 %v2694_v62, %s6995_s23 }
 0xbf0   :  { %v2696_v63 = vpop.permute.xlu0 %2695 }
 0xbf1   :  { %5663 = vmatprep.mubr.msk.f32.mxu0 %vm312_vm8, %v2696_v63 }
 0xbf2   :  { %v2698_v25 = vpop.permute.xlu1 %2697 }
 0xbf3   :  { %5664 = vmatmul.mubr.msk.f32.vlgmr.msra.gmra.mrb[16].mxu0 %vm312_vm8, %v2698_v25 }
 0xbf4   :  { %5765 = vmatpush3.bf16.msra.mxu0 %v7129_v7 }
 0xbf5   :  { %5767 = vmatprep.subr.bf16.mxu0 %v7132_v10 }
 0xbf8   :  { %5769 = vmatpush3.bf16.msra.mxu0 %v7132_v10 }
 0xcc6   :  { %v8421_v24 = vpop.f32.mrb[16].mxu0 }
 0xcc7   :  { %v2769_v57 = vpop.f32.mrb[17].mxu0  ;;  %v2788_v32 = vrot.slane %v8421_v24, 5  ;;  %v2789_v9 = vrot.slane %v8421_v24, 6  ;;  %v2787_v53 = vrot.slane %v8421_v24, 4  ;;  %v2790_v55 = vrot.slane %v8421_v24, 7 }
 0xcc8   :  { %v2780_v27 = vrot.slane %v2769_v57, 4  ;;  %v2782_v37 = vrot.slane %v2769_v57, 6  ;;  %v2784_v40 = vrot.slane %v2769_v57, 1  ;;  %v8443_v22 = vadd.f32 %v2769_v57, %v7223_v60 }
 0xcc9   :  { %v8426_v16 = vadd.f32 %v2788_v32, %v7211_v54  ;;  %v8429_v56 = vadd.f32 %v2789_v9, %v7251_v11  ;;  %v8448_v33 = vadd.f32 %v2787_v53, %v7235_v1  ;;  %v2785_v15 = vrot.slane %v2769_v57, 2 }
 0xcca   :  { %v8435_v51 = vadd.f32 %v2780_v27, %v7169_v30  ;;  %v8439_v5 = vadd.f32 %v2782_v37, %v7188_v41  ;;  %v8452_v47 = vadd.f32 %v2784_v40, %v7185_v39  ;;  %v2791_v42 = vrot.slane %v8421_v24, 1 }
 0xccb   :  { %6311 = vtanh.f32 %v8426_v16  ;;  %v8457_v4 = vadd.f32 %v2790_v55, %v7232_v0  ;;  %v2786_v49 = vrot.slane %v2769_v57, 3  ;;  %v8461_v59 = vadd.f32 %v2785_v15, %v7196_v46 }
 0xccc   :  { %6313 = vtanh.f32 %v8429_v56  ;;  %v2792_v2 = vrot.slane %v8421_v24, 2  ;;  %v8466_v38 = vadd.f32 %v2791_v42, %v7244_v8  ;;  %v2781_v45 = vrot.slane %v2769_v57, 5 }
 0xccd   :  { %6315 = vtanh.f32 %v8435_v51  ;;  %v8471_v44 = vadd.f32 %v2786_v49, %v7266_v21  ;;  %v2783_v31 = vrot.slane %v2769_v57, 7  ;;  %v2793_v25 = vrot.slane %v8421_v24, 3 }
 0xcce   :  { %6317 = vtanh.f32 %v8439_v5  ;;  %v8475_v58 = vadd.f32 %v2792_v2, %v7287_v34  ;;  %v8481_v12 = vadd.f32 %v2781_v45, %v7176_v35  ;;  %v8496_v57 = vadd.f32 %v8421_v24, %v7274_v23 }
 0xccf   :  { %6319 = vtanh.f32 %v8443_v22  ;;  %v8488_v19 = vadd.f32 %v2783_v31, %v7203_v50  ;;  %v8502_v27 = vadd.f32 %v2793_v25, %v7281_v29  ;;  %v5445_v40 = vmul.f32 -1.442695, %v8426_v16 }
 0xcd0   :  { %6321 = vtanh.f32 %v8448_v33  ;;  %v5446_v55 = vmul.f32 -1.442695, %v8429_v56  ;;  %v5436_v42 = vmul.f32 -1.442695, %v8435_v51  ;;  %v5440_v2 = vmul.f32 -1.442695, %v8443_v22 }
 0xcd1   :  { %6323 = vtanh.f32 %v8452_v47  ;;  %v5438_v45 = vmul.f32 -1.442695, %v8439_v5  ;;  %v5441_v16 = vmul.f32 -1.442695, %v8452_v47  ;;  %v5447_v56 = vmul.f32 -1.442695, %v8457_v4 }
 0xcd2   :  { %6325 = vtanh.f32 %v8457_v4  ;;  %v5442_v51 = vmul.f32 -1.442695, %v8461_v59  ;;  %v5449_v5 = vmul.f32 -1.442695, %v8466_v38  ;;  %v5450_v4 = vmul.f32 -1.442695, %v8475_v58 }
 0xcd3   :  { %6327 = vtanh.f32 %v8461_v59  ;;  %v5437_v25 = vmul.f32 -1.442695, %v8481_v12 }
 0xcd4   :  { %6329 = vtanh.f32 %v8466_v38 }
 0xcd5   :  { %v6312_v26 = vpop.eup %6311  ;;  %6331 = vtanh.f32 %v8471_v44 }
 0xcd6   :  { %3036 = vrot.lane.b32.xlu0 %v6312_v26, %s6994_s3  ;;  %v6314_v20 = vpop.eup %6313  ;;  %6333 = vtanh.f32 %v8475_v58  ;;  %v5439_v58 = vmul.f32 -1.442695, %v8488_v19 }
 0xcd7   :  { %v6316_v6 = vpop.eup %6315  ;;  %6335 = vtanh.f32 %v8481_v12 }
 0xcd8   :  { %v6318_v17 = vpop.eup %6317  ;;  %6337 = vtanh.f32 %v8488_v19  ;;  %v5451_v19 = vmul.f32 -1.442695, %v8502_v27 }
 0xcd9   :  { %v6320_v18 = vpop.eup %6319  ;;  %6339 = vtanh.f32 %v8496_v57 }
 0xcda   :  { %3038 = vrot.lane.b32.xlu0 %v6314_v20, %s6994_s3  ;;  %3026 = vrot.lane.b32.xlu1 %v6320_v18, %s6994_s3  ;;  %v6322_v52 = vpop.eup %6321  ;;  %6341 = vtanh.f32 %v8502_v27  ;;  %v5444_v18 = vmul.f32 -1.442695, %v8448_v33  ;;  %v5443_v33 = vmul.f32 -1.442695, %v8471_v44 }
 0xcdb   :  { %v6324_v48 = vpop.eup %6323  ;;  %6343 = vpow2.f32 %v5445_v40  ;;  %v5448_v40 = vmul.f32 -1.442695, %v8496_v57 }
 0xcdc   :  { %v6326_v62 = vpop.eup %6325  ;;  %6345 = vpow2.f32 %v5446_v55 }
 0xcdd   :  { %v6328_v63 = vpop.eup %6327  ;;  %6347 = vpow2.f32 %v5436_v42 }
 0xcde   :  { %3018 = vrot.lane.b32.xlu0 %v6316_v6, %s6994_s3  ;;  %3034 = vrot.lane.b32.xlu1 %v6322_v52, %s6994_s3  ;;  %v6330_v32 = vpop.eup %6329 }
 0xcdf   :  { %v6332_v9 = vpop.eup %6331 }
 0xce0   :  { %v6334_v26 = vpop.eup %6333 }
 0xce1   :  { %v6336_v37 = vpop.eup %6335 }
 0xce2   :  { %3022 = vrot.lane.b32.xlu0 %v6318_v17, %s6994_s3  ;;  %3040 = vrot.lane.b32.xlu1 %v6326_v62, %s6994_s3  ;;  %v6338_v24 = vpop.eup %6337 }
 0xce3   :  { %v6340_v20 = vpop.eup %6339 }
 0xce4   :  { %v6342_v53 = vpop.eup %6341 }
 0xce5   :  { %v6344_v15 = vpop.eup %6343 }
 0xce6   :  { %3028 = vrot.lane.b32.xlu0 %v6324_v48, %s6994_s3  ;;  %3044 = vrot.lane.b32.xlu1 %v6330_v32, %s6994_s3  ;;  %v2883_v49 = vadd.f32 1.0, %v6344_v15  ;;  %v6346_v6 = vpop.eup %6345 }
 0xce7   :  { %v2884_v17 = vadd.f32 1.0, %v6346_v6  ;;  %v6348_v31 = vpop.eup %6347 }
 0xce8   :  { %6349 = vrcp.f32 %v2883_v49  ;;  %v2874_v62 = vadd.f32 1.0, %v6348_v31 }
 0xce9   :  { %6351 = vpow2.f32 %v5440_v2 }
 0xcea   :  { %3030 = vrot.lane.b32.xlu0 %v6328_v63, %s6994_s3  ;;  %3020 = vrot.lane.b32.xlu1 %v6336_v37, %s6994_s3  ;;  %6353 = vpow2.f32 %v5438_v45 }
 0xceb   :  { %6355 = vrcp.f32 %v2884_v17 }
 0xcec   :  { %6357 = vpow2.f32 %v5444_v18 }
 0xced   :  { %6359 = vpow2.f32 %v5441_v16 }
 0xcee   :  { %3032 = vrot.lane.b32.xlu0 %v6332_v9, %s6994_s3  ;;  %3024 = vrot.lane.b32.xlu1 %v6338_v24, %s6994_s3  ;;  %6361 = vpow2.f32 %v5447_v56 }
 0xcef   :  { %6363 = vpow2.f32 %v5442_v51 }
 0xcf0   :  { %6365 = vpow2.f32 %v5449_v5 }
 0xcf1   :  { %6367 = vpow2.f32 %v5443_v33 }
 0xcf2   :  { %3046 = vrot.lane.b32.xlu0 %v6334_v26, %s6994_s3  ;;  %3042 = vrot.lane.b32.xlu1 %v6340_v20, %s6994_s3  ;;  %v8520_v22 = vpop.eup %6349  ;;  %6369 = vrcp.f32 %v2874_v62 }
 0xcf3   :  { %v6352_v47 = vpop.eup %6351  ;;  %6371 = vpow2.f32 %v5450_v4 }
 0xcf4   :  { %v6354_v63 = vpop.eup %6353  ;;  %v2878_v38 = vadd.f32 1.0, %v6352_v47  ;;  %6373 = vpow2.f32 %v5437_v25 }
 0xcf5   :  { %v8527_v59 = vpop.eup %6355  ;;  %v2876_v26 = vadd.f32 1.0, %v6354_v63 }
 0xcf6   :  { %3048 = vrot.lane.b32.xlu1 %v6342_v53, %s6994_s3  ;;  %v6358_v44 = vpop.eup %6357  ;;  %6375 = vrcp.f32 %v2878_v38 }
 0xcf7   :  { %v6360_v37 = vpop.eup %6359  ;;  %v2882_v24 = vadd.f32 1.0, %v6358_v44  ;;  %6377 = vrcp.f32 %v2876_v26 }
 0xcf8   :  { %v6362_v20 = vpop.eup %6361  ;;  %v2879_v12 = vadd.f32 1.0, %v6360_v37  ;;  %6379 = vpow2.f32 %v5439_v58 }
 0xcf9   :  { %v6364_v53 = vpop.eup %6363  ;;  %6381 = vrcp.f32 %v2882_v24  ;;  %v2885_v55 = vadd.f32 1.0, %v6362_v20 }
 0xcfa   :  { %v6366_v15 = vpop.eup %6365  ;;  %6383 = vrcp.f32 %v2879_v12  ;;  %v2880_v42 = vadd.f32 1.0, %v6364_v53 }
 0xcfb   :  { %v6368_v49 = vpop.eup %6367  ;;  %6385 = vpow2.f32 %v5448_v40  ;;  %v2887_v18 = vadd.f32 1.0, %v6366_v15 }
 0xcfc   :  { %v8534_v6 = vpop.eup %6369  ;;  %6387 = vrcp.f32 %v2885_v55  ;;  %v2881_v57 = vadd.f32 1.0, %v6368_v49 }
 0xcfd   :  { %v6372_v45 = vpop.eup %6371  ;;  %6389 = vrcp.f32 %v2880_v42 }
 0xcfe   :  { %v6374_v16 = vpop.eup %6373  ;;  %6391 = vpow2.f32 %v5451_v19  ;;  %v2888_v47 = vadd.f32 1.0, %v6372_v45 }
 0xcff   :  { %6393 = vrcp.f32 %v2887_v18  ;;  %v2875_v33 = vadd.f32 1.0, %v6374_v16 }
 0xd00   :  { %v8538_v56 = vpop.eup %6375  ;;  %6395 = vrcp.f32 %v2881_v57 }
 0xd01   :  { %v8541_v51 = vpop.eup %6377  ;;  %6397 = vrcp.f32 %v2875_v33 }
 0xd02   :  { %6399 = vrcp.f32 %v2888_v47 }
 0xd48   :  { %v3037_v52 = vpop.permute.xlu0 %3036 }
 0xd49   :  { %v3075_v48 = vmul.f32 %v8520_v22, %v3037_v52 }
 0xd4b   :  { %3116 = vrot.lane.b32.xlu0 %v3075_v48, %s6995_s23  ;;  %v6380_v48 = vpop.eup %6379 }
 0xd4c   :  { %v3039_v32 = vpop.permute.xlu0 %3038  ;;  %v3027_v31 = vpop.permute.xlu1 %3026  ;;  %v2877_v44 = vadd.f32 1.0, %v6380_v48 }
 0xd4d   :  { %v3076_v9 = vmul.f32 %v8527_v59, %v3039_v32  ;;  %v3070_v27 = vmul.f32 %v8538_v56, %v3027_v31  ;;  %v8545_v62 = vpop.eup %6381 }
 0xd4e   :  { %v8549_v63 = vpop.eup %6383  ;;  %6401 = vrcp.f32 %v2877_v44 }
 0xd4f   :  { %3118 = vrot.lane.b32.xlu0 %v3076_v9, %s6995_s23  ;;  %3106 = vrot.lane.b32.xlu1 %v3070_v27, %s6995_s23  ;;  %v6386_v9 = vpop.eup %6385 }
 0xd50   :  { %v3019_v2 = vpop.permute.xlu0 %3018  ;;  %v3035_v4 = vpop.permute.xlu1 %3034  ;;  %v2886_v40 = vadd.f32 1.0, %v6386_v9  ;;  %v2963_v9 = vrot.slane %v8293_v3, 7 }
 0xd51   :  { %v3066_v17 = vmul.f32 %v8534_v6, %v3019_v2  ;;  %v3074_v32 = vmul.f32 %v8545_v62, %v3035_v4  ;;  %v8553_v26 = vpop.eup %6387 }
 0xd52   :  { %v8557_v37 = vpop.eup %6389  ;;  %6403 = vrcp.f32 %v2886_v40  ;;  %v2995_v44 = vmul.f32 %v8520_v22, %v2963_v9  ;;  %v9844_v9 = vld [vmem:[#allocation22_spill] sm:$0xff] }
 0xd53   :  { %3098 = vrot.lane.b32.xlu0 %v3066_v17, %s6995_s23  ;;  %3114 = vrot.lane.b32.xlu1 %v3074_v32, %s6995_s23  ;;  %v6392_v53 = vpop.eup %6391 }
 0xd54   :  { %v3023_v5 = vpop.permute.xlu0 %3022  ;;  %v3041_v58 = vpop.permute.xlu1 %3040  ;;  %v2889_v45 = vadd.f32 1.0, %v6392_v53 }
 0xd55   :  { %v3068_v52 = vmul.f32 %v8541_v51, %v3023_v5  ;;  %v3077_v20 = vmul.f32 %v8553_v26, %v3041_v58  ;;  %v8561_v55 = vpop.eup %6393 }
 0xd56   :  { %v8565_v15 = vpop.eup %6395  ;;  %6405 = vrcp.f32 %v2889_v45  ;;  %v2958_v45 = vrot.slane %v8329_v13, 7 }
 0xd57   :  { %3102 = vrot.lane.b32.xlu0 %v3068_v52, %s6995_s23  ;;  %3120 = vrot.lane.b32.xlu1 %v3077_v20, %s6995_s23  ;;  %v8569_v17 = vpop.eup %6397 }
 0xd58   :  { %v3029_v25 = vpop.permute.xlu0 %3028  ;;  %v3045_v42 = vpop.permute.xlu1 %3044 }
 0xd59   :  { %v3071_v38 = vmul.f32 %v8549_v63, %v3029_v25  ;;  %v3079_v19 = vmul.f32 %v8561_v55, %v3045_v42  ;;  %v8573_v18 = vpop.eup %6399 }
 0xd5a   :  { %v8579_v27 = vpop.eup %6401 }
 0xd5b   :  { %3108 = vrot.lane.b32.xlu0 %v3071_v38, %s6995_s23  ;;  %3124 = vrot.lane.b32.xlu1 %v3079_v19, %s6995_s23 }
 0xd5c   :  { %v3031_v24 = vpop.permute.xlu0 %3030  ;;  %v3021_v16 = vpop.permute.xlu1 %3020 }
 0xd5d   :  { %v3072_v12 = vmul.f32 %v8557_v37, %v3031_v24  ;;  %v3067_v31 = vmul.f32 %v8569_v17, %v3021_v16  ;;  %v8583_v48 = vpop.eup %6403  ;;  %v2964_v24 = vrot.slane %v8336_v28, 7 }
 0xd5f   :  { %3110 = vrot.lane.b32.xlu0 %v3072_v12, %s6995_s23  ;;  %3100 = vrot.lane.b32.xlu1 %v3067_v31, %s6995_s23  ;;  %v2996_v12 = vmul.f32 %v8527_v59, %v2964_v24 }
 0xd60   :  { %v3033_v49 = vpop.permute.xlu0 %3032  ;;  %v3025_v52 = vpop.permute.xlu1 %3024 }
 0xd61   :  { %v3073_v2 = vmul.f32 %v8565_v15, %v3033_v49  ;;  %v3069_v33 = vmul.f32 %v8579_v27, %v3025_v52  ;;  %v8587_v25 = vpop.eup %6405  ;;  %v2954_v49 = vrot.slane %v8309_v43, 7  ;;  %v2962_v52 = vrot.slane %v8326_v14, 7 }
 0xd63   :  { %3112 = vrot.lane.b32.xlu0 %v3073_v2, %s6995_s23  ;;  %3104 = vrot.lane.b32.xlu1 %v3069_v33, %s6995_s23  ;;  %v2986_v3 = vmul.f32 %v8534_v6, %v2954_v49  ;;  %v2956_v2 = vrot.slane %v8319_v36, 7  ;;  %v2959_v33 = vrot.slane %v8339_v61, 7  ;;  %v2994_v13 = vmul.f32 %v8545_v62, %v2962_v52 }
 0xd64   :  { %v3047_v57 = vpop.permute.xlu0 %3046  ;;  %v3043_v47 = vpop.permute.xlu1 %3042 }
 0xd65   :  { %v3080_v5 = vmul.f32 %v8573_v18, %v3047_v57  ;;  %v3078_v4 = vmul.f32 %v8583_v48, %v3043_v47  ;;  %v2990_v57 = vmul.f32 %v8538_v56, %v2958_v45  ;;  %v2988_v43 = vmul.f32 %v8541_v51, %v2956_v2  ;;  %v9849_v2 = vld [vmem:[#allocation23_spill] sm:$0xff] }
 0xd66   :  { %v2961_v45 = vrot.slane %v9849_v2, 7 }
 0xd67   :  { %3126 = vrot.lane.b32.xlu0 %v3080_v5, %s6995_s23  ;;  %3122 = vrot.lane.b32.xlu1 %v3078_v4, %s6995_s23  ;;  %v2991_v4 = vmul.f32 %v8549_v63, %v2959_v33 }
 0xd68   :  { %v3049_v32 = vpop.permute.xlu1 %3048 }
 0xd69   :  { %v3081_v38 = vmul.f32 %v8587_v25, %v3049_v32 }
 0xd6b   :  { %3128 = vrot.lane.b32.xlu1 %v3081_v38, %s6995_s23 }
 0xdbd   :  { %v3117_v58 = vpop.permute.xlu0 %3116 }
 0xdbe   :  { %v8594_v20 = vadd.f32 %v3117_v58, %v2995_v44  ;;  %v2965_v44 = vrot.slane %v9844_v9, 7  ;;  %v9845_v58 = vld [vmem:[#allocation25_spill] sm:$0xff] }
 0xdbf   :  { %v2960_v14 = vrot.slane %v9845_v58, 7 }
 0xdc0   :  { %6407 = vtanh.f32 %v8594_v20 }
 0xdc1   :  { %v3119_v53 = vpop.permute.xlu0 %3118  ;;  %v3107_v31 = vpop.permute.xlu1 %3106 }
 0xdc2   :  { %v8598_v40 = vadd.f32 %v3119_v53, %v2996_v12  ;;  %v8614_v47 = vadd.f32 %v3107_v31, %v2990_v57  ;;  %v2997_v12 = vmul.f32 %v8553_v26, %v2965_v44  ;;  %v2992_v53 = vmul.f32 %v8557_v37, %v2960_v14 }
 0xdc4   :  { %6409 = vtanh.f32 %v8598_v40  ;;  %9843 = vst [vmem:[#allocation19_spill] sm:$0xff] %v8614_v47 }
 0xdc5   :  { %v3099_v19 = vpop.permute.xlu0 %3098  ;;  %v3115_v32 = vpop.permute.xlu1 %3114 }
 0xdc6   :  { %v8606_v16 = vadd.f32 %v3099_v19, %v2986_v3  ;;  %v8624_v24 = vadd.f32 %v3115_v32, %v2994_v13  ;;  %v9848_v19 = vld [vmem:[#allocation26_spill] sm:$0xff] }
 0xdc8   :  { %6411 = vtanh.f32 %v8606_v16  ;;  %9846 = vst [vmem:[#allocation21_spill] sm:$0xff] %v8624_v24 }
 0xdc9   :  { %v3103_v5 = vpop.permute.xlu0 %3102  ;;  %6413 = vtanh.f32 %v8614_v47 }
 0xdca   :  { %v6408_v42 = vpop.eup %6407  ;;  %v8616_v36 = vadd.f32 %v3103_v5, %v2988_v43  ;;  %v2993_v5 = vmul.f32 %v8565_v15, %v2961_v45 }
 0xdcb   :  { %3212 = vrot.lane.b32.xlu0 %v6408_v42, %s6994_s3  ;;  %v3121_v42 = vpop.permute.xlu1 %3120 }
 0xdcc   :  { %6415 = vtanh.f32 %v8616_v36  ;;  %v8634_v57 = vadd.f32 %v3121_v42, %v2997_v12 }
 0xdcd   :  { %v3109_v38 = vpop.permute.xlu0 %3108  ;;  %6417 = vtanh.f32 %v8624_v24 }
 0xdce   :  { %v6410_v28 = vpop.eup %6409  ;;  %v8626_v61 = vadd.f32 %v3109_v38, %v2991_v4  ;;  %v9851_v4 = vld [vmem:[#allocation28_spill] sm:$0xff] }
 0xdcf   :  { %3214 = vrot.lane.b32.xlu0 %v6410_v28, %s6994_s3  ;;  %v2967_v28 = vrot.slane %v9848_v19, 7  ;;  %v3125_v52 = vpop.permute.xlu1 %3124  ;;  %v2955_v32 = vrot.slane %v9851_v4, 7  ;;  %v9852_v38 = vld [vmem:[#allocation24_spill] sm:$0xff]  ;;  %v9855_v19 = vld [vmem:[#allocation29_spill] sm:$0xff] }
 0xdd0   :  { %9847 = vst [vmem:[#allocation22_spill] sm:$0xff] %v8626_v61  ;;  %6419 = vtanh.f32 %v8626_v61  ;;  %v2968_v9 = vrot.slane %v9852_v38, 7 }
 0xdd1   :  { %v3111_v49 = vpop.permute.xlu0 %3110  ;;  %6421 = vtanh.f32 %v8634_v57  ;;  %v2999_v31 = vmul.f32 %v8561_v55, %v2967_v28  ;;  %v2987_v12 = vmul.f32 %v8569_v17, %v2955_v32  ;;  %v2957_v28 = vrot.slane %v9855_v19, 7 }
 0xdd2   :  { %v6412_v3 = vpop.eup %6411  ;;  %v8636_v43 = vadd.f32 %v3111_v49, %v2992_v53  ;;  %v3000_v53 = vmul.f32 %v8573_v18, %v2968_v9 }
 0xdd3   :  { %3194 = vrot.lane.b32.xlu0 %v6412_v3, %s6994_s3  ;;  %v6414_v13 = vpop.eup %6413  ;;  %v8645_v44 = vadd.f32 %v3125_v52, %v2999_v31  ;;  %v3101_v42 = vpop.permute.xlu1 %3100 }
 0xdd4   :  { %9850 = vst [vmem:[#allocation25_spill] sm:$0xff] %v8636_v43  ;;  %6423 = vtanh.f32 %v8636_v43  ;;  %3202 = vrot.lane.b32.xlu1 %v6414_v13, %s6994_s3  ;;  %v8656_v2 = vadd.f32 %v3101_v42, %v2987_v12  ;;  %v9858_v13 = vld [vmem:[#allocation27_spill] sm:$0xff] }
 0xdd5   :  { %v3113_v33 = vpop.permute.xlu0 %3112  ;;  %9853 = vst [vmem:[#allocation26_spill] sm:$0xff] %v8645_v44  ;;  %6425 = vtanh.f32 %v8645_v44  ;;  %v2966_v4 = vrot.slane %v9858_v13, 7 }
 0xdd6   :  { %v8647_v58 = vadd.f32 %v3113_v33, %v2993_v5  ;;  %v6416_v14 = vpop.eup %6415  ;;  %9856 = vst [vmem:[#allocation28_spill] sm:$0xff] %v8656_v2  ;;  %v2989_v5 = vmul.f32 %v8579_v27, %v2957_v28 }
 0xdd7   :  { %3198 = vrot.lane.b32.xlu0 %v6416_v14, %s6994_s3  ;;  %v6418_v3 = vpop.eup %6417  ;;  %v3105_v52 = vpop.permute.xlu1 %3104  ;;  %v2998_v9 = vmul.f32 %v8583_v48, %v2966_v4 }
 0xdd8   :  { %9854 = vst [vmem:[#allocation23_spill] sm:$0xff] %v8647_v58  ;;  %6427 = vtanh.f32 %v8647_v58  ;;  %3210 = vrot.lane.b32.xlu1 %v6418_v3, %s6994_s3  ;;  %v8666_v32 = vadd.f32 %v3105_v52, %v2989_v5 }
 0xdd9   :  { %v3127_v49 = vpop.permute.xlu0 %3126  ;;  %6429 = vtanh.f32 %v8656_v2 }
 0xdda   :  { %v8658_v45 = vadd.f32 %v3127_v49, %v3000_v53  ;;  %v6420_v31 = vpop.eup %6419  ;;  %9859 = vst [vmem:[#allocation29_spill] sm:$0xff] %v8666_v32  ;;  %v9860_v53 = vld [vmem:[#allocation20_spill] sm:$0xff] }
 0xddb   :  { %3204 = vrot.lane.b32.xlu0 %v6420_v31, %s6994_s3  ;;  %v6422_v33 = vpop.eup %6421  ;;  %v3123_v14 = vpop.permute.xlu1 %3122  ;;  %v2969_v42 = vrot.slane %v9860_v53, 7 }
 0xddc   :  { %9857 = vst [vmem:[#allocation24_spill] sm:$0xff] %v8658_v45  ;;  %6431 = vtanh.f32 %v8658_v45  ;;  %3216 = vrot.lane.b32.xlu1 %v6422_v33, %s6994_s3  ;;  %v8673_v49 = vadd.f32 %v3123_v14, %v2998_v9 }
 0xddd   :  { %6433 = vtanh.f32 %v8666_v32  ;;  %v3001_v19 = vmul.f32 %v8587_v25, %v2969_v42 }
 0xdde   :  { %v6424_v38 = vpop.eup %6423  ;;  %9861 = vst [vmem:[#allocation27_spill] sm:$0xff] %v8673_v49  ;;  %6435 = vtanh.f32 %v8673_v49 }
 0xddf   :  { %3206 = vrot.lane.b32.xlu0 %v6424_v38, %s6994_s3  ;;  %v6426_v12 = vpop.eup %6425  ;;  %v3129_v28 = vpop.permute.xlu1 %3128 }
 0xde0   :  { %3220 = vrot.lane.b32.xlu1 %v6426_v12, %s6994_s3  ;;  %v8679_v5 = vadd.f32 %v3129_v28, %v3001_v19 }
 0xde2   :  { %v6428_v3 = vpop.eup %6427  ;;  %9862 = vst [vmem:[#allocation20_spill] sm:$0xff] %v8679_v5  ;;  %6437 = vtanh.f32 %v8679_v5 }
 0xde3   :  { %3208 = vrot.lane.b32.xlu0 %v6428_v3, %s6994_s3  ;;  %v6430_v31 = vpop.eup %6429 }
 0xde4   :  { %3196 = vrot.lane.b32.xlu1 %v6430_v31, %s6994_s3 }
 0xde6   :  { %v6432_v52 = vpop.eup %6431 }
 0xde7   :  { %3222 = vrot.lane.b32.xlu0 %v6432_v52, %s6994_s3  ;;  %v6434_v33 = vpop.eup %6433 }
 0xde8   :  { %3200 = vrot.lane.b32.xlu1 %v6434_v33, %s6994_s3  ;;  %v6436_v13 = vpop.eup %6435 }
 0xdec   :  { %3218 = vrot.lane.b32.xlu1 %v6436_v13, %s6994_s3  ;;  %v6438_v4 = vpop.eup %6437 }
 0xdf0   :  { %3224 = vrot.lane.b32.xlu1 %v6438_v4, %s6994_s3 }
 0xe3d   :  { %v3213_v38 = vpop.permute.xlu0 %3212 }
 0xe3e   :  { %v3251_v13 = vmul.f32 %v8520_v22, %v3213_v38 }
 0xe40   :  { %v3289_v43 = vrot.slane %v3251_v13, 3 }
 0xe41   :  { %v3215_v9 = vpop.permute.xlu0 %3214 }
 0xe42   :  { %v3252_v47 = vmul.f32 %v8527_v59, %v3215_v9 }
 0xe44   :  { %v3291_v61 = vrot.slane %v3252_v47, 2 }
 0xe45   :  { %v3195_v14 = vpop.permute.xlu0 %3194 }
 0xe46   :  { %v3203_v12 = vpop.permute.xlu1 %3202  ;;  %v3242_v33 = vmul.f32 %v8534_v6, %v3195_v14 }
 0xe48   :  { %v3274_v49 = vrot.slane %v3242_v33, 4 }
 0xe49   :  { %v3199_v53 = vpop.permute.xlu0 %3198 }
 0xe4a   :  { %v3211_v42 = vpop.permute.xlu1 %3210  ;;  %v3244_v32 = vmul.f32 %v8541_v51, %v3199_v53 }
 0xe4b   :  { %v3250_v5 = vmul.f32 %v8545_v62, %v3211_v42 }
 0xe4c   :  { %v3277_v14 = vrot.slane %v3244_v32, 2 }
 0xe4d   :  { %v3205_v3 = vpop.permute.xlu0 %3204  ;;  %v3288_v45 = vrot.slane %v3250_v5, 4 }
 0xe4e   :  { %v3217_v19 = vpop.permute.xlu1 %3216  ;;  %v3247_v62 = vmul.f32 %v8549_v63, %v3205_v3  ;;  %v3246_v63 = vmul.f32 %v8538_v56, %v3203_v12 }
 0xe4f   :  { %v3253_v44 = vmul.f32 %v8553_v26, %v3217_v19 }
 0xe50   :  { %v3282_v9 = vrot.slane %v3247_v62, 7 }
 0xe51   :  { %v3207_v28 = vpop.permute.xlu0 %3206  ;;  %v3293_v5 = vrot.slane %v3253_v44, 1 }
 0xe52   :  { %v3221_v31 = vpop.permute.xlu1 %3220  ;;  %v3248_v26 = vmul.f32 %v8557_v37, %v3207_v28 }
 0xe53   :  { %v3255_v38 = vmul.f32 %v8561_v55, %v3221_v31 }
 0xe55   :  { %v3209_v52 = vpop.permute.xlu0 %3208 }
 0xe56   :  { %v3197_v4 = vpop.permute.xlu1 %3196  ;;  %v3249_v51 = vmul.f32 %v8565_v15, %v3209_v52 }
 0xe57   :  { %v3243_v2 = vmul.f32 %v8569_v17, %v3197_v4  ;;  %v3290_v17 = vsel %vm840_vm1, %v3289_v43, %v3288_v45  ;;  %v3296_v45 = vrot.slane %v3255_v38, 7 }
 0xe58   :  { %v3286_v44 = vrot.slane %v3249_v51, 5 }
 0xe59   :  { %v3275_v58 = vrot.slane %v3243_v2, 3  ;;  %v3223_v24 = vpop.permute.xlu0 %3222 }
 0xe5a   :  { %v3201_v6 = vpop.permute.xlu1 %3200  ;;  %v3256_v2 = vmul.f32 %v8573_v18, %v3223_v24  ;;  %v3284_v24 = vrot.slane %v3248_v26, 6 }
 0xe5b   :  { %v3276_v22 = vsel %vm840_vm1, %v3275_v58, %v3274_v49  ;;  %v3245_v59 = vmul.f32 %v8579_v27, %v3201_v6  ;;  %v3292_v27 = vsel %vm843_vm2, %v3291_v61, %v3290_v17 }
 0xe5c   :  { %v3278_v32 = vsel %vm843_vm2, %v3277_v14, %v3276_v22  ;;  %v3294_v37 = vsel %vm846_vm3, %v3293_v5, %v3292_v27  ;;  %v3298_v55 = vrot.slane %v3256_v2, 6 }
 0xe5d   :  { %v3279_v47 = vrot.slane %v3245_v59, 1 }
 0xe5e   :  { %v3219_v58 = vpop.permute.xlu1 %3218 }
 0xe5f   :  { %v3280_v15 = vsel %vm846_vm3, %v3279_v47, %v3278_v32  ;;  %v3254_v43 = vmul.f32 %v8583_v48, %v3219_v58 }
 0xe60   :  { %v3281_v18 = vsel %vm849_vm4, %v3246_v63, %v3280_v15 }
 0xe61   :  { %v3295_v56 = vsel %vm849_vm4, %v3254_v43, %v3294_v37  ;;  %v3283_v49 = vsel %vm852_vm5, %v3282_v9, %v3281_v18 }
 0xe62   :  { %v3225_v12 = vpop.permute.xlu1 %3224  ;;  %v3285_v53 = vsel %vm855_vm6, %v3284_v24, %v3283_v49  ;;  %v3297_v48 = vsel %vm852_vm5, %v3296_v45, %v3295_v56 }
 0xe63   :  { %v3257_v61 = vmul.f32 %v8587_v25, %v3225_v12  ;;  %v3287_v42 = vsel %vm858_vm7, %v3286_v44, %v3285_v53  ;;  %v3299_v3 = vsel %vm855_vm6, %v3298_v55, %v3297_v48 }
 0xe64   :  { %3302 = vrot.lane.b32.xlu0 %v3287_v42, %s6995_s23 }
 0xe65   :  { %v3300_v19 = vrot.slane %v3257_v61, 5 }
 0xe67   :  { %v3301_v28 = vsel %vm858_vm7, %v3300_v19, %v3299_v3 }
 0xe68   :  { %3304 = vrot.lane.b32.xlu1 %v3301_v28, %s6995_s23 }
 0xed6   :  { %v3303_v31 = vpop.permute.xlu0 %3302 }
 0xed7   :  { %5674 = vmatprep.mubr.msk.f32.mxu1 %vm312_vm8, %v3303_v31 }
 0xeda   :  { %v3305_v52 = vpop.permute.xlu1 %3304 }
 0xedb   :  { %5675 = vmatmul.mubr.msk.f32.vlgmr.msra.gmra.mrb[8].mxu1 %vm312_vm8, %v3305_v52 }
 0xedc   :  { %5773 = vmatpush3.bf16.msra.mxu1 %v7129_v7 }
 0xedd   :  { %5775 = vmatprep.subr.bf16.mxu1 %v7132_v10 }
 0xee0   :  { %5777 = vmatpush3.bf16.msra.mxu1 %v7132_v10 }
 0xfae   :  { %v8724_v25 = vpop.f32.mrb[8].mxu1 }
 0xfaf   :  { %v8726_v33 = vpop.f32.mrb[9].mxu1  ;;  %v3395_v13 = vrot.slane %v8724_v25, 4  ;;  %v3396_v4 = vrot.slane %v8724_v25, 5  ;;  %v3397_v6 = vrot.slane %v8724_v25, 6  ;;  %v3394_v2 = vrot.slane %v8724_v25, 3 }
 0xfb0   :  { %v3387_v10 = vrot.slane %v8726_v33, 3  ;;  %v3389_v59 = vrot.slane %v8726_v33, 5  ;;  %v3392_v5 = vrot.slane %v8726_v33, 1  ;;  %v8758_v38 = vadd.f32 %v8726_v33, %v7185_v39 }
 0xfb1   :  { %v8731_v62 = vadd.f32 %v3395_v13, %v7211_v54  ;;  %v8735_v14 = vadd.f32 %v3396_v4, %v7251_v11  ;;  %v8739_v7 = vadd.f32 %v3397_v6, %v7232_v0  ;;  %v3393_v63 = vrot.slane %v8726_v33, 2 }
 0xfb2   :  { %v8747_v51 = vadd.f32 %v3387_v10, %v7169_v30  ;;  %v8752_v26 = vadd.f32 %v3389_v59, %v7188_v41  ;;  %v8763_v9 = vadd.f32 %v3392_v5, %v7196_v46  ;;  %v3398_v32 = vrot.slane %v8724_v25, 7 }
 0xfb3   :  { %6439 = vtanh.f32 %v8731_v62  ;;  %v8768_v58 = vadd.f32 %v3394_v2, %v7235_v1  ;;  %v8772_v27 = vadd.f32 %v3393_v63, %v7266_v21  ;;  %v3399_v15 = vrot.slane %v8724_v25, 1 }
 0xfb4   :  { %6441 = vtanh.f32 %v8735_v14  ;;  %v8777_v43 = vadd.f32 %v3398_v32, %v7274_v23  ;;  %v8783_v37 = vadd.f32 %v8724_v25, %v7244_v8  ;;  %v3388_v24 = vrot.slane %v8726_v33, 4 }
 0xfb5   :  { %6443 = vtanh.f32 %v8739_v7  ;;  %v8787_v18 = vadd.f32 %v3399_v15, %v7287_v34  ;;  %v3390_v56 = vrot.slane %v8726_v33, 6  ;;  %v3391_v61 = vrot.slane %v8726_v33, 7 }
 0xfb6   :  { %6445 = vtanh.f32 %v8747_v51  ;;  %v8797_v49 = vadd.f32 %v3388_v24, %v7176_v35  ;;  %v3400_v19 = vrot.slane %v8724_v25, 2  ;;  %v5463_v10 = vmul.f32 -1.442695, %v8731_v62 }
 0xfb7   :  { %6447 = vtanh.f32 %v8752_v26  ;;  %v8803_v42 = vadd.f32 %v3390_v56, %v7203_v50  ;;  %v8810_v28 = vadd.f32 %v3391_v61, %v7223_v60  ;;  %v5465_v59 = vmul.f32 -1.442695, %v8739_v7 }
 0xfb8   :  { %6449 = vtanh.f32 %v8758_v38  ;;  %v8816_v33 = vadd.f32 %v3400_v19, %v7281_v29  ;;  %v5454_v5 = vmul.f32 -1.442695, %v8747_v51  ;;  %v5456_v63 = vmul.f32 -1.442695, %v8752_v26 }
 0xfb9   :  { %6451 = vtanh.f32 %v8763_v9  ;;  %v5459_v32 = vmul.f32 -1.442695, %v8758_v38  ;;  %v5461_v51 = vmul.f32 -1.442695, %v8772_v27  ;;  %v5466_v26 = vmul.f32 -1.442695, %v8777_v43 }
 0xfba   :  { %6453 = vtanh.f32 %v8768_v58  ;;  %v5455_v61 = vmul.f32 -1.442695, %v8797_v49 }
 0xfbb   :  { %6455 = vtanh.f32 %v8772_v27 }
 0xfbc   :  { %6457 = vtanh.f32 %v8777_v43 }
 0xfbd   :  { %v6440_v22 = vpop.eup %6439  ;;  %6459 = vtanh.f32 %v8783_v37 }
 0xfbe   :  { %3643 = vrot.lane.b32.xlu0 %v6440_v22, %s6994_s3  ;;  %v6442_v17 = vpop.eup %6441  ;;  %6461 = vtanh.f32 %v8787_v18  ;;  %v5464_v22 = vmul.f32 -1.442695, %v8735_v14  ;;  %v5460_v14 = vmul.f32 -1.442695, %v8763_v9 }
 0xfbf   :  { %v6444_v47 = vpop.eup %6443  ;;  %6463 = vtanh.f32 %v8797_v49 }
 0xfc0   :  { %v6446_v44 = vpop.eup %6445  ;;  %6465 = vtanh.f32 %v8803_v42 }
 0xfc1   :  { %v6448_v55 = vpop.eup %6447  ;;  %6467 = vtanh.f32 %v8810_v28 }
 0xfc2   :  { %3645 = vrot.lane.b32.xlu0 %v6442_v17, %s6994_s3  ;;  %v6450_v45 = vpop.eup %6449  ;;  %6469 = vtanh.f32 %v8816_v33 }
 0xfc3   :  { %3635 = vrot.lane.b32.xlu1 %v6450_v45, %s6994_s3  ;;  %v6452_v12 = vpop.eup %6451  ;;  %6471 = vpow2.f32 %v5463_v10 }
 0xfc4   :  { %v6454_v53 = vpop.eup %6453  ;;  %6473 = vpow2.f32 %v5464_v22  ;;  %v5458_v22 = vmul.f32 -1.442695, %v8810_v28 }
 0xfc5   :  { %v6456_v48 = vpop.eup %6455  ;;  %6475 = vpow2.f32 %v5465_v59 }
 0xfc6   :  { %3647 = vrot.lane.b32.xlu0 %v6444_v47, %s6994_s3  ;;  %v6458_v3 = vpop.eup %6457  ;;  %6477 = vpow2.f32 %v5454_v5 }
 0xfc7   :  { %3641 = vrot.lane.b32.xlu1 %v6454_v53, %s6994_s3  ;;  %v6460_v31 = vpop.eup %6459 }
 0xfc8   :  { %v6462_v52 = vpop.eup %6461 }
 0xfc9   :  { %v6464_v13 = vpop.eup %6463 }
 0xfca   :  { %3625 = vrot.lane.b32.xlu0 %v6446_v44, %s6994_s3  ;;  %v6466_v25 = vpop.eup %6465  ;;  %v5462_v44 = vmul.f32 -1.442695, %v8768_v58  ;;  %v5468_v58 = vmul.f32 -1.442695, %v8787_v18 }
 0xfcb   :  { %3649 = vrot.lane.b32.xlu1 %v6458_v3, %s6994_s3  ;;  %v6468_v4 = vpop.eup %6467 }
 0xfcc   :  { %v6470_v6 = vpop.eup %6469 }
 0xfcd   :  { %v6472_v17 = vpop.eup %6471 }
 0xfce   :  { %3629 = vrot.lane.b32.xlu0 %v6448_v55, %s6994_s3  ;;  %v3490_v2 = vadd.f32 1.0, %v6472_v17  ;;  %v6474_v47 = vpop.eup %6473  ;;  %v5467_v55 = vmul.f32 -1.442695, %v8783_v37 }
 0xfcf   :  { %3653 = vrot.lane.b32.xlu1 %v6462_v52, %s6994_s3  ;;  %v3491_v15 = vadd.f32 1.0, %v6474_v47  ;;  %v6476_v62 = vpop.eup %6475 }
 0xfd0   :  { %6479 = vrcp.f32 %v3490_v2  ;;  %v3492_v7 = vadd.f32 1.0, %v6476_v62  ;;  %v6478_v24 = vpop.eup %6477 }
 0xfd1   :  { %6481 = vpow2.f32 %v5456_v63  ;;  %v5469_v63 = vmul.f32 -1.442695, %v8816_v33 }
 0xfd2   :  { %3637 = vrot.lane.b32.xlu0 %v6452_v12, %s6994_s3  ;;  %6483 = vpow2.f32 %v5459_v32  ;;  %v3481_v12 = vadd.f32 1.0, %v6478_v24 }
 0xfd3   :  { %3627 = vrot.lane.b32.xlu1 %v6464_v13, %s6994_s3  ;;  %6485 = vrcp.f32 %v3491_v15  ;;  %v5457_v13 = vmul.f32 -1.442695, %v8803_v42 }
 0xfd4   :  { %6487 = vpow2.f32 %v5462_v44 }
 0xfd5   :  { %6489 = vpow2.f32 %v5460_v14 }
 0xfd6   :  { %3639 = vrot.lane.b32.xlu0 %v6456_v48, %s6994_s3  ;;  %6491 = vrcp.f32 %v3492_v7 }
 0xfd7   :  { %3631 = vrot.lane.b32.xlu1 %v6466_v25, %s6994_s3  ;;  %6493 = vpow2.f32 %v5461_v51 }
 0xfd8   :  { %6495 = vpow2.f32 %v5466_v26 }
 0xfd9   :  { %6497 = vpow2.f32 %v5467_v55 }
 0xfda   :  { %3651 = vrot.lane.b32.xlu0 %v6460_v31, %s6994_s3  ;;  %v8834_v38 = vpop.eup %6479  ;;  %6499 = vpow2.f32 %v5468_v58 }
 0xfdb   :  { %3633 = vrot.lane.b32.xlu1 %v6468_v4, %s6994_s3  ;;  %v6482_v56 = vpop.eup %6481  ;;  %6501 = vrcp.f32 %v3481_v12 }
 0xfdc   :  { %v6484_v53 = vpop.eup %6483  ;;  %v3483_v18 = vadd.f32 1.0, %v6482_v56  ;;  %6503 = vpow2.f32 %v5455_v61 }
 0xfdd   :  { %v8840_v27 = vpop.eup %6485  ;;  %v3486_v19 = vadd.f32 1.0, %v6484_v53 }
 0xfde   :  { %v6488_v48 = vpop.eup %6487  ;;  %6505 = vrcp.f32 %v3483_v18 }
 0xfdf   :  { %3655 = vrot.lane.b32.xlu1 %v6470_v6, %s6994_s3  ;;  %v6490_v3 = vpop.eup %6489  ;;  %6507 = vrcp.f32 %v3486_v19  ;;  %v3489_v6 = vadd.f32 1.0, %v6488_v48 }
 0xfe0   :  { %v8845_v31 = vpop.eup %6491  ;;  %v3487_v4 = vadd.f32 1.0, %v6490_v3  ;;  %6509 = vpow2.f32 %v5457_v13 }
 0xfe1   :  { %v6494_v49 = vpop.eup %6493 }
 0xfe2   :  { %v6496_v10 = vpop.eup %6495  ;;  %6511 = vrcp.f32 %v3487_v4  ;;  %v3488_v17 = vadd.f32 1.0, %v6494_v49 }
 0xfe3   :  { %v6498_v59 = vpop.eup %6497  ;;  %6513 = vrcp.f32 %v3489_v6  ;;  %v3493_v2 = vadd.f32 1.0, %v6496_v10 }
 0xfe4   :  { %v6500_v5 = vpop.eup %6499  ;;  %6515 = vpow2.f32 %v5458_v22  ;;  %v3494_v15 = vadd.f32 1.0, %v6498_v59 }
 0xfe5   :  { %v8851_v42 = vpop.eup %6501  ;;  %6517 = vrcp.f32 %v3488_v17  ;;  %v3495_v44 = vadd.f32 1.0, %v6500_v5 }
 0xfe6   :  { %v6504_v62 = vpop.eup %6503  ;;  %6519 = vrcp.f32 %v3493_v2 }
 0xfe7   :  { %6521 = vpow2.f32 %v5469_v63  ;;  %v3482_v55 = vadd.f32 1.0, %v6504_v62 }
 0xfe8   :  { %v8856_v28 = vpop.eup %6505  ;;  %6523 = vrcp.f32 %v3494_v15 }
 0xfe9   :  { %v8858_v7 = vpop.eup %6507  ;;  %6525 = vrcp.f32 %v3495_v44 }
 0xfea   :  { %v6510_v24 = vpop.eup %6509  ;;  %6527 = vrcp.f32 %v3482_v55 }
 0xfeb   :  { %v3484_v61 = vadd.f32 1.0, %v6510_v24  ;;  %v3570_v24 = vrot.slane %v8594_v20, 7 }
 0xfed   :  { %6529 = vrcp.f32 %v3484_v61  ;;  %v3602_v55 = vmul.f32 %v8834_v38, %v3570_v24  ;;  %v3572_v61 = vrot.slane %v8634_v57, 7 }
 0xfef   :  { %v3604_v20 = vmul.f32 %v8845_v31, %v3572_v61 }
0x1030   :  { %v3644_v45 = vpop.permute.xlu0 %3643 }
0x1031   :  { %v3682_v9 = vmul.f32 %v8834_v38, %v3644_v45  ;;  %v8863_v45 = vpop.eup %6511 }
0x1033   :  { %3723 = vrot.lane.b32.xlu0 %v3682_v9, %s6995_s23  ;;  %v8866_v9 = vpop.eup %6513 }
0x1034   :  { %v3646_v43 = vpop.permute.xlu0 %3645 }
0x1035   :  { %v3683_v37 = vmul.f32 %v8840_v27, %v3646_v43  ;;  %v3636_v51 = vpop.permute.xlu1 %3635  ;;  %v6516_v43 = vpop.eup %6515 }
0x1036   :  { %v3678_v33 = vmul.f32 %v8858_v7, %v3636_v51 }
0x1037   :  { %3725 = vrot.lane.b32.xlu0 %v3683_v37, %s6995_s23  ;;  %v8871_v37 = vpop.eup %6517 }
0x1038   :  { %v3648_v52 = vpop.permute.xlu0 %3647  ;;  %3715 = vrot.lane.b32.xlu1 %v3678_v33, %s6995_s23  ;;  %v8874_v18 = vpop.eup %6519 }
0x1039   :  { %v3684_v25 = vmul.f32 %v8845_v31, %v3648_v52  ;;  %v3642_v56 = vpop.permute.xlu1 %3641  ;;  %v6522_v13 = vpop.eup %6521 }
0x103a   :  { %v3681_v53 = vmul.f32 %v8866_v9, %v3642_v56  ;;  %v8879_v4 = vpop.eup %6523  ;;  %v3496_v17 = vadd.f32 1.0, %v6522_v13  ;;  %v3571_v56 = vrot.slane %v8598_v40, 7 }
0x103b   :  { %3727 = vrot.lane.b32.xlu0 %v3684_v25, %s6995_s23  ;;  %v3485_v25 = vadd.f32 1.0, %v6516_v43  ;;  %v8882_v6 = vpop.eup %6525 }
0x103c   :  { %v3626_v47 = vpop.permute.xlu0 %3625  ;;  %3721 = vrot.lane.b32.xlu1 %v3681_v53, %s6995_s23  ;;  %v8888_v5 = vpop.eup %6527  ;;  %v3603_v53 = vmul.f32 %v8840_v27, %v3571_v56  ;;  %v9867_v56 = vld [vmem:[#allocation23_spill] sm:$0xff] }
0x103d   :  { %v3673_v32 = vmul.f32 %v8851_v42, %v3626_v47  ;;  %v3650_v3 = vpop.permute.xlu1 %3649  ;;  %6531 = vrcp.f32 %v3485_v25  ;;  %v8892_v63 = vpop.eup %6529 }
0x103e   :  { %v3685_v52 = vmul.f32 %v8874_v18, %v3650_v3  ;;  %6533 = vrcp.f32 %v3496_v17 }
0x103f   :  { %3705 = vrot.lane.b32.xlu0 %v3673_v32, %s6995_s23 }
0x1040   :  { %v3630_v14 = vpop.permute.xlu0 %3629  ;;  %3729 = vrot.lane.b32.xlu1 %v3685_v52, %s6995_s23  ;;  %v3561_v52 = vrot.slane %v8606_v16, 7 }
0x1041   :  { %v3675_v26 = vmul.f32 %v8856_v28, %v3630_v14  ;;  %v3654_v10 = vpop.permute.xlu1 %3653 }
0x1042   :  { %v3687_v59 = vmul.f32 %v8882_v6, %v3654_v10  ;;  %v3593_v13 = vmul.f32 %v8851_v42, %v3561_v52 }
0x1043   :  { %3709 = vrot.lane.b32.xlu0 %v3675_v26, %s6995_s23 }
0x1044   :  { %v3638_v58 = vpop.permute.xlu0 %3637  ;;  %3733 = vrot.lane.b32.xlu1 %v3687_v59, %s6995_s23 }
0x1045   :  { %v3679_v12 = vmul.f32 %v8863_v45, %v3638_v58  ;;  %v3628_v2 = vpop.permute.xlu1 %3627 }
0x1046   :  { %v3674_v47 = vmul.f32 %v8888_v5, %v3628_v2 }
0x1047   :  { %3717 = vrot.lane.b32.xlu0 %v3679_v12, %s6995_s23  ;;  %v8896_v62 = vpop.eup %6531 }
0x1048   :  { %v3640_v48 = vpop.permute.xlu0 %3639  ;;  %3707 = vrot.lane.b32.xlu1 %v3674_v47, %s6995_s23  ;;  %v8900_v51 = vpop.eup %6533 }
0x1049   :  { %v3680_v19 = vmul.f32 %v8871_v37, %v3640_v48  ;;  %v3632_v32 = vpop.permute.xlu1 %3631 }
0x104a   :  { %v3676_v15 = vmul.f32 %v8892_v63, %v3632_v32  ;;  %v9864_v32 = vld [vmem:[#allocation25_spill] sm:$0xff] }
0x104b   :  { %3719 = vrot.lane.b32.xlu0 %v3680_v19, %s6995_s23 }
0x104c   :  { %v3652_v49 = vpop.permute.xlu0 %3651  ;;  %3711 = vrot.lane.b32.xlu1 %v3676_v15, %s6995_s23  ;;  %v3567_v15 = vrot.slane %v9864_v32, 7 }
0x104d   :  { %v3686_v22 = vmul.f32 %v8879_v4, %v3652_v49  ;;  %v3634_v44 = vpop.permute.xlu1 %3633  ;;  %v3563_v49 = vrot.slane %v8616_v36, 7  ;;  %v9865_v36 = vld [vmem:[#allocation21_spill] sm:$0xff] }
0x104e   :  { %v3677_v14 = vmul.f32 %v8896_v62, %v3634_v44  ;;  %v3599_v24 = vmul.f32 %v8863_v45, %v3567_v15 }
0x104f   :  { %3731 = vrot.lane.b32.xlu0 %v3686_v22, %s6995_s23  ;;  %v9863_v22 = vld [vmem:[#allocation22_spill] sm:$0xff]  ;;  %v3595_v17 = vmul.f32 %v8856_v28, %v3563_v49 }
0x1050   :  { %3713 = vrot.lane.b32.xlu1 %v3677_v14, %s6995_s23  ;;  %v3566_v59 = vrot.slane %v9863_v22, 7  ;;  %v9869_v49 = vld [vmem:[#allocation26_spill] sm:$0xff] }
0x1051   :  { %v3656_v26 = vpop.permute.xlu1 %3655  ;;  %v3574_v22 = vrot.slane %v9869_v49, 7 }
0x1052   :  { %v3688_v33 = vmul.f32 %v8900_v51, %v3656_v26  ;;  %v3598_v16 = vmul.f32 %v8858_v7, %v3566_v59  ;;  %v3569_v26 = vrot.slane %v9865_v36, 7 }
0x1053   :  { %v3606_v32 = vmul.f32 %v8879_v4, %v3574_v22 }
0x1054   :  { %3735 = vrot.lane.b32.xlu1 %v3688_v33, %s6995_s23 }
0x10a5   :  { %v3724_v58 = vpop.permute.xlu0 %3723 }
0x10a6   :  { %v8907_v12 = vadd.f32 %v3724_v58, %v3602_v55  ;;  %v3601_v55 = vmul.f32 %v8866_v9, %v3569_v26 }
0x10a8   :  { %6535 = vtanh.f32 %v8907_v12 }
0x10a9   :  { %v3726_v43 = vpop.permute.xlu0 %3725 }
0x10aa   :  { %v8912_v48 = vadd.f32 %v3726_v43, %v3603_v53  ;;  %v3716_v44 = vpop.permute.xlu1 %3715  ;;  %v3568_v53 = vrot.slane %v9867_v56, 7 }
0x10ab   :  { %v8934_v33 = vadd.f32 %v3716_v44, %v3598_v16  ;;  %v9870_v16 = vld [vmem:[#allocation24_spill] sm:$0xff] }
0x10ac   :  { %6537 = vtanh.f32 %v8912_v48  ;;  %v3600_v52 = vmul.f32 %v8871_v37, %v3568_v53 }
0x10ad   :  { %v3728_v3 = vpop.permute.xlu0 %3727  ;;  %9866 = vst [vmem:[#allocation22_spill] sm:$0xff] %v8934_v33 }
0x10ae   :  { %v8916_v19 = vadd.f32 %v3728_v3, %v3604_v20  ;;  %v3722_v43 = vpop.permute.xlu1 %3721  ;;  %v9868_v20 = vld [vmem:[#allocation27_spill] sm:$0xff] }
0x10af   :  { %v3573_v3 = vrot.slane %v9868_v20, 7 }
0x10b0   :  { %6539 = vtanh.f32 %v8916_v19 }
0x10b1   :  { %v3706_v25 = vpop.permute.xlu0 %3705 }
0x10b2   :  { %v6536_v40 = vpop.eup %6535  ;;  %v8923_v10 = vadd.f32 %v3706_v25, %v3593_v13  ;;  %v3605_v13 = vmul.f32 %v8874_v18, %v3573_v3  ;;  %v3730_v59 = vpop.permute.xlu1 %3729 }
0x10b3   :  { %3819 = vrot.lane.b32.xlu0 %v6536_v40, %s6994_s3  ;;  %v8945_v40 = vadd.f32 %v3722_v43, %v3601_v55 }
0x10b4   :  { %6541 = vtanh.f32 %v8923_v10 }
0x10b5   :  { %v3710_v2 = vpop.permute.xlu0 %3709 }
0x10b6   :  { %v6538_v57 = vpop.eup %6537  ;;  %v8931_v14 = vadd.f32 %v3710_v2, %v3595_v17  ;;  %v3575_v2 = vrot.slane %v9870_v16, 7  ;;  %v3734_v26 = vpop.permute.xlu1 %3733 }
0x10b7   :  { %3821 = vrot.lane.b32.xlu0 %v6538_v57, %s6994_s3 }
0x10b8   :  { %6543 = vtanh.f32 %v8931_v14  ;;  %v3607_v15 = vmul.f32 %v8882_v6, %v3575_v2  ;;  %v9876_v2 = vld [vmem:[#allocation19_spill] sm:$0xff] }
0x10b9   :  { %6545 = vtanh.f32 %v8934_v33  ;;  %v3718_v58 = vpop.permute.xlu0 %3717 }
0x10ba   :  { %v6540_v47 = vpop.eup %6539  ;;  %v8942_v61 = vadd.f32 %v3718_v58, %v3599_v24  ;;  %v9872_v58 = vld [vmem:[#allocation28_spill] sm:$0xff]  ;;  %v8965_v53 = vadd.f32 %v3734_v26, %v3607_v15  ;;  %v3708_v3 = vpop.permute.xlu1 %3707 }
0x10bb   :  { %3823 = vrot.lane.b32.xlu0 %v6540_v47, %s6994_s3  ;;  %v8955_v47 = vadd.f32 %v3730_v59, %v3605_v13  ;;  %v3562_v56 = vrot.slane %v9872_v58, 7  ;;  %v9874_v13 = vld [vmem:[#allocation29_spill] sm:$0xff]  ;;  %v9878_v58 = vld [vmem:[#allocation20_spill] sm:$0xff] }
0x10bc   :  { %6547 = vtanh.f32 %v8942_v61  ;;  %9873 = vst [vmem:[#allocation21_spill] sm:$0xff] %v8965_v53 }
0x10bd   :  { %6549 = vtanh.f32 %v8945_v40  ;;  %v3720_v25 = vpop.permute.xlu0 %3719  ;;  %v3594_v43 = vmul.f32 %v8888_v5, %v3562_v56  ;;  %v3576_v56 = vrot.slane %v9878_v58, 7 }
0x10be   :  { %v6542_v57 = vpop.eup %6541  ;;  %v8952_v17 = vadd.f32 %v3720_v25, %v3600_v52  ;;  %v3564_v25 = vrot.slane %v9874_v13, 7  ;;  %v3712_v59 = vpop.permute.xlu1 %3711 }
0x10bf   :  { %3801 = vrot.lane.b32.xlu0 %v6542_v57, %s6994_s3  ;;  %v8973_v57 = vadd.f32 %v3708_v3, %v3594_v43 }
0x10c0   :  { %6551 = vtanh.f32 %v8952_v17  ;;  %v3596_v49 = vmul.f32 %v8892_v63, %v3564_v25 }
0x10c1   :  { %6553 = vtanh.f32 %v8955_v47  ;;  %v3732_v44 = vpop.permute.xlu0 %3731  ;;  %9875 = vst [vmem:[#allocation23_spill] sm:$0xff] %v8973_v57 }
0x10c2   :  { %v6544_v36 = vpop.eup %6543  ;;  %v8962_v24 = vadd.f32 %v3732_v44, %v3606_v32  ;;  %v3565_v32 = vrot.slane %v9876_v2, 7  ;;  %v8980_v15 = vadd.f32 %v3712_v59, %v3596_v49  ;;  %v3714_v26 = vpop.permute.xlu1 %3713 }
0x10c3   :  { %v6546_v55 = vpop.eup %6545  ;;  %3805 = vrot.lane.b32.xlu0 %v6544_v36, %s6994_s3 }
0x10c4   :  { %9871 = vst [vmem:[#allocation25_spill] sm:$0xff] %v8962_v24  ;;  %3811 = vrot.lane.b32.xlu1 %v6546_v55, %s6994_s3  ;;  %6555 = vtanh.f32 %v8962_v24  ;;  %9877 = vst [vmem:[#allocation27_spill] sm:$0xff] %v8980_v15  ;;  %v3597_v44 = vmul.f32 %v8896_v62, %v3565_v32 }
0x10c5   :  { %6557 = vtanh.f32 %v8965_v53 }
0x10c6   :  { %v6548_v20 = vpop.eup %6547  ;;  %6559 = vtanh.f32 %v8973_v57  ;;  %v8987_v43 = vadd.f32 %v3714_v26, %v3597_v44  ;;  %v3736_v3 = vpop.permute.xlu1 %3735 }
0x10c7   :  { %v6550_v52 = vpop.eup %6549  ;;  %3813 = vrot.lane.b32.xlu0 %v6548_v20, %s6994_s3  ;;  %6561 = vtanh.f32 %v8980_v15  ;;  %v3608_v20 = vmul.f32 %v8900_v51, %v3576_v56 }
0x10c8   :  { %3817 = vrot.lane.b32.xlu1 %v6550_v52, %s6994_s3  ;;  %9879 = vst [vmem:[#allocation26_spill] sm:$0xff] %v8987_v43  ;;  %6563 = vtanh.f32 %v8987_v43 }
0x10c9   :  { %v8993_v13 = vadd.f32 %v3736_v3, %v3608_v20 }
0x10ca   :  { %v6552_v22 = vpop.eup %6551 }
0x10cb   :  { %v6554_v16 = vpop.eup %6553  ;;  %3815 = vrot.lane.b32.xlu0 %v6552_v22, %s6994_s3  ;;  %9880 = vst [vmem:[#allocation24_spill] sm:$0xff] %v8993_v13  ;;  %6565 = vtanh.f32 %v8993_v13 }
0x10cc   :  { %3825 = vrot.lane.b32.xlu1 %v6554_v16, %s6994_s3 }
0x10ce   :  { %v6556_v36 = vpop.eup %6555 }
0x10cf   :  { %v6558_v55 = vpop.eup %6557  ;;  %3827 = vrot.lane.b32.xlu0 %v6556_v36, %s6994_s3 }
0x10d0   :  { %3829 = vrot.lane.b32.xlu1 %v6558_v55, %s6994_s3  ;;  %v6560_v52 = vpop.eup %6559 }
0x10d1   :  { %v6562_v25 = vpop.eup %6561 }
0x10d2   :  { %v6564_v49 = vpop.eup %6563 }
0x10d4   :  { %3803 = vrot.lane.b32.xlu1 %v6560_v52, %s6994_s3 }
0x10d5   :  { %v6566_v22 = vpop.eup %6565 }
0x10d8   :  { %3807 = vrot.lane.b32.xlu1 %v6562_v25, %s6994_s3 }
0x10dc   :  { %3809 = vrot.lane.b32.xlu1 %v6564_v49, %s6994_s3 }
0x10e0   :  { %3831 = vrot.lane.b32.xlu1 %v6566_v22, %s6994_s3 }
0x1125   :  { %v3820_v59 = vpop.permute.xlu0 %3819 }
0x1126   :  { %v3858_v3 = vmul.f32 %v8834_v38, %v3820_v59 }
0x1128   :  { %v3896_v33 = vrot.slane %v3858_v3, 4 }
0x1129   :  { %v3822_v16 = vpop.permute.xlu0 %3821 }
0x112a   :  { %v3859_v52 = vmul.f32 %v8840_v27, %v3822_v16 }
0x112c   :  { %v3898_v15 = vrot.slane %v3859_v52, 3 }
0x112d   :  { %v3824_v2 = vpop.permute.xlu0 %3823 }
0x112e   :  { %v3860_v22 = vmul.f32 %v8845_v31, %v3824_v2 }
0x1130   :  { %v3900_v13 = vrot.slane %v3860_v22, 2 }
0x1131   :  { %v3802_v32 = vpop.permute.xlu0 %3801 }
0x1132   :  { %v3849_v57 = vmul.f32 %v8851_v42, %v3802_v32 }
0x1134   :  { %v3881_v2 = vrot.slane %v3849_v57, 5 }
0x1135   :  { %v3806_v36 = vpop.permute.xlu0 %3805 }
0x1136   :  { %v3812_v44 = vpop.permute.xlu1 %3811 }
0x1139   :  { %v3814_v58 = vpop.permute.xlu0 %3813 }
0x113a   :  { %v3818_v26 = vpop.permute.xlu1 %3817 }
0x113b   :  { %v3857_v56 = vmul.f32 %v8866_v9, %v3818_v26  ;;  %v3851_v9 = vmul.f32 %v8856_v28, %v3806_v36 }
0x113d   :  { %v3816_v25 = vpop.permute.xlu0 %3815  ;;  %v3895_v49 = vrot.slane %v3857_v56, 5 }
0x113e   :  { %v3826_v55 = vpop.permute.xlu1 %3825 }
0x113f   :  { %v3897_v24 = vsel %vm840_vm1, %v3896_v33, %v3895_v49  ;;  %v3861_v38 = vmul.f32 %v8874_v18, %v3826_v55 }
0x1140   :  { %v3899_v31 = vsel %vm843_vm2, %v3898_v15, %v3897_v24 }
0x1141   :  { %v3828_v16 = vpop.permute.xlu0 %3827  ;;  %v3902_v32 = vrot.slane %v3861_v38, 1 }
0x1142   :  { %v3830_v20 = vpop.permute.xlu1 %3829  ;;  %v3862_v42 = vmul.f32 %v8879_v4, %v3828_v16 }
0x1143   :  { %v3863_v33 = vmul.f32 %v8882_v6, %v3830_v20 }
0x1145   :  { %v3905_v6 = vrot.slane %v3863_v33, 7 }
0x1146   :  { %v3804_v53 = vpop.permute.xlu1 %3803 }
0x1147   :  { %v3850_v43 = vmul.f32 %v8888_v5, %v3804_v53  ;;  %v3901_v5 = vsel %vm846_vm3, %v3900_v13, %v3899_v31  ;;  %v3884_v53 = vrot.slane %v3851_v9, 3  ;;  %v3854_v13 = vmul.f32 %v8858_v7, %v3812_v44 }
0x1148   :  { %v3903_v24 = vsel %vm849_vm4, %v3902_v32, %v3901_v5 }
0x1149   :  { %v3882_v59 = vrot.slane %v3850_v43, 4  ;;  %v3855_v43 = vmul.f32 %v8863_v45, %v3814_v58  ;;  %v3904_v4 = vsel %vm852_vm5, %v3862_v42, %v3903_v24 }
0x114a   :  { %v3808_v27 = vpop.permute.xlu1 %3807  ;;  %v3906_v52 = vsel %vm855_vm6, %v3905_v6, %v3904_v4 }
0x114b   :  { %v3852_v26 = vmul.f32 %v8892_v63, %v3808_v27  ;;  %v3883_v28 = vsel %vm840_vm1, %v3882_v59, %v3881_v2  ;;  %v3856_v63 = vmul.f32 %v8871_v37, %v3816_v25  ;;  %v3891_v3 = vrot.slane %v3855_v43, 7 }
0x114c   :  { %v3885_v57 = vsel %vm843_vm2, %v3884_v53, %v3883_v28 }
0x114d   :  { %v3886_v36 = vrot.slane %v3852_v26, 2  ;;  %v3893_v58 = vrot.slane %v3856_v63, 6 }
0x114e   :  { %v3810_v18 = vpop.permute.xlu1 %3809 }
0x114f   :  { %v3853_v55 = vmul.f32 %v8896_v62, %v3810_v18  ;;  %v3887_v56 = vsel %vm846_vm3, %v3886_v36, %v3885_v57 }
0x1151   :  { %v3888_v15 = vrot.slane %v3853_v55, 1 }
0x1152   :  { %v3832_v20 = vpop.permute.xlu1 %3831 }
0x1153   :  { %v3889_v45 = vsel %vm849_vm4, %v3888_v15, %v3887_v56  ;;  %v3864_v62 = vmul.f32 %v8900_v51, %v3832_v20 }
0x1154   :  { %v3890_v37 = vsel %vm852_vm5, %v3854_v13, %v3889_v45 }
0x1155   :  { %v3907_v25 = vrot.slane %v3864_v62, 6  ;;  %v3892_v49 = vsel %vm855_vm6, %v3891_v3, %v3890_v37 }
0x1156   :  { %v3894_v22 = vsel %vm858_vm7, %v3893_v58, %v3892_v49 }
0x1157   :  { %3909 = vrot.lane.b32.xlu0 %v3894_v22, %s6995_s23  ;;  %v3908_v7 = vsel %vm858_vm7, %v3907_v25, %v3906_v52 }
0x1158   :  { %3911 = vrot.lane.b32.xlu1 %v3908_v7, %s6995_s23 }
0x11c9   :  { %v3910_v44 = vpop.permute.xlu0 %3909 }
0x11ca   :  { %5685 = vmatprep.mubr.msk.f32.mxu0 %vm312_vm8, %v3910_v44  ;;  %v3912_v51 = vpop.permute.xlu1 %3911 }
0x11cb   :  { %5686 = vmatmul.mubr.msk.f32.vlgmr.msra.gmra.mrb[18].mxu0 %vm312_vm8, %v3912_v51 }
0x129e   :  { %v9034_v9 = vpop.f32.mrb[18].mxu0 }
0x129f   :  { %v9036_v38 = vpop.f32.mrb[19].mxu0  ;;  %v4002_v59 = vrot.slane %v9034_v9, 3  ;;  %v4003_v27 = vrot.slane %v9034_v9, 4  ;;  %v4004_v26 = vrot.slane %v9034_v9, 5  ;;  %v4005_v2 = vrot.slane %v9034_v9, 6 }
0x12a0   :  { %v3994_v42 = vrot.slane %v9036_v38, 2  ;;  %v3996_v33 = vrot.slane %v9036_v38, 4  ;;  %v4000_v18 = vrot.slane %v9036_v38, 1  ;;  %v4001_v55 = vrot.slane %v9034_v9, 2 }
0x12a1   :  { %v9041_v16 = vadd.f32 %v4002_v59, %v7211_v54  ;;  %v9045_v31 = vadd.f32 %v4003_v27, %v7251_v11  ;;  %v9050_v5 = vadd.f32 %v4004_v26, %v7232_v0  ;;  %v9054_v53 = vadd.f32 %v4005_v2, %v7274_v23 }
0x12a2   :  { %v9062_v28 = vadd.f32 %v3994_v42, %v7169_v30  ;;  %v9067_v43 = vadd.f32 %v3996_v33, %v7188_v41  ;;  %v9073_v63 = vadd.f32 %v9036_v38, %v7196_v46  ;;  %v4007_v57 = vrot.slane %v9034_v9, 1 }
0x12a3   :  { %6567 = vtanh.f32 %v9041_v16  ;;  %v9078_v15 = vadd.f32 %v4000_v18, %v7266_v21  ;;  %v4006_v4 = vrot.slane %v9034_v9, 7  ;;  %v9083_v13 = vadd.f32 %v4001_v55, %v7235_v1 }
0x12a4   :  { %6569 = vtanh.f32 %v9045_v31  ;;  %v9088_v56 = vadd.f32 %v4007_v57, %v7281_v29  ;;  %v3995_v3 = vrot.slane %v9036_v38, 3  ;;  %v3997_v62 = vrot.slane %v9036_v38, 5 }
0x12a5   :  { %6571 = vtanh.f32 %v9050_v5  ;;  %v9092_v20 = vadd.f32 %v4006_v4, %v7244_v8  ;;  %v3998_v25 = vrot.slane %v9036_v38, 6  ;;  %v3999_v44 = vrot.slane %v9036_v38, 7 }
0x12a6   :  { %6573 = vtanh.f32 %v9054_v53  ;;  %v9101_v58 = vadd.f32 %v3995_v3, %v7176_v35  ;;  %v9107_v49 = vadd.f32 %v3997_v62, %v7203_v50  ;;  %v9126_v38 = vadd.f32 %v9034_v9, %v7287_v34 }
0x12a7   :  { %6575 = vtanh.f32 %v9062_v28  ;;  %v9114_v51 = vadd.f32 %v3998_v25, %v7223_v60  ;;  %v9120_v26 = vadd.f32 %v3999_v44, %v7185_v39  ;;  %v5481_v18 = vmul.f32 -1.442695, %v9041_v16 }
0x12a8   :  { %6577 = vtanh.f32 %v9067_v43  ;;  %v5482_v9 = vmul.f32 -1.442695, %v9045_v31  ;;  %v5483_v55 = vmul.f32 -1.442695, %v9050_v5  ;;  %v5472_v4 = vmul.f32 -1.442695, %v9062_v28 }
0x12a9   :  { %6579 = vtanh.f32 %v9073_v63  ;;  %v5478_v16 = vmul.f32 -1.442695, %v9073_v63  ;;  %v5479_v5 = vmul.f32 -1.442695, %v9078_v15  ;;  %v5485_v28 = vmul.f32 -1.442695, %v9092_v20 }
0x12aa   :  { %6581 = vtanh.f32 %v9078_v15 }
0x12ab   :  { %6583 = vtanh.f32 %v9083_v13 }
0x12ac   :  { %6585 = vtanh.f32 %v9088_v56 }
0x12ad   :  { %v6568_v32 = vpop.eup %6567  ;;  %6587 = vtanh.f32 %v9092_v20 }
0x12ae   :  { %4250 = vrot.lane.b32.xlu0 %v6568_v32, %s6994_s3  ;;  %v6570_v36 = vpop.eup %6569  ;;  %6589 = vtanh.f32 %v9101_v58 }
0x12af   :  { %v6572_v24 = vpop.eup %6571  ;;  %6591 = vtanh.f32 %v9107_v49 }
0x12b0   :  { %v6574_v6 = vpop.eup %6573  ;;  %6593 = vtanh.f32 %v9114_v51 }
0x12b1   :  { %v6576_v45 = vpop.eup %6575  ;;  %6595 = vtanh.f32 %v9120_v26 }
0x12b2   :  { %4252 = vrot.lane.b32.xlu0 %v6570_v36, %s6994_s3  ;;  %v6578_v37 = vpop.eup %6577  ;;  %6597 = vtanh.f32 %v9126_v38 }
0x12b3   :  { %v6580_v52 = vpop.eup %6579  ;;  %6599 = vpow2.f32 %v5481_v18 }
0x12b4   :  { %4244 = vrot.lane.b32.xlu1 %v6580_v52, %s6994_s3  ;;  %v6582_v22 = vpop.eup %6581  ;;  %6601 = vpow2.f32 %v5482_v9 }
0x12b5   :  { %v6584_v7 = vpop.eup %6583  ;;  %6603 = vpow2.f32 %v5483_v55  ;;  %v5476_v55 = vmul.f32 -1.442695, %v9114_v51 }
0x12b6   :  { %4254 = vrot.lane.b32.xlu0 %v6572_v24, %s6994_s3  ;;  %v6586_v59 = vpop.eup %6585  ;;  %v5484_v24 = vmul.f32 -1.442695, %v9054_v53 }
0x12b7   :  { %v6588_v27 = vpop.eup %6587 }
0x12b8   :  { %4248 = vrot.lane.b32.xlu1 %v6584_v7, %s6994_s3  ;;  %v6590_v2 = vpop.eup %6589  ;;  %6605 = vpow2.f32 %v5484_v24  ;;  %v5473_v7 = vmul.f32 -1.442695, %v9101_v58 }
0x12b9   :  { %v6592_v42 = vpop.eup %6591  ;;  %6607 = vpow2.f32 %v5472_v4 }
0x12ba   :  { %4256 = vrot.lane.b32.xlu0 %v6574_v6, %s6994_s3  ;;  %v6594_v32 = vpop.eup %6593 }
0x12bb   :  { %v6596_v33 = vpop.eup %6595 }
0x12bc   :  { %4258 = vrot.lane.b32.xlu1 %v6588_v27, %s6994_s3  ;;  %v6598_v36 = vpop.eup %6597 }
0x12bd   :  { %v6600_v57 = vpop.eup %6599 }
0x12be   :  { %4232 = vrot.lane.b32.xlu0 %v6576_v45, %s6994_s3  ;;  %v4097_v6 = vadd.f32 1.0, %v6600_v57  ;;  %v6602_v3 = vpop.eup %6601  ;;  %v5474_v45 = vmul.f32 -1.442695, %v9067_v43  ;;  %v5487_v43 = vmul.f32 -1.442695, %v9088_v56 }
0x12bf   :  { %v4098_v62 = vadd.f32 1.0, %v6602_v3  ;;  %v6604_v31 = vpop.eup %6603 }
0x12c0   :  { %4234 = vrot.lane.b32.xlu1 %v6590_v2, %s6994_s3  ;;  %6609 = vrcp.f32 %v4097_v6  ;;  %v4099_v53 = vadd.f32 1.0, %v6604_v31  ;;  %v5475_v2 = vmul.f32 -1.442695, %v9107_v49 }
0x12c1   :  { %6611 = vpow2.f32 %v5474_v45 }
0x12c2   :  { %4236 = vrot.lane.b32.xlu0 %v6578_v37, %s6994_s3  ;;  %v5480_v37 = vmul.f32 -1.442695, %v9083_v13  ;;  %6613 = vpow2.f32 %v5478_v16  ;;  %v6606_v52 = vpop.eup %6605  ;;  %v5477_v16 = vmul.f32 -1.442695, %v9120_v26 }
0x12c3   :  { %6615 = vrcp.f32 %v4098_v62  ;;  %v4100_v63 = vadd.f32 1.0, %v6606_v52  ;;  %v6608_v25 = vpop.eup %6607 }
0x12c4   :  { %4238 = vrot.lane.b32.xlu1 %v6592_v42, %s6994_s3  ;;  %6617 = vpow2.f32 %v5480_v37 }
0x12c5   :  { %6619 = vpow2.f32 %v5479_v5 }
0x12c6   :  { %4246 = vrot.lane.b32.xlu0 %v6582_v22, %s6994_s3  ;;  %6621 = vrcp.f32 %v4099_v53 }
0x12c7   :  { %6623 = vpow2.f32 %v5485_v28  ;;  %v5486_v28 = vmul.f32 -1.442695, %v9126_v38 }
0x12c8   :  { %4240 = vrot.lane.b32.xlu1 %v6594_v32, %s6994_s3  ;;  %6625 = vpow2.f32 %v5487_v43 }
0x12c9   :  { %6627 = vrcp.f32 %v4100_v63 }
0x12ca   :  { %4262 = vrot.lane.b32.xlu0 %v6586_v59, %s6994_s3  ;;  %v9145_v22 = vpop.eup %6609  ;;  %v4088_v59 = vadd.f32 1.0, %v6608_v25  ;;  %6629 = vpow2.f32 %v5473_v7 }
0x12cb   :  { %v6612_v44 = vpop.eup %6611 }
0x12cc   :  { %4242 = vrot.lane.b32.xlu1 %v6596_v33, %s6994_s3  ;;  %v6614_v27 = vpop.eup %6613  ;;  %6631 = vrcp.f32 %v4088_v59  ;;  %v4090_v33 = vadd.f32 1.0, %v6612_v44 }
0x12cd   :  { %v9150_v56 = vpop.eup %6615  ;;  %6633 = vpow2.f32 %v5475_v2 }
0x12ce   :  { %v6618_v32 = vpop.eup %6617  ;;  %6635 = vrcp.f32 %v4090_v33 }
0x12cf   :  { %v6620_v58 = vpop.eup %6619  ;;  %v4096_v6 = vadd.f32 1.0, %v6618_v32 }
0x12d0   :  { %4260 = vrot.lane.b32.xlu1 %v6598_v36, %s6994_s3  ;;  %v4094_v36 = vadd.f32 1.0, %v6614_v27  ;;  %v9155_v18 = vpop.eup %6621  ;;  %v4095_v49 = vadd.f32 1.0, %v6620_v58 }
0x12d1   :  { %v6624_v57 = vpop.eup %6623 }
0x12d2   :  { %v6626_v4 = vpop.eup %6625  ;;  %6637 = vrcp.f32 %v4094_v36  ;;  %v4101_v37 = vadd.f32 1.0, %v6624_v57 }
0x12d3   :  { %v9160_v3 = vpop.eup %6627  ;;  %6639 = vpow2.f32 %v5476_v55  ;;  %v4103_v51 = vadd.f32 1.0, %v6626_v4 }
0x12d4   :  { %6641 = vrcp.f32 %v4095_v49  ;;  %v6630_v31 = vpop.eup %6629 }
0x12d5   :  { %6643 = vrcp.f32 %v4096_v6  ;;  %v4089_v26 = vadd.f32 1.0, %v6630_v31 }
0x12d6   :  { %v9165_v5 = vpop.eup %6631  ;;  %6645 = vpow2.f32 %v5477_v16 }
0x12d7   :  { %6647 = vrcp.f32 %v4103_v51  ;;  %v6634_v43 = vpop.eup %6633 }
0x12d8   :  { %6649 = vrcp.f32 %v4101_v37  ;;  %v9170_v63 = vpop.eup %6635  ;;  %v4091_v38 = vadd.f32 1.0, %v6634_v43 }
0x12d9   :  { %6651 = vpow2.f32 %v5486_v28 }
0x12da   :  { %6653 = vrcp.f32 %v4089_v26 }
0x12db   :  { %6655 = vrcp.f32 %v4091_v38 }
0x1320   :  { %v4251_v13 = vpop.permute.xlu0 %4250 }
0x1321   :  { %v4289_v15 = vmul.f32 %v9145_v22, %v4251_v13  ;;  %v9172_v13 = vpop.eup %6637 }
0x1322   :  { %v6640_v59 = vpop.eup %6639 }
0x1323   :  { %4330 = vrot.lane.b32.xlu0 %v4289_v15, %s6995_s23  ;;  %v9177_v27 = vpop.eup %6641  ;;  %v4092_v36 = vadd.f32 1.0, %v6640_v59 }
0x1324   :  { %v4253_v20 = vpop.permute.xlu0 %4252  ;;  %v9180_v2 = vpop.eup %6643 }
0x1325   :  { %v4290_v42 = vmul.f32 %v9150_v56, %v4253_v20  ;;  %v6646_v58 = vpop.eup %6645  ;;  %6657 = vrcp.f32 %v4092_v36 }
0x1326   :  { %v4245_v7 = vpop.permute.xlu1 %4244  ;;  %v4093_v6 = vadd.f32 1.0, %v6646_v58 }
0x1327   :  { %4332 = vrot.lane.b32.xlu0 %v4290_v42, %s6995_s23  ;;  %v4286_v44 = vmul.f32 %v9172_v13, %v4245_v7 }
0x1328   :  { %v4255_v9 = vpop.permute.xlu0 %4254  ;;  %6659 = vrcp.f32 %v4093_v6  ;;  %v4180_v6 = vrot.slane %v8955_v47, 7 }
0x1329   :  { %v4291_v24 = vmul.f32 %v9155_v18, %v4255_v9  ;;  %4324 = vrot.lane.b32.xlu1 %v4286_v44, %s6995_s23  ;;  %v9185_v9 = vpop.eup %6647 }
0x132a   :  { %v4249_v42 = vpop.permute.xlu1 %4248 }
0x132b   :  { %4334 = vrot.lane.b32.xlu0 %v4291_v24, %s6995_s23  ;;  %v4288_v33 = vmul.f32 %v9180_v2, %v4249_v42  ;;  %v9188_v24 = vpop.eup %6649 }
0x132c   :  { %v4257_v45 = vpop.permute.xlu0 %4256 }
0x132d   :  { %v4292_v62 = vmul.f32 %v9160_v3, %v4257_v45  ;;  %4328 = vrot.lane.b32.xlu1 %v4288_v33, %s6995_s23  ;;  %v6652_v45 = vpop.eup %6651  ;;  %v4178_v33 = vrot.slane %v8912_v48, 7  ;;  %v4212_v48 = vmul.f32 %v9160_v3, %v4180_v6 }
0x132e   :  { %v4259_v57 = vpop.permute.xlu1 %4258  ;;  %v9194_v16 = vpop.eup %6653  ;;  %v4102_v31 = vadd.f32 1.0, %v6652_v45 }
0x132f   :  { %4336 = vrot.lane.b32.xlu0 %v4292_v62, %s6995_s23  ;;  %v4293_v4 = vmul.f32 %v9188_v24, %v4259_v57  ;;  %v9198_v37 = vpop.eup %6655  ;;  %v4210_v36 = vmul.f32 %v9150_v56, %v4178_v33  ;;  %v4179_v57 = vrot.slane %v8916_v19, 7 }
0x1330   :  { %v4233_v53 = vpop.permute.xlu0 %4232  ;;  %6661 = vrcp.f32 %v4102_v31  ;;  %v9202_v28 = vpop.eup %6657  ;;  %v4168_v31 = vrot.slane %v8923_v10, 7 }
0x1331   :  { %v4280_v52 = vmul.f32 %v9165_v5, %v4233_v53  ;;  %4338 = vrot.lane.b32.xlu1 %v4293_v4, %s6995_s23 }
0x1332   :  { %v4235_v62 = vpop.permute.xlu1 %4234 }
0x1333   :  { %4312 = vrot.lane.b32.xlu0 %v4280_v52, %s6995_s23  ;;  %v4281_v51 = vmul.f32 %v9194_v16, %v4235_v62 }
0x1334   :  { %v4237_v25 = vpop.permute.xlu0 %4236 }
0x1335   :  { %v4282_v15 = vmul.f32 %v9170_v63, %v4237_v25  ;;  %4314 = vrot.lane.b32.xlu1 %v4281_v51, %s6995_s23  ;;  %v9206_v25 = vpop.eup %6659 }
0x1336   :  { %v4239_v53 = vpop.permute.xlu1 %4238 }
0x1337   :  { %4316 = vrot.lane.b32.xlu0 %v4282_v15, %s6995_s23  ;;  %v4283_v52 = vmul.f32 %v9198_v37, %v4239_v53  ;;  %v4200_v53 = vmul.f32 %v9165_v5, %v4168_v31 }
0x1338   :  { %v4247_v20 = vpop.permute.xlu0 %4246 }
0x1339   :  { %v4287_v32 = vmul.f32 %v9177_v27, %v4247_v20  ;;  %4318 = vrot.lane.b32.xlu1 %v4283_v52, %s6995_s23  ;;  %v4177_v20 = vrot.slane %v8907_v12, 7  ;;  %v4211_v12 = vmul.f32 %v9155_v18, %v4179_v57 }
0x133a   :  { %v4241_v43 = vpop.permute.xlu1 %4240  ;;  %v9210_v44 = vpop.eup %6661 }
0x133b   :  { %4326 = vrot.lane.b32.xlu0 %v4287_v32, %s6995_s23  ;;  %v4284_v26 = vmul.f32 %v9202_v28, %v4241_v43  ;;  %v4209_v42 = vmul.f32 %v9145_v22, %v4177_v20  ;;  %v4170_v43 = vrot.slane %v8931_v14, 7  ;;  %v4175_v20 = vrot.slane %v8952_v17, 7  ;;  %v9882_v17 = vld [vmem:[#allocation24_spill] sm:$0xff] }
0x133c   :  { %v4263_v55 = vpop.permute.xlu0 %4262  ;;  %v4176_v14 = vrot.slane %v8945_v40, 7  ;;  %v9884_v40 = vld [vmem:[#allocation25_spill] sm:$0xff] }
0x133d   :  { %v4295_v49 = vmul.f32 %v9185_v9, %v4263_v55  ;;  %4320 = vrot.lane.b32.xlu1 %v4284_v26, %s6995_s23  ;;  %v4202_v10 = vmul.f32 %v9170_v63, %v4170_v43 }
0x133e   :  { %v4243_v7 = vpop.permute.xlu1 %4242 }
0x133f   :  { %4342 = vrot.lane.b32.xlu0 %v4295_v49, %s6995_s23  ;;  %v4285_v15 = vmul.f32 %v9206_v25, %v4243_v7  ;;  %v4174_v7 = vrot.slane %v8942_v61, 7  ;;  %v4207_v61 = vmul.f32 %v9177_v27, %v4175_v20 }
0x1341   :  { %4322 = vrot.lane.b32.xlu1 %v4285_v15, %s6995_s23  ;;  %v4206_v15 = vmul.f32 %v9172_v13, %v4174_v7  ;;  %v9886_v7 = vld [vmem:[#allocation23_spill] sm:$0xff] }
0x1342   :  { %v4261_v59 = vpop.permute.xlu1 %4260 }
0x1343   :  { %v4294_v38 = vmul.f32 %v9210_v44, %v4261_v59 }
0x1345   :  { %4340 = vrot.lane.b32.xlu1 %v4294_v38, %s6995_s23 }
0x1395   :  { %v4331_v32 = vpop.permute.xlu0 %4330 }
0x1396   :  { %v9217_v58 = vadd.f32 %v4331_v32, %v4209_v42 }
0x1398   :  { %6663 = vtanh.f32 %v9217_v58 }
0x1399   :  { %v4333_v55 = vpop.permute.xlu0 %4332 }
0x139a   :  { %v9222_v49 = vadd.f32 %v4333_v55, %v4210_v36  ;;  %v4208_v36 = vmul.f32 %v9180_v2, %v4176_v14  ;;  %v9888_v14 = vld [vmem:[#allocation27_spill] sm:$0xff] }
0x139b   :  { %v4325_v42 = vpop.permute.xlu1 %4324 }
0x139c   :  { %6665 = vtanh.f32 %v9222_v49  ;;  %v9249_v33 = vadd.f32 %v4325_v42, %v4206_v15 }
0x139d   :  { %v4335_v4 = vpop.permute.xlu0 %4334 }
0x139e   :  { %v9227_v45 = vadd.f32 %v4335_v4, %v4211_v12  ;;  %9881 = vst [vmem:[#allocation28_spill] sm:$0xff] %v9249_v33  ;;  %v4183_v12 = vrot.slane %v9882_v17, 7 }
0x139f   :  { %v4329_v4 = vpop.permute.xlu1 %4328 }
0x13a0   :  { %6667 = vtanh.f32 %v9227_v45 }
0x13a1   :  { %v4337_v62 = vpop.permute.xlu0 %4336 }
0x13a2   :  { %v6664_v51 = vpop.eup %6663  ;;  %v9232_v19 = vadd.f32 %v4337_v62, %v4212_v48  ;;  %v4181_v48 = vrot.slane %v9884_v40, 7  ;;  %v9260_v62 = vadd.f32 %v4329_v4, %v4208_v36  ;;  %v9889_v4 = vld [vmem:[#allocation26_spill] sm:$0xff] }
0x13a3   :  { %4426 = vrot.lane.b32.xlu0 %v6664_v51, %s6994_s3  ;;  %v4215_v51 = vmul.f32 %v9185_v9, %v4183_v12  ;;  %v4172_v40 = vrot.slane %v9889_v4, 7 }
0x13a4   :  { %6669 = vtanh.f32 %v9232_v19  ;;  %v4213_v31 = vmul.f32 %v9188_v24, %v4181_v48 }
0x13a5   :  { %v4313_v52 = vpop.permute.xlu0 %4312 }
0x13a6   :  { %v6666_v47 = vpop.eup %6665  ;;  %v9238_v26 = vadd.f32 %v4313_v52, %v4200_v53 }
0x13a7   :  { %4428 = vrot.lane.b32.xlu0 %v6666_v47, %s6994_s3  ;;  %v4339_v47 = vpop.permute.xlu1 %4338 }
0x13a8   :  { %6671 = vtanh.f32 %v9238_v26  ;;  %v9270_v15 = vadd.f32 %v4339_v47, %v4213_v31  ;;  %v9891_v47 = vld [vmem:[#allocation22_spill] sm:$0xff] }
0x13a9   :  { %v4317_v59 = vpop.permute.xlu0 %4316 }
0x13aa   :  { %v6668_v38 = vpop.eup %6667  ;;  %v9246_v32 = vadd.f32 %v4317_v59, %v4202_v10  ;;  %v4169_v10 = vrot.slane %v9886_v7, 7  ;;  %9887 = vst [vmem:[#allocation20_spill] sm:$0xff] %v9270_v15  ;;  %v4173_v7 = vrot.slane %v9891_v47, 7 }
0x13ab   :  { %4430 = vrot.lane.b32.xlu0 %v6668_v38, %s6994_s3  ;;  %v4315_v20 = vpop.permute.xlu1 %4314 }
0x13ac   :  { %6673 = vtanh.f32 %v9246_v32  ;;  %v4201_v59 = vmul.f32 %v9194_v16, %v4169_v10 }
0x13ad   :  { %6675 = vtanh.f32 %v9249_v33  ;;  %v4327_v55 = vpop.permute.xlu0 %4326 }
0x13ae   :  { %v6670_v57 = vpop.eup %6669  ;;  %v9257_v6 = vadd.f32 %v4327_v55, %v4207_v61  ;;  %v4171_v61 = vrot.slane %v9888_v14, 7  ;;  %v9277_v36 = vadd.f32 %v4315_v20, %v4201_v59  ;;  %v4205_v59 = vmul.f32 %v9206_v25, %v4173_v7 }
0x13af   :  { %4432 = vrot.lane.b32.xlu0 %v6670_v57, %s6994_s3  ;;  %v4319_v17 = vpop.permute.xlu1 %4318 }
0x13b0   :  { %9883 = vst [vmem:[#allocation29_spill] sm:$0xff] %v9257_v6  ;;  %6677 = vtanh.f32 %v9257_v6  ;;  %v4203_v55 = vmul.f32 %v9198_v37, %v4171_v61 }
0x13b1   :  { %6679 = vtanh.f32 %v9260_v62  ;;  %v4343_v53 = vpop.permute.xlu0 %4342 }
0x13b2   :  { %v6672_v52 = vpop.eup %6671  ;;  %v9267_v43 = vadd.f32 %v4343_v53, %v4215_v51  ;;  %v9284_v48 = vadd.f32 %v4319_v17, %v4203_v55  ;;  %v4204_v51 = vmul.f32 %v9202_v28, %v4172_v40 }
0x13b3   :  { %4408 = vrot.lane.b32.xlu0 %v6672_v52, %s6994_s3  ;;  %v4321_v53 = vpop.permute.xlu1 %4320 }
0x13b4   :  { %9885 = vst [vmem:[#allocation19_spill] sm:$0xff] %v9267_v43  ;;  %6681 = vtanh.f32 %v9267_v43  ;;  %9890 = vst [vmem:[#allocation24_spill] sm:$0xff] %v9284_v48  ;;  %v9291_v10 = vadd.f32 %v4321_v53, %v4204_v51 }
0x13b5   :  { %6683 = vtanh.f32 %v9270_v15 }
0x13b6   :  { %v6674_v38 = vpop.eup %6673  ;;  %6685 = vtanh.f32 %v9277_v36  ;;  %9892 = vst [vmem:[#allocation25_spill] sm:$0xff] %v9291_v10 }
0x13b7   :  { %v6676_v42 = vpop.eup %6675  ;;  %4412 = vrot.lane.b32.xlu0 %v6674_v38, %s6994_s3  ;;  %6687 = vtanh.f32 %v9284_v48  ;;  %v4323_v38 = vpop.permute.xlu1 %4322 }
0x13b8   :  { %4420 = vrot.lane.b32.xlu1 %v6676_v42, %s6994_s3  ;;  %6689 = vtanh.f32 %v9291_v10  ;;  %v9893_v42 = vld [vmem:[#allocation21_spill] sm:$0xff]  ;;  %v9298_v61 = vadd.f32 %v4323_v38, %v4205_v59 }
0x13b9   :  { %v4182_v14 = vrot.slane %v9893_v42, 7 }
0x13ba   :  { %v6678_v57 = vpop.eup %6677  ;;  %9894 = vst [vmem:[#allocation23_spill] sm:$0xff] %v9298_v61  ;;  %6691 = vtanh.f32 %v9298_v61 }
0x13bb   :  { %v6680_v12 = vpop.eup %6679  ;;  %4422 = vrot.lane.b32.xlu0 %v6678_v57, %s6994_s3  ;;  %v4214_v55 = vmul.f32 %v9210_v44, %v4182_v14  ;;  %v4341_v57 = vpop.permute.xlu1 %4340 }
0x13bc   :  { %4424 = vrot.lane.b32.xlu1 %v6680_v12, %s6994_s3 }
0x13bd   :  { %v9303_v12 = vadd.f32 %v4341_v57, %v4214_v55 }
0x13be   :  { %v6682_v31 = vpop.eup %6681 }
0x13bf   :  { %v6684_v52 = vpop.eup %6683  ;;  %4438 = vrot.lane.b32.xlu0 %v6682_v31, %s6994_s3  ;;  %6693 = vtanh.f32 %v9303_v12 }
0x13c0   :  { %4434 = vrot.lane.b32.xlu1 %v6684_v52, %s6994_s3  ;;  %v6686_v20 = vpop.eup %6685 }
0x13c1   :  { %v6688_v17 = vpop.eup %6687 }
0x13c2   :  { %v6690_v4 = vpop.eup %6689 }
0x13c4   :  { %4410 = vrot.lane.b32.xlu1 %v6686_v20, %s6994_s3  ;;  %v6692_v40 = vpop.eup %6691 }
0x13c8   :  { %4414 = vrot.lane.b32.xlu1 %v6688_v17, %s6994_s3 }
0x13c9   :  { %v6694_v51 = vpop.eup %6693 }
0x13cc   :  { %4416 = vrot.lane.b32.xlu1 %v6690_v4, %s6994_s3 }
0x13d0   :  { %4418 = vrot.lane.b32.xlu1 %v6692_v40, %s6994_s3 }
0x13d4   :  { %4436 = vrot.lane.b32.xlu1 %v6694_v51, %s6994_s3 }
0x1415   :  { %v4427_v31 = vpop.permute.xlu0 %4426 }
0x1416   :  { %v4465_v43 = vmul.f32 %v9145_v22, %v4427_v31 }
0x1419   :  { %v4429_v53 = vpop.permute.xlu0 %4428 }
0x141a   :  { %v4466_v6 = vmul.f32 %v9150_v56, %v4429_v53 }
0x141d   :  { %v4431_v52 = vpop.permute.xlu0 %4430 }
0x1421   :  { %v4433_v47 = vpop.permute.xlu0 %4432 }
0x1425   :  { %v4409_v59 = vpop.permute.xlu0 %4408 }
0x1426   :  { %v4456_v14 = vmul.f32 %v9165_v5, %v4409_v59  ;;  %v4467_v5 = vmul.f32 %v9155_v18, %v4431_v52  ;;  %v4503_v59 = vrot.slane %v4465_v43, 5 }
0x1428   :  { %v4488_v40 = vrot.slane %v4456_v14, 6  ;;  %v4507_v53 = vrot.slane %v4467_v5, 3 }
0x1429   :  { %v4413_v42 = vpop.permute.xlu0 %4412 }
0x142a   :  { %v4421_v7 = vpop.permute.xlu1 %4420  ;;  %v4458_v57 = vmul.f32 %v9170_v63, %v4413_v42  ;;  %v4468_v63 = vmul.f32 %v9160_v3, %v4433_v47  ;;  %v4505_v42 = vrot.slane %v4466_v6, 4 }
0x142c   :  { %v4491_v61 = vrot.slane %v4458_v57, 4 }
0x142d   :  { %v4423_v51 = vpop.permute.xlu0 %4422 }
0x142e   :  { %v4425_v38 = vpop.permute.xlu1 %4424  ;;  %v4463_v18 = vmul.f32 %v9177_v27, %v4423_v51  ;;  %v4462_v27 = vmul.f32 %v9172_v13, %v4421_v7 }
0x142f   :  { %v4464_v4 = vmul.f32 %v9180_v2, %v4425_v38 }
0x1431   :  { %v4502_v15 = vrot.slane %v4464_v4, 6  ;;  %v4439_v14 = vpop.permute.xlu0 %4438 }
0x1432   :  { %v4435_v20 = vpop.permute.xlu1 %4434  ;;  %v4471_v52 = vmul.f32 %v9185_v9, %v4439_v14 }
0x1433   :  { %v4504_v56 = vsel %vm840_vm1, %v4503_v59, %v4502_v15  ;;  %v4469_v3 = vmul.f32 %v9188_v24, %v4435_v20 }
0x1434   :  { %v4506_v6 = vsel %vm843_vm2, %v4505_v42, %v4504_v56  ;;  %v4514_v20 = vrot.slane %v4471_v52, 7 }
0x1435   :  { %v4511_v57 = vrot.slane %v4469_v3, 1 }
0x1436   :  { %v4411_v55 = vpop.permute.xlu1 %4410 }
0x1437   :  { %v4457_v17 = vmul.f32 %v9194_v16, %v4411_v55  ;;  %v4500_v55 = vrot.slane %v4463_v18, 7 }
0x1439   :  { %v4489_v10 = vrot.slane %v4457_v17, 5 }
0x143a   :  { %v4415_v33 = vpop.permute.xlu1 %4414 }
0x143b   :  { %v4459_v48 = vmul.f32 %v9198_v37, %v4415_v33  ;;  %v4490_v16 = vsel %vm840_vm1, %v4489_v10, %v4488_v40  ;;  %v4509_v37 = vrot.slane %v4468_v63, 2 }
0x143c   :  { %v4492_v38 = vsel %vm843_vm2, %v4491_v61, %v4490_v16 }
0x143d   :  { %v4493_v22 = vrot.slane %v4459_v48, 3 }
0x143e   :  { %v4417_v2 = vpop.permute.xlu1 %4416 }
0x143f   :  { %v4460_v31 = vmul.f32 %v9202_v28, %v4417_v2  ;;  %v4494_v33 = vsel %vm846_vm3, %v4493_v22, %v4492_v38  ;;  %v4508_v28 = vsel %vm846_vm3, %v4507_v53, %v4506_v6 }
0x1440   :  { %v4510_v61 = vsel %vm849_vm4, %v4509_v37, %v4508_v28 }
0x1441   :  { %v4495_v10 = vrot.slane %v4460_v31, 2  ;;  %v4512_v4 = vsel %vm852_vm5, %v4511_v57, %v4510_v61 }
0x1442   :  { %v4419_v43 = vpop.permute.xlu1 %4418 }
0x1443   :  { %v4461_v48 = vmul.f32 %v9206_v25, %v4419_v43  ;;  %v4496_v15 = vsel %vm849_vm4, %v4495_v10, %v4494_v33 }
0x1445   :  { %v4497_v47 = vrot.slane %v4461_v48, 1 }
0x1446   :  { %v4437_v24 = vpop.permute.xlu1 %4436 }
0x1447   :  { %v4498_v17 = vsel %vm852_vm5, %v4497_v47, %v4496_v15  ;;  %v4470_v9 = vmul.f32 %v9210_v44, %v4437_v24 }
0x1448   :  { %v4499_v25 = vsel %vm855_vm6, %v4462_v27, %v4498_v17 }
0x1449   :  { %v4513_v40 = vsel %vm855_vm6, %v4470_v9, %v4512_v4  ;;  %v4501_v51 = vsel %vm858_vm7, %v4500_v55, %v4499_v25 }
0x144a   :  { %4516 = vrot.lane.b32.xlu0 %v4501_v51, %s6995_s23  ;;  %v4515_v5 = vsel %vm858_vm7, %v4514_v20, %v4513_v40 }
0x144b   :  { %4518 = vrot.lane.b32.xlu1 %v4515_v5, %s6995_s23 }
0x14bc   :  { %v4517_v13 = vpop.permute.xlu0 %4516 }
0x14bd   :  { %5696 = vmatprep.mubr.msk.f32.mxu1 %vm312_vm8, %v4517_v13  ;;  %v4519_v7 = vpop.permute.xlu1 %4518 }
0x14be   :  { %5697 = vmatmul.mubr.msk.f32.vlgmr.msra.gmra.mrb[10].mxu1 %vm312_vm8, %v4519_v7 }
0x1591   :  { %v9344_v44 = vpop.f32.mrb[10].mxu1 }
0x1592   :  { %v4608_v63 = vrot.slane %v9344_v44, 1  ;;  %v4590_v16 = vpop.f32.mrb[11].mxu1  ;;  %v4609_v2 = vrot.slane %v9344_v44, 2  ;;  %v4610_v38 = vrot.slane %v9344_v44, 3  ;;  %v4611_v22 = vrot.slane %v9344_v44, 4 }
0x1593   :  { %v4601_v53 = vrot.slane %v4590_v16, 1  ;;  %v4614_v33 = vrot.slane %v9344_v44, 7  ;;  %v9406_v47 = vadd.f32 %v4590_v16, %v7266_v21 }
0x1594   :  { %v9348_v59 = vadd.f32 %v4608_v63, %v7235_v1  ;;  %v9354_v42 = vadd.f32 %v4609_v2, %v7211_v54  ;;  %v9358_v31 = vadd.f32 %v4610_v38, %v7251_v11  ;;  %v4612_v1 = vrot.slane %v9344_v44, 5 }
0x1595   :  { %v9364_v56 = vadd.f32 %v4611_v22, %v7232_v0  ;;  %v4602_v11 = vrot.slane %v4590_v16, 2  ;;  %v9373_v18 = vadd.f32 %v4601_v53, %v7169_v30  ;;  %v4603_v0 = vrot.slane %v4590_v16, 3 }
0x1596   :  { %6695 = vtanh.f32 %v9348_v59  ;;  %v9368_v54 = vadd.f32 %v4612_v1, %v7274_v23  ;;  %v4613_v23 = vrot.slane %v9344_v44, 6  ;;  %v9382_v43 = vadd.f32 %v4614_v33, %v7287_v34 }
0x1597   :  { %6697 = vtanh.f32 %v9354_v42  ;;  %v9378_v3 = vadd.f32 %v4602_v11, %v7176_v35  ;;  %v4604_v30 = vrot.slane %v4590_v16, 4  ;;  %v9387_v52 = vadd.f32 %v4603_v0, %v7188_v41 }
0x1598   :  { %6699 = vtanh.f32 %v9358_v31  ;;  %v9391_v35 = vadd.f32 %v4613_v23, %v7244_v8  ;;  %v4605_v34 = vrot.slane %v4590_v16, 5  ;;  %v4606_v41 = vrot.slane %v4590_v16, 6 }
0x1599   :  { %6701 = vtanh.f32 %v9364_v56  ;;  %v9396_v48 = vadd.f32 %v4604_v30, %v7203_v50  ;;  %v4607_v50 = vrot.slane %v4590_v16, 7  ;;  %v5499_v25 = vmul.f32 -1.442695, %v9354_v42 }
0x159a   :  { %6703 = vtanh.f32 %v9368_v54  ;;  %v9402_v15 = vadd.f32 %v4605_v34, %v7223_v60  ;;  %v9411_v55 = vadd.f32 %v4606_v41, %v7185_v39  ;;  %v9425_v39 = vadd.f32 %v9344_v44, %v7281_v29 }
0x159b   :  { %6705 = vtanh.f32 %v9373_v18  ;;  %v9418_v21 = vadd.f32 %v4607_v50, %v7196_v46  ;;  %v5498_v29 = vmul.f32 -1.442695, %v9348_v59  ;;  %v5500_v40 = vmul.f32 -1.442695, %v9358_v31 }
0x159c   :  { %6707 = vtanh.f32 %v9378_v3  ;;  %v5501_v5 = vmul.f32 -1.442695, %v9364_v56  ;;  %v5502_v7 = vmul.f32 -1.442695, %v9368_v54  ;;  %v5490_v63 = vmul.f32 -1.442695, %v9373_v18 }
0x159d   :  { %6709 = vtanh.f32 %v9382_v43  ;;  %v5491_v16 = vmul.f32 -1.442695, %v9378_v3  ;;  %v5492_v38 = vmul.f32 -1.442695, %v9387_v52  ;;  %v5504_v42 = vmul.f32 -1.442695, %v9382_v43 }
0x159e   :  { %6711 = vtanh.f32 %v9387_v52  ;;  %v5493_v56 = vmul.f32 -1.442695, %v9396_v48  ;;  %v5503_v54 = vmul.f32 -1.442695, %v9391_v35  ;;  %v5494_v33 = vmul.f32 -1.442695, %v9402_v15 }
0x159f   :  { %6713 = vtanh.f32 %v9391_v35  ;;  %v5495_v43 = vmul.f32 -1.442695, %v9411_v55  ;;  %v5496_v41 = vmul.f32 -1.442695, %v9418_v21 }
0x15a0   :  { %v6696_v14 = vpop.eup %6695  ;;  %6715 = vtanh.f32 %v9396_v48 }
0x15a1   :  { %4855 = vrot.lane.b32.xlu1 %v6696_v14, %s6994_s3  ;;  %v6698_v37 = vpop.eup %6697  ;;  %6717 = vtanh.f32 %v9402_v15 }
0x15a2   :  { %4857 = vrot.lane.b32.xlu0 %v6698_v37, %s6994_s3  ;;  %v6700_v10 = vpop.eup %6699  ;;  %6719 = vtanh.f32 %v9406_v47 }
0x15a3   :  { %v6702_v6 = vpop.eup %6701  ;;  %6721 = vtanh.f32 %v9411_v55 }
0x15a4   :  { %v6704_v28 = vpop.eup %6703  ;;  %6723 = vtanh.f32 %v9418_v21 }
0x15a5   :  { %v6706_v8 = vpop.eup %6705  ;;  %6725 = vtanh.f32 %v9425_v39 }
0x15a6   :  { %4859 = vrot.lane.b32.xlu0 %v6700_v10, %s6994_s3  ;;  %v6708_v61 = vpop.eup %6707  ;;  %6727 = vpow2.f32 %v5498_v29  ;;  %v5497_v10 = vmul.f32 -1.442695, %v9406_v47 }
0x15a7   :  { %4841 = vrot.lane.b32.xlu1 %v6708_v61, %s6994_s3  ;;  %v6710_v27 = vpop.eup %6709  ;;  %6729 = vpow2.f32 %v5499_v25 }
0x15a8   :  { %v6712_v60 = vpop.eup %6711  ;;  %6731 = vpow2.f32 %v5500_v40 }
0x15a9   :  { %v6714_v57 = vpop.eup %6713  ;;  %6733 = vpow2.f32 %v5501_v5 }
0x15aa   :  { %4861 = vrot.lane.b32.xlu0 %v6702_v6, %s6994_s3  ;;  %v6716_v24 = vpop.eup %6715 }
0x15ab   :  { %4867 = vrot.lane.b32.xlu1 %v6710_v27, %s6994_s3  ;;  %v6718_v20 = vpop.eup %6717 }
0x15ac   :  { %v6720_v17 = vpop.eup %6719 }
0x15ad   :  { %v6722_v46 = vpop.eup %6721 }
0x15ae   :  { %4863 = vrot.lane.b32.xlu0 %v6704_v28, %s6994_s3  ;;  %v6724_v9 = vpop.eup %6723 }
0x15af   :  { %4845 = vrot.lane.b32.xlu1 %v6716_v24, %s6994_s3  ;;  %v6726_v4 = vpop.eup %6725 }
0x15b0   :  { %v6728_v51 = vpop.eup %6727 }
0x15b1   :  { %v4703_v13 = vadd.f32 1.0, %v6728_v51  ;;  %v6730_v44 = vpop.eup %6729 }
0x15b2   :  { %4839 = vrot.lane.b32.xlu0 %v6706_v8, %s6994_s3  ;;  %v4704_v59 = vadd.f32 1.0, %v6730_v44  ;;  %v6732_v2 = vpop.eup %6731 }
0x15b3   :  { %4847 = vrot.lane.b32.xlu1 %v6718_v20, %s6994_s3  ;;  %6735 = vrcp.f32 %v4703_v13  ;;  %v6734_v22 = vpop.eup %6733  ;;  %v4705_v31 = vadd.f32 1.0, %v6732_v2 }
0x15b4   :  { %6737 = vpow2.f32 %v5502_v7  ;;  %v4706_v11 = vadd.f32 1.0, %v6734_v22 }
0x15b5   :  { %6739 = vpow2.f32 %v5490_v63 }
0x15b6   :  { %4843 = vrot.lane.b32.xlu0 %v6712_v60, %s6994_s3  ;;  %6741 = vpow2.f32 %v5491_v16  ;;  %v5505_v60 = vmul.f32 -1.442695, %v9425_v39 }
0x15b7   :  { %4849 = vrot.lane.b32.xlu1 %v6722_v46, %s6994_s3  ;;  %6743 = vrcp.f32 %v4704_v59 }
0x15b8   :  { %6745 = vpow2.f32 %v5492_v38 }
0x15b9   :  { %6747 = vpow2.f32 %v5504_v42 }
0x15ba   :  { %4865 = vrot.lane.b32.xlu0 %v6714_v57, %s6994_s3  ;;  %6749 = vrcp.f32 %v4705_v31 }
0x15bb   :  { %4851 = vrot.lane.b32.xlu1 %v6724_v9, %s6994_s3  ;;  %6751 = vpow2.f32 %v5493_v56 }
0x15bc   :  { %6753 = vpow2.f32 %v5503_v54 }
0x15bd   :  { %v9443_v14 = vpop.eup %6735  ;;  %6755 = vrcp.f32 %v4706_v11 }
0x15be   :  { %4853 = vrot.lane.b32.xlu0 %v6720_v17, %s6994_s3  ;;  %v6738_v37 = vpop.eup %6737  ;;  %6757 = vpow2.f32 %v5494_v33 }
0x15bf   :  { %4869 = vrot.lane.b32.xlu1 %v6726_v4, %s6994_s3  ;;  %v6740_v18 = vpop.eup %6739  ;;  %v4707_v0 = vadd.f32 1.0, %v6738_v37 }
0x15c0   :  { %v6742_v3 = vpop.eup %6741  ;;  %v4695_v52 = vadd.f32 1.0, %v6740_v18 }
0x15c1   :  { %v9451_v23 = vpop.eup %6743  ;;  %v4696_v34 = vadd.f32 1.0, %v6742_v3  ;;  %6759 = vrcp.f32 %v4707_v0 }
0x15c2   :  { %v6746_v35 = vpop.eup %6745  ;;  %6761 = vpow2.f32 %v5497_v10 }
0x15c3   :  { %v6748_v48 = vpop.eup %6747  ;;  %6763 = vpow2.f32 %v5495_v43  ;;  %v4697_v8 = vadd.f32 1.0, %v6746_v35 }
0x15c4   :  { %v9456_v28 = vpop.eup %6749  ;;  %6765 = vrcp.f32 %v4695_v52  ;;  %v4709_v50 = vadd.f32 1.0, %v6748_v48 }
0x15c5   :  { %v6752_v47 = vpop.eup %6751  ;;  %6767 = vrcp.f32 %v4696_v34 }
0x15c6   :  { %v6754_v55 = vpop.eup %6753  ;;  %6769 = vpow2.f32 %v5496_v41  ;;  %v4698_v24 = vadd.f32 1.0, %v6752_v47 }
0x15c7   :  { %v9461_v27 = vpop.eup %6755  ;;  %6771 = vrcp.f32 %v4697_v8  ;;  %v4708_v20 = vadd.f32 1.0, %v6754_v55 }
0x15c8   :  { %6773 = vrcp.f32 %v4709_v50  ;;  %v6758_v17 = vpop.eup %6757 }
0x15c9   :  { %6775 = vpow2.f32 %v5505_v60  ;;  %v4699_v25 = vadd.f32 1.0, %v6758_v17  ;;  %v5506_v60 = vld [vmem:[%s9735_s6] ss:$0 sm:$0xff]  ;;  %v4784_v17 = vrot.slane %v9217_v58, 7 }
0x15ca   :  { %6777 = vrcp.f32 %v4698_v24 }
0x15cb   :  { %v9466_v46 = vpop.eup %6759  ;;  %6779 = vrcp.f32 %v4708_v20 }
0x15cc   :  { %v6762_v4 = vpop.eup %6761  ;;  %6781 = vrcp.f32 %v4699_v25 }
0x15cd   :  { %v6764_v39 = vpop.eup %6763  ;;  %v4702_v5 = vadd.f32 1.0, %v6762_v4 }
0x15ce   :  { %v9469_v40 = vpop.eup %6765  ;;  %v4700_v59 = vadd.f32 1.0, %v6764_v39 }
0x15cf   :  { %v9472_v51 = vpop.eup %6767  ;;  %6783 = vrcp.f32 %v4702_v5 }
0x15d0   :  { %v6770_v16 = vpop.eup %6769  ;;  %6785 = vrcp.f32 %v4700_v59 }
0x15d1   :  { %v9476_v2 = vpop.eup %6771 }
0x15d2   :  { %v9480_v38 = vpop.eup %6773 }
0x15d3   :  { %v6776_v56 = vpop.eup %6775 }
0x15d4   :  { %v9484_v54 = vpop.eup %6777  ;;  %v4710_v3 = vadd.f32 1.0, %v6776_v56 }
0x15d5   :  { %v9488_v11 = vpop.eup %6779 }
0x15d6   :  { %v9494_v10 = vpop.eup %6781 }
0x15d9   :  { %v9497_v52 = vpop.eup %6783 }
0x15da   :  { %v9501_v34 = vpop.eup %6785 }
0x1613   :  { %v4856_v1 = vpop.permute.xlu1 %4855 }
0x1614   :  { %v4895_v53 = vmul.f32 %v9443_v14, %v4856_v1  ;;  %v4858_v30 = vpop.permute.xlu0 %4857 }
0x1615   :  { %v4896_v6 = vmul.f32 %v9451_v23, %v4858_v30 }
0x1616   :  { %4935 = vrot.lane.b32.xlu1 %v4895_v53, %s6995_s23  ;;  %v4701_v53 = vadd.f32 1.0, %v6770_v16 }
0x1617   :  { %4937 = vrot.lane.b32.xlu0 %v4896_v6, %s6995_s23 }
0x1618   :  { %v4860_v15 = vpop.permute.xlu0 %4859  ;;  %6787 = vrcp.f32 %v4701_v53 }
0x1619   :  { %v4897_v61 = vmul.f32 %v9456_v28, %v4860_v15  ;;  %v4842_v13 = vpop.permute.xlu1 %4841  ;;  %6789 = vrcp.f32 %v4710_v3 }
0x161a   :  { %v4888_v44 = vmul.f32 %v9472_v51, %v4842_v13 }
0x161b   :  { %4939 = vrot.lane.b32.xlu0 %v4897_v61, %s6995_s23 }
0x161c   :  { %v4862_v57 = vpop.permute.xlu0 %4861  ;;  %4921 = vrot.lane.b32.xlu1 %v4888_v44, %s6995_s23 }
0x161d   :  { %v4898_v21 = vmul.f32 %v9461_v27, %v4862_v57  ;;  %v4868_v42 = vpop.permute.xlu1 %4867  ;;  %v4783_v57 = vrot.slane %v9260_v62, 7  ;;  %v4786_v62 = vrot.slane %v9227_v45, 7 }
0x161e   :  { %v4901_v31 = vmul.f32 %v9480_v38, %v4868_v42 }
0x161f   :  { %4941 = vrot.lane.b32.xlu0 %v4898_v21, %s6995_s23  ;;  %v4815_v24 = vmul.f32 %v9443_v14, %v4783_v57  ;;  %v4818_v44 = vmul.f32 %v9461_v27, %v4786_v62 }
0x1620   :  { %v4864_v9 = vpop.permute.xlu0 %4863  ;;  %4947 = vrot.lane.b32.xlu1 %v4901_v31, %s6995_s23  ;;  %v4775_v31 = vrot.slane %v9238_v26, 7 }
0x1621   :  { %v4899_v29 = vmul.f32 %v9466_v46, %v4864_v9  ;;  %v4846_v37 = vpop.permute.xlu1 %4845  ;;  %v4816_v9 = vmul.f32 %v9451_v23, %v4784_v17 }
0x1622   :  { %v4890_v18 = vmul.f32 %v9484_v54, %v4846_v37  ;;  %v9506_v15 = vpop.eup %6787  ;;  %v4807_v56 = vmul.f32 %v9469_v40, %v4775_v31 }
0x1623   :  { %4943 = vrot.lane.b32.xlu0 %v4899_v29, %s6995_s23  ;;  %v9510_v47 = vpop.eup %6789  ;;  %v4785_v29 = vrot.slane %v9222_v49, 7 }
0x1624   :  { %v4840_v7 = vpop.permute.xlu0 %4839  ;;  %4925 = vrot.lane.b32.xlu1 %v4890_v18, %s6995_s23 }
0x1625   :  { %v4887_v63 = vmul.f32 %v9469_v40, %v4840_v7  ;;  %v4848_v43 = vpop.permute.xlu1 %4847  ;;  %v4817_v25 = vmul.f32 %v9456_v28, %v4785_v29 }
0x1626   :  { %v4891_v30 = vmul.f32 %v9494_v10, %v4848_v43 }
0x1627   :  { %4919 = vrot.lane.b32.xlu0 %v4887_v63, %s6995_s23  ;;  %v4787_v63 = vrot.slane %v9232_v19, 7 }
0x1628   :  { %v4844_v22 = vpop.permute.xlu0 %4843  ;;  %4927 = vrot.lane.b32.xlu1 %v4891_v30, %s6995_s23 }
0x1629   :  { %v4889_v1 = vmul.f32 %v9476_v2, %v4844_v22  ;;  %v4850_v48 = vpop.permute.xlu1 %4849  ;;  %v4819_v49 = vmul.f32 %v9466_v46, %v4787_v63  ;;  %v4776_v22 = vrot.slane %v9277_v36, 7  ;;  %v4789_v36 = vrot.slane %v9303_v12, 7 }
0x162a   :  { %v4892_v41 = vmul.f32 %v9501_v34, %v4850_v48  ;;  %v9896_v48 = vld [vmem:[#allocation24_spill] sm:$0xff] }
0x162b   :  { %4923 = vrot.lane.b32.xlu0 %v4889_v1, %s6995_s23  ;;  %v4808_v1 = vmul.f32 %v9472_v51, %v4776_v22 }
0x162c   :  { %v4866_v33 = vpop.permute.xlu0 %4865  ;;  %4929 = vrot.lane.b32.xlu1 %v4892_v41, %s6995_s23  ;;  %v4778_v41 = vrot.slane %v9896_v48, 7  ;;  %v5104_v48 = vld [vmem:[#allocation8] sm:$0xff] }
0x162d   :  { %v4900_v0 = vmul.f32 %v9488_v11, %v4866_v33  ;;  %v4852_v8 = vpop.permute.xlu1 %4851  ;;  %v4777_v33 = vrot.slane %v9246_v32, 7  ;;  %v4821_v32 = vmul.f32 %v9480_v38, %v4789_v36 }
0x162e   :  { %v4893_v61 = vmul.f32 %v9506_v15, %v4852_v8 }
0x162f   :  { %4945 = vrot.lane.b32.xlu0 %v4900_v0, %s6995_s23  ;;  %v4809_v26 = vmul.f32 %v9476_v2, %v4777_v33 }
0x1630   :  { %v4854_v6 = vpop.permute.xlu0 %4853  ;;  %4931 = vrot.lane.b32.xlu1 %v4893_v61, %s6995_s23  ;;  %v4810_v61 = vmul.f32 %v9484_v54, %v4778_v41  ;;  %v5105_v41 = vld [vmem:[#allocation8 + $0x8] sm:$0xff] }
0x1631   :  { %v4894_v35 = vmul.f32 %v9497_v52, %v4854_v6  ;;  %v4870_v50 = vpop.permute.xlu1 %4869  ;;  %v9895_v6 = vld [vmem:[#allocation20_spill] sm:$0xff] }
0x1632   :  { %v4902_v55 = vmul.f32 %v9510_v47, %v4870_v50 }
0x1633   :  { %4933 = vrot.lane.b32.xlu0 %v4894_v35, %s6995_s23  ;;  %v4788_v35 = vrot.slane %v9895_v6, 7 }
0x1634   :  { %4949 = vrot.lane.b32.xlu1 %v4902_v55, %s6995_s23 }
0x1635   :  { %v4820_v50 = vmul.f32 %v9488_v11, %v4788_v35 }
0x1638   :  { %5085 = vrot.lane.b32.xlu1 %v5506_v60, %s6996_s28 }
0x1688   :  { %v4936_v21 = vpop.permute.xlu1 %4935 }
0x1689   :  { %v4975_v20 = vadd.f32 %v4936_v21, %v4815_v24  ;;  %v4938_v4 = vpop.permute.xlu0 %4937  ;;  %v9897_v24 = vld [vmem:[#allocation25_spill] sm:$0xff] }
0x168a   :  { %v4976_v39 = vadd.f32 %v4938_v4, %v4816_v9  ;;  %v4779_v21 = vrot.slane %v9897_v24, 7  ;;  %v9898_v9 = vld [vmem:[#allocation29_spill] sm:$0xff] }
0x168b   :  { %6791 = vtanh.f32 %v4975_v20  ;;  %v4782_v4 = vrot.slane %v9898_v9, 7 }
0x168c   :  { %6793 = vtanh.f32 %v4976_v39  ;;  %v4811_v29 = vmul.f32 %v9494_v10, %v4779_v21 }
0x168d   :  { %v4940_v13 = vpop.permute.xlu0 %4939 }
0x168e   :  { %v4977_v7 = vadd.f32 %v4940_v13, %v4817_v25  ;;  %v4922_v53 = vpop.permute.xlu1 %4921 }
0x168f   :  { %v4968_v18 = vadd.f32 %v4922_v53, %v4808_v1  ;;  %v9901_v53 = vld [vmem:[#allocation19_spill] sm:$0xff] }
0x1690   :  { %6795 = vtanh.f32 %v4977_v7  ;;  %v4814_v7 = vmul.f32 %v9497_v52, %v4782_v4 }
0x1691   :  { %v4942_v58 = vpop.permute.xlu0 %4941 }
0x1692   :  { %v4978_v16 = vadd.f32 %v4942_v58, %v4818_v44  ;;  %v4948_v3 = vpop.permute.xlu1 %4947 }
0x1693   :  { %v4981_v55 = vadd.f32 %v4948_v3, %v4821_v32  ;;  %v5778_v32 = vpack.c.bf16 %v5105_v41, %v5104_v48 }
0x1694   :  { %6797 = vtanh.f32 %v4978_v16 }
0x1695   :  { %v6792_v5 = vpop.eup %6791  ;;  %v4944_v59 = vpop.permute.xlu0 %4943  ;;  %5779 = vmatprep.subr.bf16.mxu0 %v5778_v32 }
0x1696   :  { %5031 = vrot.lane.b32.xlu1 %v6792_v5, %s6994_s3  ;;  %v6794_v42 = vpop.eup %6793  ;;  %v4979_v45 = vadd.f32 %v4944_v59, %v4819_v49  ;;  %v4926_v60 = vpop.permute.xlu1 %4925  ;;  %v9899_v5 = vld [vmem:[#allocation23_spill] sm:$0xff]  ;;  %v9900_v59 = vld [vmem:[#allocation28_spill] sm:$0xff]  ;;  %5781 = vmatpush3.bf16.msra.mxu0 %v5778_v32 }
0x1697   :  { %5033 = vrot.lane.b32.xlu0 %v6794_v42, %s6994_s3  ;;  %v4970_v20 = vadd.f32 %v4926_v60, %v4810_v61  ;;  %v4780_v13 = vrot.slane %v9899_v5, 7  ;;  %v4781_v42 = vrot.slane %v9900_v59, 7  ;;  %v5107_v61 = vld [vmem:[#allocation8 + $0x18] sm:$0xff] }
0x1698   :  { %6799 = vtanh.f32 %v4979_v45 }
0x1699   :  { %v4920_v19 = vpop.permute.xlu0 %4919  ;;  %6801 = vtanh.f32 %v4968_v18  ;;  %v4812_v63 = vmul.f32 %v9501_v34, %v4780_v13  ;;  %v4813_v45 = vmul.f32 %v9506_v15, %v4781_v42 }
0x169a   :  { %v6796_v37 = vpop.eup %6795  ;;  %v4967_v0 = vadd.f32 %v4920_v19, %v4807_v56  ;;  %v4928_v39 = vpop.permute.xlu1 %4927  ;;  %v4790_v19 = vrot.slane %v9901_v53, 7 }
0x169b   :  { %5035 = vrot.lane.b32.xlu0 %v6796_v37, %s6994_s3  ;;  %v4971_v62 = vadd.f32 %v4928_v39, %v4811_v29 }
0x169c   :  { %6803 = vtanh.f32 %v4967_v0  ;;  %v4822_v0 = vmul.f32 %v9510_v47, %v4790_v19 }
0x169d   :  { %v4924_v43 = vpop.permute.xlu0 %4923 }
0x169e   :  { %v6798_v30 = vpop.eup %6797  ;;  %v4969_v8 = vadd.f32 %v4924_v43, %v4809_v26  ;;  %v4930_v49 = vpop.permute.xlu1 %4929 }
0x169f   :  { %5037 = vrot.lane.b32.xlu1 %v6798_v30, %s6994_s3  ;;  %v4972_v22 = vadd.f32 %v4930_v49, %v4812_v63 }
0x16a0   :  { %6805 = vtanh.f32 %v4969_v8  ;;  %v5106_v8 = vld [vmem:[#allocation8 + $0x10] sm:$0xff] }
0x16a1   :  { %v4946_v12 = vpop.permute.xlu0 %4945  ;;  %6807 = vtanh.f32 %v4970_v20 }
0x16a2   :  { %v6800_v57 = vpop.eup %6799  ;;  %v4980_v17 = vadd.f32 %v4946_v12, %v4820_v50  ;;  %6809 = vtanh.f32 %v4981_v55  ;;  %v4932_v1 = vpop.permute.xlu1 %4931  ;;  %v5782_v50 = vpack.c.bf16 %v5107_v61, %v5106_v8 }
0x16a3   :  { %5039 = vrot.lane.b32.xlu1 %v6800_v57, %s6994_s3  ;;  %v6802_v25 = vpop.eup %6801  ;;  %v4973_v37 = vadd.f32 %v4932_v1, %v4813_v45 }
0x16a4   :  { %6811 = vtanh.f32 %v4980_v17  ;;  %5783 = vmatprep.subr.bf16.mxu0 %v5782_v50 }
0x16a5   :  { %v4934_v58 = vpop.permute.xlu0 %4933  ;;  %6813 = vtanh.f32 %v4971_v62  ;;  %5785 = vmatpush3.bf16.msra.mxu0 %v5782_v50 }
0x16a6   :  { %v6804_v44 = vpop.eup %6803  ;;  %v4974_v16 = vadd.f32 %v4934_v58, %v4814_v7  ;;  %v4950_v26 = vpop.permute.xlu1 %4949 }
0x16a7   :  { %5017 = vrot.lane.b32.xlu1 %v6802_v25, %s6994_s3  ;;  %5015 = vrot.lane.b32.xlu0 %v6804_v44, %s6994_s3  ;;  %v4982_v36 = vadd.f32 %v4950_v26, %v4822_v0 }
0x16a8   :  { %6815 = vtanh.f32 %v4974_v16 }
0x16a9   :  { %6817 = vtanh.f32 %v4972_v22 }
0x16aa   :  { %v6806_v31 = vpop.eup %6805  ;;  %6819 = vtanh.f32 %v4973_v37  ;;  %v9565_v55 = vpop.permute.xlu1 %5085 }
0x16ab   :  { %5019 = vrot.lane.b32.xlu0 %v6806_v31, %s6994_s3  ;;  %v6808_v56 = vpop.eup %6807  ;;  %6821 = vtanh.f32 %v4982_v36 }
0x16ac   :  { %v6810_v33 = vpop.eup %6809  ;;  %5021 = vrot.lane.b32.xlu1 %v6808_v56, %s6994_s3 }
0x16ae   :  { %v6812_v18 = vpop.eup %6811 }
0x16af   :  { %5043 = vrot.lane.b32.xlu0 %v6810_v33, %s6994_s3  ;;  %v6814_v3 = vpop.eup %6813 }
0x16b0   :  { %5041 = vrot.lane.b32.xlu1 %v6812_v18, %s6994_s3 }
0x16b2   :  { %v6816_v43 = vpop.eup %6815 }
0x16b3   :  { %5023 = vrot.lane.b32.xlu0 %v6814_v3, %s6994_s3  ;;  %v6818_v30 = vpop.eup %6817 }
0x16b4   :  { %5029 = vrot.lane.b32.xlu1 %v6816_v43, %s6994_s3  ;;  %v6820_v6 = vpop.eup %6819 }
0x16b5   :  { %v6822_v35 = vpop.eup %6821 }
0x16b7   :  { %5025 = vrot.lane.b32.xlu0 %v6818_v30, %s6994_s3 }
0x16bb   :  { %5027 = vrot.lane.b32.xlu0 %v6820_v6, %s6994_s3 }
0x16bf   :  { %5045 = vrot.lane.b32.xlu0 %v6822_v35, %s6994_s3 }
0x1708   :  { %v5032_v60 = vpop.permute.xlu1 %5031 }
0x1709   :  { %v5034_v12 = vpop.permute.xlu0 %5033  ;;  %v5071_v4 = vmul.f32 %v9443_v14, %v5032_v60 }
0x170a   :  { %v5072_v29 = vmul.f32 %v9451_v23, %v5034_v12 }
0x170b   :  { %v9573_v7 = vadd.f32 %v9565_v55, %v5071_v4 }
0x170c   :  { %v9576_v44 = vadd.f32 %v9565_v55, %v5072_v29 }
0x170d   :  { %v5036_v21 = vpop.permute.xlu0 %5035  ;;  %v5145_v42 = vrot.slane %v9573_v7, 7 }
0x170e   :  { %v5073_v58 = vmul.f32 %v9456_v28, %v5036_v21  ;;  %v5146_v28 = vrot.slane %v9576_v44, 6 }
0x1710   :  { %v5147_v37 = vsel %vm840_vm1, %v5146_v28, %v5145_v42 }
0x1711   :  { %v5038_v57 = vpop.permute.xlu1 %5037 }
0x1712   :  { %v5074_v14 = vmul.f32 %v9461_v27, %v5038_v57  ;;  %v9591_v27 = vadd.f32 %v9565_v55, %v5073_v58 }
0x1714   :  { %v9595_v22 = vadd.f32 %v9565_v55, %v5074_v14  ;;  %v5148_v33 = vrot.slane %v9591_v27, 5 }
0x1715   :  { %v5040_v24 = vpop.permute.xlu1 %5039 }
0x1716   :  { %v5075_v23 = vmul.f32 %v9466_v46, %v5040_v24  ;;  %v5150_v36 = vrot.slane %v9595_v22, 4  ;;  %v5149_v50 = vsel %vm843_vm2, %v5148_v33, %v5147_v37  ;;  %v5270_v24 = vrot.slane %v9591_v27, 6 }
0x1718   :  { %v5151_v21 = vsel %vm846_vm3, %v5150_v36, %v5149_v50 }
0x1719   :  { %v5016_v20 = vpop.permute.xlu0 %5015  ;;  %v5018_v17 = vpop.permute.xlu1 %5017 }
0x171a   :  { %v5064_v39 = vmul.f32 %v9472_v51, %v5018_v17  ;;  %v5063_v25 = vmul.f32 %v9469_v40, %v5016_v20 }
0x171c   :  { %v5089_v51 = vadd.f32 %v9565_v55, %v5064_v39  ;;  %v9583_v40 = vadd.f32 %v9565_v55, %v5063_v25 }
0x171d   :  { %v5020_v9 = vpop.permute.xlu0 %5019 }
0x171e   :  { %v5022_v5 = vpop.permute.xlu1 %5021  ;;  %v5065_v13 = vmul.f32 %v9476_v2, %v5020_v9  ;;  %v5132_v31 = vrot.slane %v5089_v51, 6  ;;  %v5131_v45 = vrot.slane %v9583_v40, 7  ;;  %v5255_v43 = vrot.slane %v5089_v51, 7 }
0x171f   :  { %v5066_v2 = vmul.f32 %v9484_v54, %v5022_v5  ;;  %v9598_v54 = vadd.f32 %v9565_v55, %v5075_v23  ;;  %v5269_v51 = vrot.slane %v9576_v44, 7 }
0x1720   :  { %v5090_v63 = vadd.f32 %v9565_v55, %v5065_v13 }
0x1721   :  { %v5044_v62 = vpop.permute.xlu0 %5043  ;;  %v5152_v3 = vrot.slane %v9598_v54, 3 }
0x1722   :  { %v5042_v16 = vpop.permute.xlu1 %5041  ;;  %v5134_v1 = vrot.slane %v5090_v63, 5  ;;  %v5077_v56 = vmul.f32 %v9480_v38, %v5044_v62  ;;  %v5256_v18 = vrot.slane %v5090_v63, 6  ;;  %v5133_v38 = vsel %vm840_vm1, %v5132_v31, %v5131_v45 }
0x1723   :  { %v5076_v49 = vmul.f32 %v9488_v11, %v5042_v16  ;;  %v5091_v11 = vadd.f32 %v9565_v55, %v5066_v2  ;;  %v5153_v9 = vsel %vm849_vm4, %v5152_v3, %v5151_v21  ;;  %v5272_v2 = vrot.slane %v9595_v22, 5  ;;  %v5507_v3 = vld [vmem:[%s9734_s5] ss:$0 sm:$0xff]  ;;  %s6911_s5 = scalar_lea.vmem %s5315_s11, 256 }
0x1724   :  { %v5135_v6 = vsel %vm843_vm2, %v5134_v1, %v5133_v38  ;;  %v5102_v35 = vadd.f32 %v9565_v55, %v5077_v56  ;;  %v5257_v60 = vsel %vm840_vm1, %v5256_v18, %v5255_v43  ;;  %v5271_v22 = vsel %vm840_vm1, %v5270_v24, %v5269_v51  ;;  %v5510_v38 = vld [vmem:[%s9736_s7] ss:$0 sm:$0xff]  ;;  %p6912_p4 = scmp.ne.s32.totalorder %s5315_s11, %s6911_s5  ;;  %p6917_p6 = scmp.lt.s32.totalorder %s6911_s5, %s6911_s5 }
0x1725   :  { %v5024_v59 = vpop.permute.xlu0 %5023  ;;  %v9604_v53 = vadd.f32 %v9565_v55, %v5076_v49  ;;  %v5136_v30 = vrot.slane %v5091_v11, 4  ;;  %v5258_v41 = vrot.slane %v5091_v11, 5  ;;  %v5274_v49 = vrot.slane %v9598_v54, 4 }
0x1726   :  { %v5067_v46 = vmul.f32 %v9494_v10, %v5024_v59  ;;  %v5030_v0 = vpop.permute.xlu1 %5029  ;;  %v5156_v4 = vrot.slane %v5102_v35, 1  ;;  %v5273_v54 = vsel %vm843_vm2, %v5272_v2, %v5271_v22  ;;  %v5278_v11 = vrot.slane %v5102_v35, 2  ;;  %p6918_p7 = por %p6917_p6, %p6916_p5 }
0x1727   :  { %v5154_v8 = vrot.slane %v9604_v53, 2  ;;  %v5070_v32 = vmul.f32 %v9497_v52, %v5030_v0  ;;  %v5137_v52 = vsel %vm846_vm3, %v5136_v30, %v5135_v6  ;;  %v5259_v25 = vsel %vm843_vm2, %v5258_v41, %v5257_v60 }
0x1728   :  { %v5092_v19 = vadd.f32 %v9565_v55, %v5067_v46  ;;  %v5276_v27 = vrot.slane %v9604_v53, 3  ;;  %v5275_v45 = vsel %vm846_vm3, %v5274_v49, %v5273_v54  ;;  %p6919_p8 = pnand %p6918_p7, %p6912_p4 }
0x1729   :  { %v5026_v10 = vpop.permute.xlu0 %5025  ;;  %v5095_v39 = vadd.f32 %v9565_v55, %v5070_v32  ;;  %v5155_v13 = vsel %vm852_vm5, %v5154_v8, %v5153_v9 }
0x172a   :  { %v5068_v26 = vmul.f32 %v9501_v34, %v5026_v10  ;;  %v5138_v34 = vrot.slane %v5092_v19, 3  ;;  %v5260_v12 = vrot.slane %v5092_v19, 4  ;;  %v5157_v44 = vsel %vm855_vm6, %v5156_v4, %v5155_v13 }
0x172b   :  { %v5266_v46 = vrot.slane %v5095_v39, 1  ;;  %v5277_v56 = vsel %vm849_vm4, %v5276_v27, %v5275_v45 }
0x172c   :  { %v5093_v48 = vadd.f32 %v9565_v55, %v5068_v26  ;;  %v5139_v5 = vsel %vm849_vm4, %v5138_v34, %v5137_v52  ;;  %v5261_v62 = vsel %vm846_vm3, %v5260_v12, %v5259_v25  ;;  %v5279_v19 = vsel %vm852_vm5, %v5278_v11, %v5277_v56 }
0x172d   :  { %v5028_v61 = vpop.permute.xlu0 %5027 }
0x172e   :  { %v5069_v57 = vmul.f32 %v9506_v15, %v5028_v61  ;;  %v5140_v20 = vrot.slane %v5093_v48, 2  ;;  %v5262_v17 = vrot.slane %v5093_v48, 3 }
0x1730   :  { %v5094_v29 = vadd.f32 %v9565_v55, %v5069_v57  ;;  %v5263_v63 = vsel %vm849_vm4, %v5262_v17, %v5261_v62  ;;  %v5141_v16 = vsel %vm852_vm5, %v5140_v20, %v5139_v5 }
0x1731   :  { %v5046_v15 = vpop.permute.xlu0 %5045 }
0x1732   :  { %v5142_v58 = vrot.slane %v5094_v29, 1  ;;  %v5264_v14 = vrot.slane %v5094_v29, 2  ;;  %v5078_v23 = vmul.f32 %v9510_v47, %v5046_v15 }
0x1734   :  { %v5103_v59 = vadd.f32 %v9565_v55, %v5078_v23  ;;  %v5143_v42 = vsel %vm855_vm6, %v5142_v58, %v5141_v16  ;;  %v5265_v28 = vsel %vm852_vm5, %v5264_v14, %v5263_v63 }
0x1735   :  { %v5144_v47 = vsel %vm858_vm7, %v5095_v39, %v5143_v42  ;;  %v5267_v55 = vsel %vm855_vm6, %v5266_v46, %v5265_v28 }
0x1736   :  { %5159 = vrot.lane.b32.xlu1 %v5144_v47, %s6995_s23  ;;  %v5158_v31 = vsel %vm858_vm7, %v5103_v59, %v5157_v44  ;;  %v5280_v1 = vrot.slane %v5103_v59, 1  ;;  %v5268_v53 = vsel %vm858_vm7, %v9573_v7, %v5267_v55 }
0x1737   :  { %5161 = vrot.lane.b32.xlu0 %v5158_v31, %s6995_s23 }
0x1738   :  { %v5281_v10 = vsel %vm855_vm6, %v5280_v1, %v5279_v19 }
0x173a   :  { %5282 = vrot.lane.b32.xlu1 %v9583_v40, %s6995_s23 }
0x173b   :  { %5284 = vrot.lane.b32.xlu0 %v5268_v53, %s6995_s23 }
0x173e   :  { %5286 = vrot.lane.b32.xlu1 %v5281_v10, %s6995_s23 }
0x17a8   :  { %v5160_v37 = vpop.permute.xlu1 %5159 }
0x17a9   :  { %5707 = vmatprep.mubr.msk.f32.mxu0 %vm312_vm8, %v5160_v37  ;;  %v5162_v33 = vpop.permute.xlu0 %5161 }
0x17aa   :  { %5708 = vmatmul.mubr.msk.f32.vlgmr.msra.gmra.mrb[20].mxu0 %vm312_vm8, %v5162_v33 }
0x17ac   :  { %v5283_v18 = vpop.permute.xlu1 %5282 }
0x17ad   :  { %v5291_v40 = vsel %vm312_vm8, %v5283_v18, 0.0  ;;  %v5285_v0 = vpop.permute.xlu0 %5284 }
0x17ae   :  { %5294 = vst [vmem:[#allocation13 - $0x7] sm:$0x80] %v5291_v40  ;;  %v5292_v7 = vsel %vm312_vm8, %v5285_v0, 0.0 }
0x17af   :  { %5295 = vst [vmem:[#allocation13 + $0x1] sm:$0xff] %v5292_v7 }
0x17b0   :  { %v5287_v26 = vpop.permute.xlu1 %5286 }
0x17b1   :  { %v5293_v36 = vsel %vm312_vm8, %v5287_v26, 0.0 }
0x17b2   :  { %5296 = vst [vmem:[#allocation13 + $0x9] sm:$0x7f] %v5293_v36 }
0x187d   :  { %v5709_v43 = vpop.f32.mrb[20].mxu0 }
0x187e   :  { %v5239_v30 = vadd.f32 %v5709_v43, %v5507_v3  ;;  %v5233_v6 = vpop.f32.mrb[21].mxu0 }
0x187f   :  { %v5234_v35 = vadd.f32 %v5507_v3, %v5233_v6 }
0x1880   :  { %5243 = vst [vmem:[#allocation11 + $0x8] sm:$0xff] %v5239_v30  ;;  %v5252_v48 = vadd.f32 %v5510_v38, %v5239_v30 }
0x1881   :  { %5242 = vst [vmem:[#allocation11] sm:$0xff] %v5234_v35  ;;  %v5251_v41 = vadd.f32 %v5510_v38, %v5234_v35 }
0x1882   :  { %5254 = vst [vmem:[#allocation10 + $0x8] sm:$0xff] %v5252_v48 }
0x1883   :  { %6922 = shalt.err (!%p6919_p8)
}
0x1884   :  { %s6923_s1 = scalar_lea.hbm %s9738_s9, 256 }
0x1885   :  { %p6924_p9 = scmp.ne.s32.totalorder %s9738_s9, %s6923_s1  ;;  %p6927_p10 = scmp.lt.u32.totalorder %s6923_s1, %s9738_s9 }
0x1887   :  { %p6929_p11 = pnand %p6927_p10, %p6924_p9 }
0x1889   :  { %6932 = shalt.err (!%p6929_p11)
}
0x188a   :  { %5320 = dma.vmem_to_hbm [thread:$0]  %s5315_s11, 256, %s9738_s9, [#allocation12], %s6989_s25, %s6989_s25, %s6990_s26   ;;  %5253 = vst [vmem:[#allocation10] sm:$0xff] %v5251_v41 }
0x188b   :  { %s6933_s22 = scalar_lea.vmem %s9670_s13, 256  ;;  %p6938_p13 = scmp.lt.s32.totalorder %s9670_s13, %s9670_s13 }
0x188c   :  { %p6934_p12 = scmp.ne.s32.totalorder %s9670_s13, %s6933_s22  ;;  %p6939_p0 = scmp.lt.s32.totalorder %s6933_s22, %s6933_s22 }
0x188e   :  { %p6940_p1 = por %p6939_p0, %p6938_p13 }
0x1890   :  { %p6941_p2 = pnand %p6940_p1, %p6934_p12 }
0x1892   :  { %6944 = shalt.err (!%p6941_p2)
}
0x1893   :  { %s6945_s24 = scalar_lea.hbm %s9739_s10, 256 }
0x1894   :  { %p6946_p3 = scmp.ne.s32.totalorder %s9739_s10, %s6945_s24  ;;  %p6949_p4 = scmp.lt.u32.totalorder %s6945_s24, %s9739_s10 }
0x1896   :  { %p6951_p5 = pnand %p6949_p4, %p6946_p3 }
0x1898   :  { %6954 = shalt.err (!%p6951_p5)
}
0x1899   :  { %5332 = dma.vmem_to_hbm [thread:$0]  %s9670_s13, 256, %s9739_s10, [#allocation12], %s6989_s25, %s6989_s25, %s6990_s26  }
0x189a   :  { %s6955_s11 = scalar_lea.vmem %s9672_s17, 256  ;;  %p6960_p7 = scmp.lt.s32.totalorder %s9672_s17, %s9672_s17 }
0x189b   :  { %p6956_p6 = scmp.ne.s32.totalorder %s9672_s17, %s6955_s11  ;;  %p6961_p8 = scmp.lt.s32.totalorder %s6955_s11, %s6955_s11 }
0x189d   :  { %p6962_p9 = por %p6961_p8, %p6960_p7 }
0x189f   :  { %p6963_p10 = pnand %p6962_p9, %p6956_p6 }
0x18a1   :  { %6966 = shalt.err (!%p6963_p10)
}
0x18a2   :  { %s6967_s12 = scalar_lea.hbm %s9737_s8, 256 }
0x18a3   :  { %p6968_p11 = scmp.ne.s32.totalorder %s9737_s8, %s6967_s12  ;;  %p6971_p12 = scmp.lt.u32.totalorder %s6967_s12, %s9737_s8 }
0x18a5   :  { %p6973_p13 = pnand %p6971_p12, %p6968_p11 }
0x18a7   :  { %6976 = shalt.err (!%p6973_p13)
}
0x18a8   :  { %5308 = dma.vmem_to_hbm [thread:$0]  %s9672_s17, 256, %s9737_s8, [#allocation4], %s6989_s25, %s6989_s25, %s6990_s26  }
0x18a9   :  { %6983 = dma.done.wait [#allocation4], 256  }
0x18aa   :  { %6984 = vsyncadd [#allocation4], 4294967040 }
0x18ab   :  { %6985 = dma.done.wait [#allocation12], 512  }
0x18ac   :  { %6986 = vsyncadd [#allocation12], 4294966784 }
0x18ad   :  { %5342 = vsyncpa [#allocation3], 1 }
0x18ae   :  { %5343 = vsyncpa [#allocation6], 1 }
0x18af   :  { %5344 = vsyncpa [#allocation9], 1 }
0x18b0   :  { %5345 = vsyncpa [#allocation4], 1 }
0x18b1   :  { %5346 = vsyncpa [#allocation12], 1 }

</bundles_post_ra>
